<compile_context>
chip_gen: v6e
topology: v6e:2x2x1
jax: 0.10.0
libtpu: 0.0.40
codegen_flags: <defaults>
</compile_context>

<pallas_src>
import functools

import jax
import jax.numpy as jnp
from jax import lax
from jax.experimental import pallas as pl
from jax.experimental.pallas import tpu as pltpu

KW = 25                     # conv1 temporal kernel width
POOL_K = 75                 # AvgPool2d kernel (time)
POOL_S = 15                 # AvgPool2d stride (time)
POOL_R = POOL_K // POOL_S   # 5 segments per pooling window
CONV_NUMS = 40              # number of conv feature maps
BN_EPS = 1e-5
_LANE = 128
_MAX_CHUNK_LANES = 512      # keep per-chunk f32 accumulators inside 64 vregs


def _tap_groups(offset):
    """Static decomposition of the 25 conv taps for pooling offset i (0..14).

    Source time index: t = s*15 + i + k = (s + m)*15 + r, with m = (i+k)//15,
    r = (i+k)%15.  Taps sharing m form a contiguous run both in k and in r, so
    each run is one full-K matmul on a contiguous slice of the (r, c)-ordered
    x tile -- no im2col copy needed.  Returns [(m, k_lo, k_hi, r_lo), ...].
    """
    groups = []
    for m in range(3):
        k_lo = max(0, POOL_S * m - offset)
        k_hi = min(KW, POOL_S * (m + 1) - offset)
        if k_hi > k_lo:
            groups.append((m, k_lo, k_hi, offset + k_lo - POOL_S * m))
    return groups


def _shallow_feature_kernel(x_ref, w_ref, shift_ref, o_ref, seg_ref, *,
                            b_blk, n_seg, t_pool, chans_p, chunk_segs):
    """One batch block: fused conv+BN -> square -> AvgPool(75,15) -> safe_log.

    x_ref     : (1, POOL_S*chans_p, (n_seg+2)*b_blk)  bf16
                row  = r*chans_p + c  (r = time%15, c = channel)
                lane = q*b_blk + b'   (q = time//15, b' = batch-in-block)
    w_ref     : (CONV_NUMS, KW*chans_p) bf16, col = k*chans_p + c
                (conv1*conv2 fused, BN scale folded; padded channels are 0)
    shift_ref : (CONV_NUMS, 1) f32  BN shift (includes conv1 bias)
    o_ref     : (1, CONV_NUMS, t_pool*b_blk) f32, lane = p*b_blk + b'
    seg_ref   : (CONV_NUMS, n_seg*b_blk) f32 VMEM scratch: per-stride-15-segment
                sums of squared activations.
    """
    w = w_ref[...]
    shift = shift_ref[...]

    # Hoist every distinct weight lane-slice once (reused by all lane chunks;
    # slicing inside the loops would redo the relayout per use).
    w_slc = {}
    for i in range(POOL_S):
        for (_, k_lo, k_hi, _) in _tap_groups(i):
            if (k_lo, k_hi) not in w_slc:
                w_slc[(k_lo, k_hi)] = w[:, k_lo * chans_p:k_hi * chans_p]

    # ---- Stage 1: squared activations accumulated per stride-15 segment.
    # Lane dim processed in chunks of <= chunk_segs segments (<=512 lanes) so
    # the f32 accumulators stay inside the vreg file.
    n_chunks = -(-n_seg // chunk_segs)
    for ci in range(n_chunks):
        s0 = ci * chunk_segs
        segs = min(chunk_segs, n_seg - s0)
        nl = segs * b_blk
        shift_b = jnp.broadcast_to(shift, (CONV_NUMS, nl))  # hoisted broadcast
        acc = jnp.zeros((CONV_NUMS, nl), jnp.float32)
        for i in range(POOL_S):                 # offset inside each segment
            y = shift_b
            for (m, k_lo, k_hi, r_lo) in _tap_groups(i):
                r_hi = r_lo + (k_hi - k_lo)
                xk = x_ref[0,
                           r_lo * chans_p:r_hi * chans_p,
                           (s0 + m) * b_blk:(s0 + m + segs) * b_blk]
                y = y + jnp.dot(w_slc[(k_lo, k_hi)], xk,
                                preferred_element_type=jnp.float32)
            acc = acc + y * y
        seg_ref[:, s0 * b_blk:(s0 + segs) * b_blk] = acc

    # ---- Stage 2: each pooling window (width 75, stride 15) is the sum of
    # POOL_R=5 adjacent segments; lane shift by j*b_blk (128-aligned when
    # b_blk % 128 == 0).
    n_ochunks = -(-t_pool // chunk_segs)
    for ci in range(n_ochunks):
        p0 = ci * chunk_segs
        ps = min(chunk_segs, t_pool - p0)
        nl = ps * b_blk
        pooled = seg_ref[:, p0 * b_blk:(p0 + ps) * b_blk]
        for j in range(1, POOL_R):
            pooled = pooled + seg_ref[:, (p0 + j) * b_blk:(p0 + j + ps) * b_blk]
        pooled = pooled * (1.0 / POOL_K)
        # safe_log exactly as the PyTorch module: clip(log(x), 1e-7, 1e7)
        o_ref[0, :, p0 * b_blk:(p0 + ps) * b_blk] = jnp.clip(
            jnp.log(pooled), 1e-7, 1e7)


def _vmem_capacity_bytes():
    try:
        return int(pltpu.get_tpu_info().vmem_capacity_bytes)
    except Exception:
        return 64 * 1024 * 1024   # conservative: v7x per-TensorCore VMEM


def _pick_b_blk(batch, chans_p, n_seg, t_pool, vmem_bytes):
    """Batch-block size: generation-aware VMEM budget; lane-dense when possible."""
    nq = n_seg + 2
    per_elem = (2 * (POOL_S * chans_p) * nq * 2   # bf16 input tile, double-buffered
                + CONV_NUMS * n_seg * 4           # f32 segment scratch
                + 2 * CONV_NUMS * t_pool * 4)     # f32 output tile, double-buffered
    budget = int(0.40 * vmem_bytes)               # headroom for weights/compiler
    max_b = max(1, budget // max(per_elem, 1))
    # Keep >= 2 grid steps whenever batch allows: pipelining overlap, and both
    # TensorCores get work on v7x (grid axis is "parallel").
    target = -(-batch // 2) if batch >= 2 else 1
    # Cap at 128: lane width n_seg*b_blk is already >= 640 there, pooling lane
    # shifts / segment slices / output stores become 128-aligned, and larger
    # blocks only grow the statically-unrolled trace.
    b = max(1, min(max_b, target, _LANE))
    if b >= _LANE:
        b = (b // _LANE) * _LANE
    return int(b)


def init_params(key, num_classes, chans, samples):
    t1 = samples - KW + 1
    t_pool = (t1 - POOL_K) // POOL_S + 1
    ks = jax.random.split(key, 5)
    return dict(
        w1=0.1 * jax.random.normal(ks[0], (CONV_NUMS, 1, 1, KW), jnp.float32),
        b1=0.1 * jax.random.normal(ks[1], (CONV_NUMS,), jnp.float32),
        w2=0.1 * jax.random.normal(ks[2], (CONV_NUMS, CONV_NUMS, chans, 1),
                                   jnp.float32),
        gamma=jnp.ones((CONV_NUMS,), jnp.float32),
        beta=jnp.zeros((CONV_NUMS,), jnp.float32),
        run_mean=jnp.zeros((CONV_NUMS,), jnp.float32),
        run_var=jnp.ones((CONV_NUMS,), jnp.float32),
        wc=0.1 * jax.random.normal(ks[3], (num_classes, CONV_NUMS * t_pool),
                                   jnp.float32),
        bc=0.1 * jax.random.normal(ks[4], (num_classes,), jnp.float32),
    )


def shallow_convnet_forward(x, params):
    """x: (B, 1, chans, samples) float32 NCHW, matching the PyTorch module."""
    B, _, chans, samples = x.shape
    t1 = samples - KW + 1
    assert t1 >= POOL_K, "samples too short for the 75-wide pooling window"
    t_pool = (t1 - POOL_K) // POOL_S + 1
    n_seg = t_pool + POOL_R - 1          # stride-15 segments used by pooling
    nq = n_seg + 2                       # 15-wide time blocks the kernel touches
    chans_p = ((chans + 7) // 8) * 8     # sublane-aligned channel padding
    hp = lax.Precision.HIGHEST

    # ---- parameter folding (host/XLA side; tiny tensors) --------------------
    w1 = params["w1"][:, 0, 0, :]        # (40, 25)
    w2 = params["w2"][:, :, :, 0]        # (40, 40, chans)
    wkc = jnp.einsum("gfc,fk->gkc", w2, w1, precision=hp)    # (40, 25, chans)
    beff = jnp.einsum("gfc,f->g", w2, params["b1"], precision=hp)
    inv_std = 1.0 / jnp.sqrt(params["run_var"] + BN_EPS)
    scale = params["gamma"] * inv_std
    wkc = wkc * scale[:, None, None]
    wkc = jnp.pad(wkc, ((0, 0), (0, 0), (0, chans_p - chans)))
    w2d = wkc.reshape(CONV_NUMS, KW * chans_p).astype(jnp.bfloat16)
    shift = ((beff - params["run_mean"]) * scale
             + params["beta"])[:, None].astype(jnp.float32)          # (40, 1)

    # ---- generation-aware batch blocking ------------------------------------
    vmem_cap = _vmem_capacity_bytes()
    b_blk = _pick_b_blk(B, chans_p, n_seg, t_pool, vmem_cap)
    nb = pl.cdiv(B, b_blk)
    b_pad = nb * b_blk

    # ---- raw-x relayout (1x bytes, bf16; NO 25x im2col in HBM) --------------
    # x_r[n, r*chans_p + c, q*b_blk + b'] = x[n*b_blk + b', c, q*15 + r]
    Ttot = nq * POOL_S
    x2 = x[:, 0, :, :min(Ttot, samples)]
    x2 = jnp.pad(x2, ((0, b_pad - B), (0, chans_p - chans),
                      (0, max(0, Ttot - samples))))
    x_r = (x2.reshape(nb, b_blk, chans_p, nq, POOL_S)
             .transpose(0, 4, 2, 3, 1)
             .reshape(nb, POOL_S * chans_p, nq * b_blk)
             .astype(jnp.bfloat16))

    # ---- Pallas kernel: features (conv+BN+square+pool+safe_log) -------------
    chunk_segs = max(1, min(n_seg, _MAX_CHUNK_LANES // b_blk))
    kernel = functools.partial(_shallow_feature_kernel, b_blk=b_blk,
                               n_seg=n_seg, t_pool=t_pool, chans_p=chans_p,
                               chunk_segs=chunk_segs)
    cost = pl.CostEstimate(
        flops=2 * b_pad * CONV_NUMS * (KW * chans) * (n_seg * POOL_S),
        transcendentals=b_pad * CONV_NUMS * t_pool,
        bytes_accessed=(x_r.size * 2 + w2d.size * 2 + CONV_NUMS * 4
                        + nb * CONV_NUMS * t_pool * b_blk * 4))

    feats = pl.pallas_call(
        kernel,
        out_shape=jax.ShapeDtypeStruct((nb, CONV_NUMS, t_pool * b_blk),
                                       jnp.float32),
        grid=(nb,),
        in_specs=[
            pl.BlockSpec((1, POOL_S * chans_p, nq * b_blk),
                         lambda n: (n, 0, 0)),
            pl.BlockSpec((CONV_NUMS, KW * chans_p), lambda n: (0, 0)),
            pl.BlockSpec((CONV_NUMS, 1), lambda n: (0, 0)),
        ],
        out_specs=pl.BlockSpec((1, CONV_NUMS, t_pool * b_blk),
                               lambda n: (n, 0, 0)),
        scratch_shapes=[pltpu.VMEM((CONV_NUMS, n_seg * b_blk), jnp.float32)],
        compiler_params=pltpu.CompilerParams(
            dimension_semantics=("parallel",),
            vmem_limit_bytes=int(0.85 * vmem_cap)),
        cost_estimate=cost,
    )(x_r, w2d, shift)

    # ---- unpack lanes (p-major / b-minor) to the PyTorch flatten order ------
    feats = feats.reshape(nb, CONV_NUMS, t_pool, b_blk)
    feats = feats.transpose(0, 3, 1, 2).reshape(b_pad, CONV_NUMS * t_pool)[:B]

    # TODO(synk): nn.Dropout is inference-mode identity here (no train-mode RNG).
    # Final classifier: ONE matmul in the wrapper (tiny tensor; the flatten
    # above is pure layout plumbing).
    return jnp.dot(feats, params["wc"].T, precision=hp) + params["bc"][None, :]


def reference_forward(x, params):
    """Pure-JAX f32 reference mirroring the PyTorch module (inference mode)."""
    B, _, chans, samples = x.shape
    t1 = samples - KW + 1
    t_pool = (t1 - POOL_K) // POOL_S + 1
    hp = lax.Precision.HIGHEST
    w1 = params["w1"][:, 0, 0, :]
    w2 = params["w2"][:, :, :, 0]
    xin = x[:, 0]                                                  # (B, chans, samples)
    windows = jnp.stack([xin[:, :, k:k + t1] for k in range(KW)], axis=-1)
    out1 = (jnp.einsum("bctk,fk->bfct", windows, w1, precision=hp)
            + params["b1"][None, :, None, None])
    out2 = jnp.einsum("bfct,gfc->bgt", out1, w2, precision=hp)     # (B, 40, t1)
    bn = ((out2 - params["run_mean"][None, :, None])
          / jnp.sqrt(params["run_var"][None, :, None] + BN_EPS)
          * params["gamma"][None, :, None] + params["beta"][None, :, None])
    sq = bn * bn
    pooled = jnp.stack(
        [sq[:, :, p * POOL_S:p * POOL_S + POOL_K].mean(axis=-1)
         for p in range(t_pool)], axis=-1)                         # (B, 40, t_pool)
    lg = jnp.clip(jnp.log(pooled), 1e-7, 1e7)
    feat = lg.reshape(B, -1)
    return jnp.dot(feat, params["wc"].T, precision=hp) + params["bc"][None, :]


if __name__ == "__main__":
    num_classes, chans, samples, batch = 4, 4, 128, 2
    key = jax.random.PRNGKey(0)
    kp, kx = jax.random.split(key)
    params = init_params(kp, num_classes, chans, samples)
    x = jax.random.normal(kx, (batch, 1, chans, samples), jnp.float32)

    fwd = jax.jit(shallow_convnet_forward)
    out = jax.block_until_ready(fwd(x, params))

    ref = reference_forward(x, params)
    assert out.shape == (batch, num_classes)
    # bf16 matmul operands (per perf review) vs. f32 reference -> loosened tol.
    if not jnp.allclose(out, ref, rtol=2e-2, atol=1e-2):
        raise AssertionError(
            f"mismatch: max abs diff {float(jnp.max(jnp.abs(out - ref)))}")
    print("KERNEL_OK")
</pallas_src>

<mosaic_0001>
module attributes {stable_mosaic.version = 11 : i64} {
  func.func @_shallow_feature_kernel(%arg0: i32, %arg1: memref<1x120x8xbf16, #tpu.memory_space<vmem>>, %arg2: memref<40x200xbf16, #tpu.memory_space<vmem>>, %arg3: memref<40x1xf32, #tpu.memory_space<vmem>>, %arg4: memref<1x40x2xf32, #tpu.memory_space<vmem>>, %arg5: memref<40x6xf32, #tpu.memory_space<vmem>>) attributes {dimension_semantics = [#tpu.dimension_semantics<parallel>], iteration_bounds = array<i64: 2>, scalar_prefetch = 0 : i64, scratch_operands = 1 : i64, tpu.core_type = #tpu.core_type<tc>, window_params = [{transform_indices = @transform_0, window_bounds = array<i64: 1, 120, 8>}, {pipeline_mode = #tpu.pipeline_mode<synchronous>, transform_indices = @transform_1, window_bounds = array<i64: 40, 200>}, {pipeline_mode = #tpu.pipeline_mode<synchronous>, transform_indices = @transform_2, window_bounds = array<i64: 40, 1>}, {transform_indices = @transform_3, window_bounds = array<i64: 1, 40, 2>}]} {
    %c0 = arith.constant 0 : index
    %c0_0 = arith.constant 0 : index
    %0 = vector.load %arg2[%c0, %c0_0] : memref<40x200xbf16, #tpu.memory_space<vmem>>, vector<40x200xbf16>
    %c0_1 = arith.constant 0 : index
    %c0_2 = arith.constant 0 : index
    %1 = vector.load %arg3[%c0_1, %c0_2] : memref<40x1xf32, #tpu.memory_space<vmem>>, vector<40x1xf32>
    %2 = vector.extract_strided_slice %0 {offsets = [0, 0], sizes = [40, 120], strides = [1, 1]} : vector<40x200xbf16> to vector<40x120xbf16>
    %3 = vector.extract_strided_slice %0 {offsets = [0, 120], sizes = [40, 80], strides = [1, 1]} : vector<40x200xbf16> to vector<40x80xbf16>
    %4 = vector.extract_strided_slice %0 {offsets = [0, 0], sizes = [40, 112], strides = [1, 1]} : vector<40x200xbf16> to vector<40x112xbf16>
    %5 = vector.extract_strided_slice %0 {offsets = [0, 112], sizes = [40, 88], strides = [1, 1]} : vector<40x200xbf16> to vector<40x88xbf16>
    %6 = vector.extract_strided_slice %0 {offsets = [0, 0], sizes = [40, 104], strides = [1, 1]} : vector<40x200xbf16> to vector<40x104xbf16>
    %7 = vector.extract_strided_slice %0 {offsets = [0, 104], sizes = [40, 96], strides = [1, 1]} : vector<40x200xbf16> to vector<40x96xbf16>
    %8 = vector.extract_strided_slice %0 {offsets = [0, 0], sizes = [40, 96], strides = [1, 1]} : vector<40x200xbf16> to vector<40x96xbf16>
    %9 = vector.extract_strided_slice %0 {offsets = [0, 96], sizes = [40, 104], strides = [1, 1]} : vector<40x200xbf16> to vector<40x104xbf16>
    %10 = vector.extract_strided_slice %0 {offsets = [0, 0], sizes = [40, 88], strides = [1, 1]} : vector<40x200xbf16> to vector<40x88xbf16>
    %11 = vector.extract_strided_slice %0 {offsets = [0, 88], sizes = [40, 112], strides = [1, 1]} : vector<40x200xbf16> to vector<40x112xbf16>
    %12 = vector.extract_strided_slice %0 {offsets = [0, 0], sizes = [40, 80], strides = [1, 1]} : vector<40x200xbf16> to vector<40x80xbf16>
    %13 = vector.extract_strided_slice %0 {offsets = [0, 80], sizes = [40, 120], strides = [1, 1]} : vector<40x200xbf16> to vector<40x120xbf16>
    %14 = vector.extract_strided_slice %0 {offsets = [0, 0], sizes = [40, 72], strides = [1, 1]} : vector<40x200xbf16> to vector<40x72xbf16>
    %15 = vector.extract_strided_slice %0 {offsets = [0, 72], sizes = [40, 120], strides = [1, 1]} : vector<40x200xbf16> to vector<40x120xbf16>
    %16 = vector.extract_strided_slice %0 {offsets = [0, 192], sizes = [40, 8], strides = [1, 1]} : vector<40x200xbf16> to vector<40x8xbf16>
    %17 = vector.extract_strided_slice %0 {offsets = [0, 0], sizes = [40, 64], strides = [1, 1]} : vector<40x200xbf16> to vector<40x64xbf16>
    %18 = vector.extract_strided_slice %0 {offsets = [0, 64], sizes = [40, 120], strides = [1, 1]} : vector<40x200xbf16> to vector<40x120xbf16>
    %19 = vector.extract_strided_slice %0 {offsets = [0, 184], sizes = [40, 16], strides = [1, 1]} : vector<40x200xbf16> to vector<40x16xbf16>
    %20 = vector.extract_strided_slice %0 {offsets = [0, 0], sizes = [40, 56], strides = [1, 1]} : vector<40x200xbf16> to vector<40x56xbf16>
    %21 = vector.extract_strided_slice %0 {offsets = [0, 56], sizes = [40, 120], strides = [1, 1]} : vector<40x200xbf16> to vector<40x120xbf16>
    %22 = vector.extract_strided_slice %0 {offsets = [0, 176], sizes = [40, 24], strides = [1, 1]} : vector<40x200xbf16> to vector<40x24xbf16>
    %23 = vector.extract_strided_slice %0 {offsets = [0, 0], sizes = [40, 48], strides = [1, 1]} : vector<40x200xbf16> to vector<40x48xbf16>
    %24 = vector.extract_strided_slice %0 {offsets = [0, 48], sizes = [40, 120], strides = [1, 1]} : vector<40x200xbf16> to vector<40x120xbf16>
    %25 = vector.extract_strided_slice %0 {offsets = [0, 168], sizes = [40, 32], strides = [1, 1]} : vector<40x200xbf16> to vector<40x32xbf16>
    %26 = vector.extract_strided_slice %0 {offsets = [0, 0], sizes = [40, 40], strides = [1, 1]} : vector<40x200xbf16> to vector<40x40xbf16>
    %27 = vector.extract_strided_slice %0 {offsets = [0, 40], sizes = [40, 120], strides = [1, 1]} : vector<40x200xbf16> to vector<40x120xbf16>
    %28 = vector.extract_strided_slice %0 {offsets = [0, 160], sizes = [40, 40], strides = [1, 1]} : vector<40x200xbf16> to vector<40x40xbf16>
    %29 = vector.extract_strided_slice %0 {offsets = [0, 0], sizes = [40, 32], strides = [1, 1]} : vector<40x200xbf16> to vector<40x32xbf16>
    %30 = vector.extract_strided_slice %0 {offsets = [0, 32], sizes = [40, 120], strides = [1, 1]} : vector<40x200xbf16> to vector<40x120xbf16>
    %31 = vector.extract_strided_slice %0 {offsets = [0, 152], sizes = [40, 48], strides = [1, 1]} : vector<40x200xbf16> to vector<40x48xbf16>
    %32 = vector.extract_strided_slice %0 {offsets = [0, 0], sizes = [40, 24], strides = [1, 1]} : vector<40x200xbf16> to vector<40x24xbf16>
    %33 = vector.extract_strided_slice %0 {offsets = [0, 24], sizes = [40, 120], strides = [1, 1]} : vector<40x200xbf16> to vector<40x120xbf16>
    %34 = vector.extract_strided_slice %0 {offsets = [0, 144], sizes = [40, 56], strides = [1, 1]} : vector<40x200xbf16> to vector<40x56xbf16>
    %35 = vector.extract_strided_slice %0 {offsets = [0, 0], sizes = [40, 16], strides = [1, 1]} : vector<40x200xbf16> to vector<40x16xbf16>
    %36 = vector.extract_strided_slice %0 {offsets = [0, 16], sizes = [40, 120], strides = [1, 1]} : vector<40x200xbf16> to vector<40x120xbf16>
    %37 = vector.extract_strided_slice %0 {offsets = [0, 136], sizes = [40, 64], strides = [1, 1]} : vector<40x200xbf16> to vector<40x64xbf16>
    %38 = vector.extract_strided_slice %0 {offsets = [0, 0], sizes = [40, 8], strides = [1, 1]} : vector<40x200xbf16> to vector<40x8xbf16>
    %39 = vector.extract_strided_slice %0 {offsets = [0, 8], sizes = [40, 120], strides = [1, 1]} : vector<40x200xbf16> to vector<40x120xbf16>
    %40 = vector.extract_strided_slice %0 {offsets = [0, 128], sizes = [40, 72], strides = [1, 1]} : vector<40x200xbf16> to vector<40x72xbf16>
    %41 = vector.shape_cast %1 : vector<40x1xf32> to vector<40x1xf32>
    %42 = vector.broadcast %41 : vector<40x1xf32> to vector<40x6xf32>
    %cst = arith.constant 0.000000e+00 : f32
    %43 = vector.broadcast %cst : f32 to vector<40x6xf32>
    %c0_3 = arith.constant 0 : index
    %c0_4 = arith.constant 0 : index
    %c0_5 = arith.constant 0 : index
    %44 = vector.load %arg1[%c0_3, %c0_4, %c0_5] : memref<1x120x8xbf16, #tpu.memory_space<vmem>>, vector<1x120x6xbf16>
    %45 = vector.shape_cast %44 : vector<1x120x6xbf16> to vector<120x6xbf16>
    %cst_6 = arith.constant dense<0.000000e+00> : vector<40x6xf32>
    %46 = tpu.matmul %2, %45, %cst_6 {dimension_numbers = #tpu.dot_dimension_numbers<[1], [0], [0], [1], [0, 0, 1, 1], [], []>} : vector<40x120xbf16>, vector<120x6xbf16>, vector<40x6xf32> -> vector<40x6xf32>
    %47 = arith.addf %42, %46 : vector<40x6xf32>
    %c0_7 = arith.constant 0 : index
    %c0_8 = arith.constant 0 : index
    %c1 = arith.constant 1 : index
    %48 = vector.load %arg1[%c0_7, %c0_8, %c1] : memref<1x120x8xbf16, #tpu.memory_space<vmem>>, vector<1x80x6xbf16>
    %49 = vector.shape_cast %48 : vector<1x80x6xbf16> to vector<80x6xbf16>
    %cst_9 = arith.constant dense<0.000000e+00> : vector<40x6xf32>
    %50 = tpu.matmul %3, %49, %cst_9 {dimension_numbers = #tpu.dot_dimension_numbers<[1], [0], [0], [1], [0, 0, 1, 1], [], []>} : vector<40x80xbf16>, vector<80x6xbf16>, vector<40x6xf32> -> vector<40x6xf32>
    %51 = arith.addf %47, %50 : vector<40x6xf32>
    %52 = arith.mulf %51, %51 : vector<40x6xf32>
    %53 = arith.addf %43, %52 : vector<40x6xf32>
    %c0_10 = arith.constant 0 : index
    %c8 = arith.constant 8 : index
    %c0_11 = arith.constant 0 : index
    %54 = vector.load %arg1[%c0_10, %c8, %c0_11] : memref<1x120x8xbf16, #tpu.memory_space<vmem>>, vector<1x112x6xbf16>
    %55 = vector.shape_cast %54 : vector<1x112x6xbf16> to vector<112x6xbf16>
    %cst_12 = arith.constant dense<0.000000e+00> : vector<40x6xf32>
    %56 = tpu.matmul %4, %55, %cst_12 {dimension_numbers = #tpu.dot_dimension_numbers<[1], [0], [0], [1], [0, 0, 1, 1], [], []>} : vector<40x112xbf16>, vector<112x6xbf16>, vector<40x6xf32> -> vector<40x6xf32>
    %57 = arith.addf %42, %56 : vector<40x6xf32>
    %c0_13 = arith.constant 0 : index
    %c0_14 = arith.constant 0 : index
    %c1_15 = arith.constant 1 : index
    %58 = vector.load %arg1[%c0_13, %c0_14, %c1_15] : memref<1x120x8xbf16, #tpu.memory_space<vmem>>, vector<1x88x6xbf16>
    %59 = vector.shape_cast %58 : vector<1x88x6xbf16> to vector<88x6xbf16>
    %cst_16 = arith.constant dense<0.000000e+00> : vector<40x6xf32>
    %60 = tpu.matmul %5, %59, %cst_16 {dimension_numbers = #tpu.dot_dimension_numbers<[1], [0], [0], [1], [0, 0, 1, 1], [], []>} : vector<40x88xbf16>, vector<88x6xbf16>, vector<40x6xf32> -> vector<40x6xf32>
    %61 = arith.addf %57, %60 : vector<40x6xf32>
    %62 = arith.mulf %61, %61 : vector<40x6xf32>
    %63 = arith.addf %53, %62 : vector<40x6xf32>
    %c0_17 = arith.constant 0 : index
    %c16 = arith.constant 16 : index
    %c0_18 = arith.constant 0 : index
    %64 = vector.load %arg1[%c0_17, %c16, %c0_18] : memref<1x120x8xbf16, #tpu.memory_space<vmem>>, vector<1x104x6xbf16>
    %65 = vector.shape_cast %64 : vector<1x104x6xbf16> to vector<104x6xbf16>
    %cst_19 = arith.constant dense<0.000000e+00> : vector<40x6xf32>
    %66 = tpu.matmul %6, %65, %cst_19 {dimension_numbers = #tpu.dot_dimension_numbers<[1], [0], [0], [1], [0, 0, 1, 1], [], []>} : vector<40x104xbf16>, vector<104x6xbf16>, vector<40x6xf32> -> vector<40x6xf32>
    %67 = arith.addf %42, %66 : vector<40x6xf32>
    %c0_20 = arith.constant 0 : index
    %c0_21 = arith.constant 0 : index
    %c1_22 = arith.constant 1 : index
    %68 = vector.load %arg1[%c0_20, %c0_21, %c1_22] : memref<1x120x8xbf16, #tpu.memory_space<vmem>>, vector<1x96x6xbf16>
    %69 = vector.shape_cast %68 : vector<1x96x6xbf16> to vector<96x6xbf16>
    %cst_23 = arith.constant dense<0.000000e+00> : vector<40x6xf32>
    %70 = tpu.matmul %7, %69, %cst_23 {dimension_numbers = #tpu.dot_dimension_numbers<[1], [0], [0], [1], [0, 0, 1, 1], [], []>} : vector<40x96xbf16>, vector<96x6xbf16>, vector<40x6xf32> -> vector<40x6xf32>
    %71 = arith.addf %67, %70 : vector<40x6xf32>
    %72 = arith.mulf %71, %71 : vector<40x6xf32>
    %73 = arith.addf %63, %72 : vector<40x6xf32>
    %c0_24 = arith.constant 0 : index
    %c24 = arith.constant 24 : index
    %c0_25 = arith.constant 0 : index
    %74 = vector.load %arg1[%c0_24, %c24, %c0_25] : memref<1x120x8xbf16, #tpu.memory_space<vmem>>, vector<1x96x6xbf16>
    %75 = vector.shape_cast %74 : vector<1x96x6xbf16> to vector<96x6xbf16>
    %cst_26 = arith.constant dense<0.000000e+00> : vector<40x6xf32>
    %76 = tpu.matmul %8, %75, %cst_26 {dimension_numbers = #tpu.dot_dimension_numbers<[1], [0], [0], [1], [0, 0, 1, 1], [], []>} : vector<40x96xbf16>, vector<96x6xbf16>, vector<40x6xf32> -> vector<40x6xf32>
    %77 = arith.addf %42, %76 : vector<40x6xf32>
    %c0_27 = arith.constant 0 : index
    %c0_28 = arith.constant 0 : index
    %c1_29 = arith.constant 1 : index
    %78 = vector.load %arg1[%c0_27, %c0_28, %c1_29] : memref<1x120x8xbf16, #tpu.memory_space<vmem>>, vector<1x104x6xbf16>
    %79 = vector.shape_cast %78 : vector<1x104x6xbf16> to vector<104x6xbf16>
    %cst_30 = arith.constant dense<0.000000e+00> : vector<40x6xf32>
    %80 = tpu.matmul %9, %79, %cst_30 {dimension_numbers = #tpu.dot_dimension_numbers<[1], [0], [0], [1], [0, 0, 1, 1], [], []>} : vector<40x104xbf16>, vector<104x6xbf16>, vector<40x6xf32> -> vector<40x6xf32>
    %81 = arith.addf %77, %80 : vector<40x6xf32>
    %82 = arith.mulf %81, %81 : vector<40x6xf32>
    %83 = arith.addf %73, %82 : vector<40x6xf32>
    %c0_31 = arith.constant 0 : index
    %c32 = arith.constant 32 : index
    %c0_32 = arith.constant 0 : index
    %84 = vector.load %arg1[%c0_31, %c32, %c0_32] : memref<1x120x8xbf16, #tpu.memory_space<vmem>>, vector<1x88x6xbf16>
    %85 = vector.shape_cast %84 : vector<1x88x6xbf16> to vector<88x6xbf16>
    %cst_33 = arith.constant dense<0.000000e+00> : vector<40x6xf32>
    %86 = tpu.matmul %10, %85, %cst_33 {dimension_numbers = #tpu.dot_dimension_numbers<[1], [0], [0], [1], [0, 0, 1, 1], [], []>} : vector<40x88xbf16>, vector<88x6xbf16>, vector<40x6xf32> -> vector<40x6xf32>
    %87 = arith.addf %42, %86 : vector<40x6xf32>
    %c0_34 = arith.constant 0 : index
    %c0_35 = arith.constant 0 : index
    %c1_36 = arith.constant 1 : index
    %88 = vector.load %arg1[%c0_34, %c0_35, %c1_36] : memref<1x120x8xbf16, #tpu.memory_space<vmem>>, vector<1x112x6xbf16>
    %89 = vector.shape_cast %88 : vector<1x112x6xbf16> to vector<112x6xbf16>
    %cst_37 = arith.constant dense<0.000000e+00> : vector<40x6xf32>
    %90 = tpu.matmul %11, %89, %cst_37 {dimension_numbers = #tpu.dot_dimension_numbers<[1], [0], [0], [1], [0, 0, 1, 1], [], []>} : vector<40x112xbf16>, vector<112x6xbf16>, vector<40x6xf32> -> vector<40x6xf32>
    %91 = arith.addf %87, %90 : vector<40x6xf32>
    %92 = arith.mulf %91, %91 : vector<40x6xf32>
    %93 = arith.addf %83, %92 : vector<40x6xf32>
    %c0_38 = arith.constant 0 : index
    %c40 = arith.constant 40 : index
    %c0_39 = arith.constant 0 : index
    %94 = vector.load %arg1[%c0_38, %c40, %c0_39] : memref<1x120x8xbf16, #tpu.memory_space<vmem>>, vector<1x80x6xbf16>
    %95 = vector.shape_cast %94 : vector<1x80x6xbf16> to vector<80x6xbf16>
    %cst_40 = arith.constant dense<0.000000e+00> : vector<40x6xf32>
    %96 = tpu.matmul %12, %95, %cst_40 {dimension_numbers = #tpu.dot_dimension_numbers<[1], [0], [0], [1], [0, 0, 1, 1], [], []>} : vector<40x80xbf16>, vector<80x6xbf16>, vector<40x6xf32> -> vector<40x6xf32>
    %97 = arith.addf %42, %96 : vector<40x6xf32>
    %c0_41 = arith.constant 0 : index
    %c0_42 = arith.constant 0 : index
    %c1_43 = arith.constant 1 : index
    %98 = vector.load %arg1[%c0_41, %c0_42, %c1_43] : memref<1x120x8xbf16, #tpu.memory_space<vmem>>, vector<1x120x6xbf16>
    %99 = vector.shape_cast %98 : vector<1x120x6xbf16> to vector<120x6xbf16>
    %cst_44 = arith.constant dense<0.000000e+00> : vector<40x6xf32>
    %100 = tpu.matmul %13, %99, %cst_44 {dimension_numbers = #tpu.dot_dimension_numbers<[1], [0], [0], [1], [0, 0, 1, 1], [], []>} : vector<40x120xbf16>, vector<120x6xbf16>, vector<40x6xf32> -> vector<40x6xf32>
    %101 = arith.addf %97, %100 : vector<40x6xf32>
    %102 = arith.mulf %101, %101 : vector<40x6xf32>
    %103 = arith.addf %93, %102 : vector<40x6xf32>
    %c0_45 = arith.constant 0 : index
    %c48 = arith.constant 48 : index
    %c0_46 = arith.constant 0 : index
    %104 = vector.load %arg1[%c0_45, %c48, %c0_46] : memref<1x120x8xbf16, #tpu.memory_space<vmem>>, vector<1x72x6xbf16>
    %105 = vector.shape_cast %104 : vector<1x72x6xbf16> to vector<72x6xbf16>
    %cst_47 = arith.constant dense<0.000000e+00> : vector<40x6xf32>
    %106 = tpu.matmul %14, %105, %cst_47 {dimension_numbers = #tpu.dot_dimension_numbers<[1], [0], [0], [1], [0, 0, 1, 1], [], []>} : vector<40x72xbf16>, vector<72x6xbf16>, vector<40x6xf32> -> vector<40x6xf32>
    %107 = arith.addf %42, %106 : vector<40x6xf32>
    %c0_48 = arith.constant 0 : index
    %c0_49 = arith.constant 0 : index
    %c1_50 = arith.constant 1 : index
    %108 = vector.load %arg1[%c0_48, %c0_49, %c1_50] : memref<1x120x8xbf16, #tpu.memory_space<vmem>>, vector<1x120x6xbf16>
    %109 = vector.shape_cast %108 : vector<1x120x6xbf16> to vector<120x6xbf16>
    %cst_51 = arith.constant dense<0.000000e+00> : vector<40x6xf32>
    %110 = tpu.matmul %15, %109, %cst_51 {dimension_numbers = #tpu.dot_dimension_numbers<[1], [0], [0], [1], [0, 0, 1, 1], [], []>} : vector<40x120xbf16>, vector<120x6xbf16>, vector<40x6xf32> -> vector<40x6xf32>
    %111 = arith.addf %107, %110 : vector<40x6xf32>
    %c0_52 = arith.constant 0 : index
    %c0_53 = arith.constant 0 : index
    %c2 = arith.constant 2 : index
    %112 = vector.load %arg1[%c0_52, %c0_53, %c2] : memref<1x120x8xbf16, #tpu.memory_space<vmem>>, vector<1x8x6xbf16>
    %113 = vector.shape_cast %112 : vector<1x8x6xbf16> to vector<8x6xbf16>
    %cst_54 = arith.constant dense<0.000000e+00> : vector<40x6xf32>
    %114 = tpu.matmul %16, %113, %cst_54 {dimension_numbers = #tpu.dot_dimension_numbers<[1], [0], [0], [1], [0, 0, 1, 1], [], []>} : vector<40x8xbf16>, vector<8x6xbf16>, vector<40x6xf32> -> vector<40x6xf32>
    %115 = arith.addf %111, %114 : vector<40x6xf32>
    %116 = arith.mulf %115, %115 : vector<40x6xf32>
    %117 = arith.addf %103, %116 : vector<40x6xf32>
    %c0_55 = arith.constant 0 : index
    %c56 = arith.constant 56 : index
    %c0_56 = arith.constant 0 : index
    %118 = vector.load %arg1[%c0_55, %c56, %c0_56] : memref<1x120x8xbf16, #tpu.memory_space<vmem>>, vector<1x64x6xbf16>
    %119 = vector.shape_cast %118 : vector<1x64x6xbf16> to vector<64x6xbf16>
    %cst_57 = arith.constant dense<0.000000e+00> : vector<40x6xf32>
    %120 = tpu.matmul %17, %119, %cst_57 {dimension_numbers = #tpu.dot_dimension_numbers<[1], [0], [0], [1], [0, 0, 1, 1], [], []>} : vector<40x64xbf16>, vector<64x6xbf16>, vector<40x6xf32> -> vector<40x6xf32>
    %121 = arith.addf %42, %120 : vector<40x6xf32>
    %c0_58 = arith.constant 0 : index
    %c0_59 = arith.constant 0 : index
    %c1_60 = arith.constant 1 : index
    %122 = vector.load %arg1[%c0_58, %c0_59, %c1_60] : memref<1x120x8xbf16, #tpu.memory_space<vmem>>, vector<1x120x6xbf16>
    %123 = vector.shape_cast %122 : vector<1x120x6xbf16> to vector<120x6xbf16>
    %cst_61 = arith.constant dense<0.000000e+00> : vector<40x6xf32>
    %124 = tpu.matmul %18, %123, %cst_61 {dimension_numbers = #tpu.dot_dimension_numbers<[1], [0], [0], [1], [0, 0, 1, 1], [], []>} : vector<40x120xbf16>, vector<120x6xbf16>, vector<40x6xf32> -> vector<40x6xf32>
    %125 = arith.addf %121, %124 : vector<40x6xf32>
    %c0_62 = arith.constant 0 : index
    %c0_63 = arith.constant 0 : index
    %c2_64 = arith.constant 2 : index
    %126 = vector.load %arg1[%c0_62, %c0_63, %c2_64] : memref<1x120x8xbf16, #tpu.memory_space<vmem>>, vector<1x16x6xbf16>
    %127 = vector.shape_cast %126 : vector<1x16x6xbf16> to vector<16x6xbf16>
    %cst_65 = arith.constant dense<0.000000e+00> : vector<40x6xf32>
    %128 = tpu.matmul %19, %127, %cst_65 {dimension_numbers = #tpu.dot_dimension_numbers<[1], [0], [0], [1], [0, 0, 1, 1], [], []>} : vector<40x16xbf16>, vector<16x6xbf16>, vector<40x6xf32> -> vector<40x6xf32>
    %129 = arith.addf %125, %128 : vector<40x6xf32>
    %130 = arith.mulf %129, %129 : vector<40x6xf32>
    %131 = arith.addf %117, %130 : vector<40x6xf32>
    %c0_66 = arith.constant 0 : index
    %c64 = arith.constant 64 : index
    %c0_67 = arith.constant 0 : index
    %132 = vector.load %arg1[%c0_66, %c64, %c0_67] : memref<1x120x8xbf16, #tpu.memory_space<vmem>>, vector<1x56x6xbf16>
    %133 = vector.shape_cast %132 : vector<1x56x6xbf16> to vector<56x6xbf16>
    %cst_68 = arith.constant dense<0.000000e+00> : vector<40x6xf32>
    %134 = tpu.matmul %20, %133, %cst_68 {dimension_numbers = #tpu.dot_dimension_numbers<[1], [0], [0], [1], [0, 0, 1, 1], [], []>} : vector<40x56xbf16>, vector<56x6xbf16>, vector<40x6xf32> -> vector<40x6xf32>
    %135 = arith.addf %42, %134 : vector<40x6xf32>
    %c0_69 = arith.constant 0 : index
    %c0_70 = arith.constant 0 : index
    %c1_71 = arith.constant 1 : index
    %136 = vector.load %arg1[%c0_69, %c0_70, %c1_71] : memref<1x120x8xbf16, #tpu.memory_space<vmem>>, vector<1x120x6xbf16>
    %137 = vector.shape_cast %136 : vector<1x120x6xbf16> to vector<120x6xbf16>
    %cst_72 = arith.constant dense<0.000000e+00> : vector<40x6xf32>
    %138 = tpu.matmul %21, %137, %cst_72 {dimension_numbers = #tpu.dot_dimension_numbers<[1], [0], [0], [1], [0, 0, 1, 1], [], []>} : vector<40x120xbf16>, vector<120x6xbf16>, vector<40x6xf32> -> vector<40x6xf32>
    %139 = arith.addf %135, %138 : vector<40x6xf32>
    %c0_73 = arith.constant 0 : index
    %c0_74 = arith.constant 0 : index
    %c2_75 = arith.constant 2 : index
    %140 = vector.load %arg1[%c0_73, %c0_74, %c2_75] : memref<1x120x8xbf16, #tpu.memory_space<vmem>>, vector<1x24x6xbf16>
    %141 = vector.shape_cast %140 : vector<1x24x6xbf16> to vector<24x6xbf16>
    %cst_76 = arith.constant dense<0.000000e+00> : vector<40x6xf32>
    %142 = tpu.matmul %22, %141, %cst_76 {dimension_numbers = #tpu.dot_dimension_numbers<[1], [0], [0], [1], [0, 0, 1, 1], [], []>} : vector<40x24xbf16>, vector<24x6xbf16>, vector<40x6xf32> -> vector<40x6xf32>
    %143 = arith.addf %139, %142 : vector<40x6xf32>
    %144 = arith.mulf %143, %143 : vector<40x6xf32>
    %145 = arith.addf %131, %144 : vector<40x6xf32>
    %c0_77 = arith.constant 0 : index
    %c72 = arith.constant 72 : index
    %c0_78 = arith.constant 0 : index
    %146 = vector.load %arg1[%c0_77, %c72, %c0_78] : memref<1x120x8xbf16, #tpu.memory_space<vmem>>, vector<1x48x6xbf16>
    %147 = vector.shape_cast %146 : vector<1x48x6xbf16> to vector<48x6xbf16>
    %cst_79 = arith.constant dense<0.000000e+00> : vector<40x6xf32>
    %148 = tpu.matmul %23, %147, %cst_79 {dimension_numbers = #tpu.dot_dimension_numbers<[1], [0], [0], [1], [0, 0, 1, 1], [], []>} : vector<40x48xbf16>, vector<48x6xbf16>, vector<40x6xf32> -> vector<40x6xf32>
    %149 = arith.addf %42, %148 : vector<40x6xf32>
    %c0_80 = arith.constant 0 : index
    %c0_81 = arith.constant 0 : index
    %c1_82 = arith.constant 1 : index
    %150 = vector.load %arg1[%c0_80, %c0_81, %c1_82] : memref<1x120x8xbf16, #tpu.memory_space<vmem>>, vector<1x120x6xbf16>
    %151 = vector.shape_cast %150 : vector<1x120x6xbf16> to vector<120x6xbf16>
    %cst_83 = arith.constant dense<0.000000e+00> : vector<40x6xf32>
    %152 = tpu.matmul %24, %151, %cst_83 {dimension_numbers = #tpu.dot_dimension_numbers<[1], [0], [0], [1], [0, 0, 1, 1], [], []>} : vector<40x120xbf16>, vector<120x6xbf16>, vector<40x6xf32> -> vector<40x6xf32>
    %153 = arith.addf %149, %152 : vector<40x6xf32>
    %c0_84 = arith.constant 0 : index
    %c0_85 = arith.constant 0 : index
    %c2_86 = arith.constant 2 : index
    %154 = vector.load %arg1[%c0_84, %c0_85, %c2_86] : memref<1x120x8xbf16, #tpu.memory_space<vmem>>, vector<1x32x6xbf16>
    %155 = vector.shape_cast %154 : vector<1x32x6xbf16> to vector<32x6xbf16>
    %cst_87 = arith.constant dense<0.000000e+00> : vector<40x6xf32>
    %156 = tpu.matmul %25, %155, %cst_87 {dimension_numbers = #tpu.dot_dimension_numbers<[1], [0], [0], [1], [0, 0, 1, 1], [], []>} : vector<40x32xbf16>, vector<32x6xbf16>, vector<40x6xf32> -> vector<40x6xf32>
    %157 = arith.addf %153, %156 : vector<40x6xf32>
    %158 = arith.mulf %157, %157 : vector<40x6xf32>
    %159 = arith.addf %145, %158 : vector<40x6xf32>
    %c0_88 = arith.constant 0 : index
    %c80 = arith.constant 80 : index
    %c0_89 = arith.constant 0 : index
    %160 = vector.load %arg1[%c0_88, %c80, %c0_89] : memref<1x120x8xbf16, #tpu.memory_space<vmem>>, vector<1x40x6xbf16>
    %161 = vector.shape_cast %160 : vector<1x40x6xbf16> to vector<40x6xbf16>
    %cst_90 = arith.constant dense<0.000000e+00> : vector<40x6xf32>
    %162 = tpu.matmul %26, %161, %cst_90 {dimension_numbers = #tpu.dot_dimension_numbers<[1], [0], [0], [1], [0, 0, 1, 1], [], []>} : vector<40x40xbf16>, vector<40x6xbf16>, vector<40x6xf32> -> vector<40x6xf32>
    %163 = arith.addf %42, %162 : vector<40x6xf32>
    %c0_91 = arith.constant 0 : index
    %c0_92 = arith.constant 0 : index
    %c1_93 = arith.constant 1 : index
    %164 = vector.load %arg1[%c0_91, %c0_92, %c1_93] : memref<1x120x8xbf16, #tpu.memory_space<vmem>>, vector<1x120x6xbf16>
    %165 = vector.shape_cast %164 : vector<1x120x6xbf16> to vector<120x6xbf16>
    %cst_94 = arith.constant dense<0.000000e+00> : vector<40x6xf32>
    %166 = tpu.matmul %27, %165, %cst_94 {dimension_numbers = #tpu.dot_dimension_numbers<[1], [0], [0], [1], [0, 0, 1, 1], [], []>} : vector<40x120xbf16>, vector<120x6xbf16>, vector<40x6xf32> -> vector<40x6xf32>
    %167 = arith.addf %163, %166 : vector<40x6xf32>
    %c0_95 = arith.constant 0 : index
    %c0_96 = arith.constant 0 : index
    %c2_97 = arith.constant 2 : index
    %168 = vector.load %arg1[%c0_95, %c0_96, %c2_97] : memref<1x120x8xbf16, #tpu.memory_space<vmem>>, vector<1x40x6xbf16>
    %169 = vector.shape_cast %168 : vector<1x40x6xbf16> to vector<40x6xbf16>
    %cst_98 = arith.constant dense<0.000000e+00> : vector<40x6xf32>
    %170 = tpu.matmul %28, %169, %cst_98 {dimension_numbers = #tpu.dot_dimension_numbers<[1], [0], [0], [1], [0, 0, 1, 1], [], []>} : vector<40x40xbf16>, vector<40x6xbf16>, vector<40x6xf32> -> vector<40x6xf32>
    %171 = arith.addf %167, %170 : vector<40x6xf32>
    %172 = arith.mulf %171, %171 : vector<40x6xf32>
    %173 = arith.addf %159, %172 : vector<40x6xf32>
    %c0_99 = arith.constant 0 : index
    %c88 = arith.constant 88 : index
    %c0_100 = arith.constant 0 : index
    %174 = vector.load %arg1[%c0_99, %c88, %c0_100] : memref<1x120x8xbf16, #tpu.memory_space<vmem>>, vector<1x32x6xbf16>
    %175 = vector.shape_cast %174 : vector<1x32x6xbf16> to vector<32x6xbf16>
    %cst_101 = arith.constant dense<0.000000e+00> : vector<40x6xf32>
    %176 = tpu.matmul %29, %175, %cst_101 {dimension_numbers = #tpu.dot_dimension_numbers<[1], [0], [0], [1], [0, 0, 1, 1], [], []>} : vector<40x32xbf16>, vector<32x6xbf16>, vector<40x6xf32> -> vector<40x6xf32>
    %177 = arith.addf %42, %176 : vector<40x6xf32>
    %c0_102 = arith.constant 0 : index
    %c0_103 = arith.constant 0 : index
    %c1_104 = arith.constant 1 : index
    %178 = vector.load %arg1[%c0_102, %c0_103, %c1_104] : memref<1x120x8xbf16, #tpu.memory_space<vmem>>, vector<1x120x6xbf16>
    %179 = vector.shape_cast %178 : vector<1x120x6xbf16> to vector<120x6xbf16>
    %cst_105 = arith.constant dense<0.000000e+00> : vector<40x6xf32>
    %180 = tpu.matmul %30, %179, %cst_105 {dimension_numbers = #tpu.dot_dimension_numbers<[1], [0], [0], [1], [0, 0, 1, 1], [], []>} : vector<40x120xbf16>, vector<120x6xbf16>, vector<40x6xf32> -> vector<40x6xf32>
    %181 = arith.addf %177, %180 : vector<40x6xf32>
    %c0_106 = arith.constant 0 : index
    %c0_107 = arith.constant 0 : index
    %c2_108 = arith.constant 2 : index
    %182 = vector.load %arg1[%c0_106, %c0_107, %c2_108] : memref<1x120x8xbf16, #tpu.memory_space<vmem>>, vector<1x48x6xbf16>
    %183 = vector.shape_cast %182 : vector<1x48x6xbf16> to vector<48x6xbf16>
    %cst_109 = arith.constant dense<0.000000e+00> : vector<40x6xf32>
    %184 = tpu.matmul %31, %183, %cst_109 {dimension_numbers = #tpu.dot_dimension_numbers<[1], [0], [0], [1], [0, 0, 1, 1], [], []>} : vector<40x48xbf16>, vector<48x6xbf16>, vector<40x6xf32> -> vector<40x6xf32>
    %185 = arith.addf %181, %184 : vector<40x6xf32>
    %186 = arith.mulf %185, %185 : vector<40x6xf32>
    %187 = arith.addf %173, %186 : vector<40x6xf32>
    %c0_110 = arith.constant 0 : index
    %c96 = arith.constant 96 : index
    %c0_111 = arith.constant 0 : index
    %188 = vector.load %arg1[%c0_110, %c96, %c0_111] : memref<1x120x8xbf16, #tpu.memory_space<vmem>>, vector<1x24x6xbf16>
    %189 = vector.shape_cast %188 : vector<1x24x6xbf16> to vector<24x6xbf16>
    %cst_112 = arith.constant dense<0.000000e+00> : vector<40x6xf32>
    %190 = tpu.matmul %32, %189, %cst_112 {dimension_numbers = #tpu.dot_dimension_numbers<[1], [0], [0], [1], [0, 0, 1, 1], [], []>} : vector<40x24xbf16>, vector<24x6xbf16>, vector<40x6xf32> -> vector<40x6xf32>
    %191 = arith.addf %42, %190 : vector<40x6xf32>
    %c0_113 = arith.constant 0 : index
    %c0_114 = arith.constant 0 : index
    %c1_115 = arith.constant 1 : index
    %192 = vector.load %arg1[%c0_113, %c0_114, %c1_115] : memref<1x120x8xbf16, #tpu.memory_space<vmem>>, vector<1x120x6xbf16>
    %193 = vector.shape_cast %192 : vector<1x120x6xbf16> to vector<120x6xbf16>
    %cst_116 = arith.constant dense<0.000000e+00> : vector<40x6xf32>
    %194 = tpu.matmul %33, %193, %cst_116 {dimension_numbers = #tpu.dot_dimension_numbers<[1], [0], [0], [1], [0, 0, 1, 1], [], []>} : vector<40x120xbf16>, vector<120x6xbf16>, vector<40x6xf32> -> vector<40x6xf32>
    %195 = arith.addf %191, %194 : vector<40x6xf32>
    %c0_117 = arith.constant 0 : index
    %c0_118 = arith.constant 0 : index
    %c2_119 = arith.constant 2 : index
    %196 = vector.load %arg1[%c0_117, %c0_118, %c2_119] : memref<1x120x8xbf16, #tpu.memory_space<vmem>>, vector<1x56x6xbf16>
    %197 = vector.shape_cast %196 : vector<1x56x6xbf16> to vector<56x6xbf16>
    %cst_120 = arith.constant dense<0.000000e+00> : vector<40x6xf32>
    %198 = tpu.matmul %34, %197, %cst_120 {dimension_numbers = #tpu.dot_dimension_numbers<[1], [0], [0], [1], [0, 0, 1, 1], [], []>} : vector<40x56xbf16>, vector<56x6xbf16>, vector<40x6xf32> -> vector<40x6xf32>
    %199 = arith.addf %195, %198 : vector<40x6xf32>
    %200 = arith.mulf %199, %199 : vector<40x6xf32>
    %201 = arith.addf %187, %200 : vector<40x6xf32>
    %c0_121 = arith.constant 0 : index
    %c104 = arith.constant 104 : index
    %c0_122 = arith.constant 0 : index
    %202 = vector.load %arg1[%c0_121, %c104, %c0_122] : memref<1x120x8xbf16, #tpu.memory_space<vmem>>, vector<1x16x6xbf16>
    %203 = vector.shape_cast %202 : vector<1x16x6xbf16> to vector<16x6xbf16>
    %cst_123 = arith.constant dense<0.000000e+00> : vector<40x6xf32>
    %204 = tpu.matmul %35, %203, %cst_123 {dimension_numbers = #tpu.dot_dimension_numbers<[1], [0], [0], [1], [0, 0, 1, 1], [], []>} : vector<40x16xbf16>, vector<16x6xbf16>, vector<40x6xf32> -> vector<40x6xf32>
    %205 = arith.addf %42, %204 : vector<40x6xf32>
    %c0_124 = arith.constant 0 : index
    %c0_125 = arith.constant 0 : index
    %c1_126 = arith.constant 1 : index
    %206 = vector.load %arg1[%c0_124, %c0_125, %c1_126] : memref<1x120x8xbf16, #tpu.memory_space<vmem>>, vector<1x120x6xbf16>
    %207 = vector.shape_cast %206 : vector<1x120x6xbf16> to vector<120x6xbf16>
    %cst_127 = arith.constant dense<0.000000e+00> : vector<40x6xf32>
    %208 = tpu.matmul %36, %207, %cst_127 {dimension_numbers = #tpu.dot_dimension_numbers<[1], [0], [0], [1], [0, 0, 1, 1], [], []>} : vector<40x120xbf16>, vector<120x6xbf16>, vector<40x6xf32> -> vector<40x6xf32>
    %209 = arith.addf %205, %208 : vector<40x6xf32>
    %c0_128 = arith.constant 0 : index
    %c0_129 = arith.constant 0 : index
    %c2_130 = arith.constant 2 : index
    %210 = vector.load %arg1[%c0_128, %c0_129, %c2_130] : memref<1x120x8xbf16, #tpu.memory_space<vmem>>, vector<1x64x6xbf16>
    %211 = vector.shape_cast %210 : vector<1x64x6xbf16> to vector<64x6xbf16>
    %cst_131 = arith.constant dense<0.000000e+00> : vector<40x6xf32>
    %212 = tpu.matmul %37, %211, %cst_131 {dimension_numbers = #tpu.dot_dimension_numbers<[1], [0], [0], [1], [0, 0, 1, 1], [], []>} : vector<40x64xbf16>, vector<64x6xbf16>, vector<40x6xf32> -> vector<40x6xf32>
    %213 = arith.addf %209, %212 : vector<40x6xf32>
    %214 = arith.mulf %213, %213 : vector<40x6xf32>
    %215 = arith.addf %201, %214 : vector<40x6xf32>
    %c0_132 = arith.constant 0 : index
    %c112 = arith.constant 112 : index
    %c0_133 = arith.constant 0 : index
    %216 = vector.load %arg1[%c0_132, %c112, %c0_133] : memref<1x120x8xbf16, #tpu.memory_space<vmem>>, vector<1x8x6xbf16>
    %217 = vector.shape_cast %216 : vector<1x8x6xbf16> to vector<8x6xbf16>
    %cst_134 = arith.constant dense<0.000000e+00> : vector<40x6xf32>
    %218 = tpu.matmul %38, %217, %cst_134 {dimension_numbers = #tpu.dot_dimension_numbers<[1], [0], [0], [1], [0, 0, 1, 1], [], []>} : vector<40x8xbf16>, vector<8x6xbf16>, vector<40x6xf32> -> vector<40x6xf32>
    %219 = arith.addf %42, %218 : vector<40x6xf32>
    %c0_135 = arith.constant 0 : index
    %c0_136 = arith.constant 0 : index
    %c1_137 = arith.constant 1 : index
    %220 = vector.load %arg1[%c0_135, %c0_136, %c1_137] : memref<1x120x8xbf16, #tpu.memory_space<vmem>>, vector<1x120x6xbf16>
    %221 = vector.shape_cast %220 : vector<1x120x6xbf16> to vector<120x6xbf16>
    %cst_138 = arith.constant dense<0.000000e+00> : vector<40x6xf32>
    %222 = tpu.matmul %39, %221, %cst_138 {dimension_numbers = #tpu.dot_dimension_numbers<[1], [0], [0], [1], [0, 0, 1, 1], [], []>} : vector<40x120xbf16>, vector<120x6xbf16>, vector<40x6xf32> -> vector<40x6xf32>
    %223 = arith.addf %219, %222 : vector<40x6xf32>
    %c0_139 = arith.constant 0 : index
    %c0_140 = arith.constant 0 : index
    %c2_141 = arith.constant 2 : index
    %224 = vector.load %arg1[%c0_139, %c0_140, %c2_141] : memref<1x120x8xbf16, #tpu.memory_space<vmem>>, vector<1x72x6xbf16>
    %225 = vector.shape_cast %224 : vector<1x72x6xbf16> to vector<72x6xbf16>
    %cst_142 = arith.constant dense<0.000000e+00> : vector<40x6xf32>
    %226 = tpu.matmul %40, %225, %cst_142 {dimension_numbers = #tpu.dot_dimension_numbers<[1], [0], [0], [1], [0, 0, 1, 1], [], []>} : vector<40x72xbf16>, vector<72x6xbf16>, vector<40x6xf32> -> vector<40x6xf32>
    %227 = arith.addf %223, %226 : vector<40x6xf32>
    %228 = arith.mulf %227, %227 : vector<40x6xf32>
    %229 = arith.addf %215, %228 : vector<40x6xf32>
    %c0_143 = arith.constant 0 : index
    %c0_144 = arith.constant 0 : index
    %230 = vector.load %arg5[%c0_143, %c0_144] : memref<40x6xf32, #tpu.memory_space<vmem>>, vector<40x6xf32>
    tpu.vector_store %arg5[%c0_143, %c0_144], %229 {strides = array<i32>} : memref<40x6xf32, #tpu.memory_space<vmem>>, vector<40x6xf32>,
    %c0_145 = arith.constant 0 : index
    %c0_146 = arith.constant 0 : index
    %231 = vector.load %arg5[%c0_145, %c0_146] : memref<40x6xf32, #tpu.memory_space<vmem>>, vector<40x2xf32>
    %c0_147 = arith.constant 0 : index
    %c1_148 = arith.constant 1 : index
    %232 = vector.load %arg5[%c0_147, %c1_148] : memref<40x6xf32, #tpu.memory_space<vmem>>, vector<40x2xf32>
    %233 = arith.addf %231, %232 : vector<40x2xf32>
    %c0_149 = arith.constant 0 : index
    %c2_150 = arith.constant 2 : index
    %234 = vector.load %arg5[%c0_149, %c2_150] : memref<40x6xf32, #tpu.memory_space<vmem>>, vector<40x2xf32>
    %235 = arith.addf %233, %234 : vector<40x2xf32>
    %c0_151 = arith.constant 0 : index
    %c3 = arith.constant 3 : index
    %236 = vector.load %arg5[%c0_151, %c3] : memref<40x6xf32, #tpu.memory_space<vmem>>, vector<40x2xf32>
    %237 = arith.addf %235, %236 : vector<40x2xf32>
    %c0_152 = arith.constant 0 : index
    %c4 = arith.constant 4 : index
    %238 = vector.load %arg5[%c0_152, %c4] : memref<40x6xf32, #tpu.memory_space<vmem>>, vector<40x2xf32>
    %239 = arith.addf %237, %238 : vector<40x2xf32>
    %cst_153 = arith.constant 0.0133333337 : f32
    %240 = vector.broadcast %cst_153 : f32 to vector<40x2xf32>
    %241 = arith.mulf %239, %240 : vector<40x2xf32>
    %242 = math.log %241 : vector<40x2xf32>
    %cst_154 = arith.constant 1.000000e-07 : f32
    %cst_155 = arith.constant 1.000000e+07 : f32
    %243 = vector.broadcast %cst_154 : f32 to vector<40x2xf32>
    %244 = arith.maximumf %243, %242 : vector<40x2xf32>
    %245 = vector.broadcast %cst_155 : f32 to vector<40x2xf32>
    %246 = arith.minimumf %245, %244 : vector<40x2xf32>
    %c0_156 = arith.constant 0 : index
    %c0_157 = arith.constant 0 : index
    %c0_158 = arith.constant 0 : index
    %247 = vector.load %arg4[%c0_156, %c0_157, %c0_158] : memref<1x40x2xf32, #tpu.memory_space<vmem>>, vector<1x40x2xf32>
    %248 = vector.shape_cast %247 : vector<1x40x2xf32> to vector<40x2xf32>
    %249 = vector.shape_cast %246 : vector<40x2xf32> to vector<1x40x2xf32>
    tpu.vector_store %arg4[%c0_156, %c0_157, %c0_158], %249 {strides = array<i32>} : memref<1x40x2xf32, #tpu.memory_space<vmem>>, vector<1x40x2xf32>,
    return
  }
  func.func @transform_0(%arg0: i32) -> (i32, i32, i32) {
    %c0_i32 = arith.constant 0 : i32
    %c0_i32_0 = arith.constant 0 : i32
    %c0_i32_1 = arith.constant 0 : i32
    return %arg0, %c0_i32, %c0_i32_0 : i32, i32, i32
  }
  func.func @transform_1(%arg0: i32) -> (i32, i32) {
    %c0_i32 = arith.constant 0 : i32
    %c0_i32_0 = arith.constant 0 : i32
    %c0_i32_1 = arith.constant 0 : i32
    return %c0_i32, %c0_i32_0 : i32, i32
  }
  func.func @transform_2(%arg0: i32) -> (i32, i32) {
    %c0_i32 = arith.constant 0 : i32
    %c0_i32_0 = arith.constant 0 : i32
    %c0_i32_1 = arith.constant 0 : i32
    return %c0_i32, %c0_i32_0 : i32, i32
  }
  func.func @transform_3(%arg0: i32) -> (i32, i32, i32) {
    %c0_i32 = arith.constant 0 : i32
    %c0_i32_0 = arith.constant 0 : i32
    %c0_i32_1 = arith.constant 0 : i32
    return %arg0, %c0_i32, %c0_i32_0 : i32, i32, i32
  }
}

</mosaic_0001>

<bundles_post_ra>
// kernel: shallow_convnet_forward.1
= control target key start
LH: loop header
LB: loop body
LE: loop exit
PB: predicated region body
PF: predicated region fallthrough
CT: control target
= control target key end

     0   :  { %s5730_s12 = smov 0   ;;  %s7638_s0 = inlined_call_operand.vmem [shape: bf16[2,120,8], index: 0, kind: input, shape index: {}]   ;;  %s7639_s1 = inlined_call_operand.vmem [shape: bf16[40,200], index: 1, kind: input, shape index: {}]   ;;  %s7640_s2 = inlined_call_operand.vmem [shape: f32[40,1], index: 2, kind: input, shape index: {}]   ;;  %s7641_s3 = inlined_call_operand.vmem [shape: f32[2,40,2], index: 3, kind: output, shape index: {}]  }
   0x1 LB: > { %s4159_s13 = sadd.s32 4294967295, %s5686_s12   ;;  %p4163_p0 = scmp.ge.s32.totalorder %s5686_s12, 1  ;;  %s5686_s12 = sphi %s5730_s12, %s13_s12  }
   0x2   : > { %p137_p1 = scmp.lt.s32.totalorder %s5686_s12, 3 }
   0x4   : > { %p138_p2 = pnand %p4163_p0, %p137_p1 }
   0x6   : > { %141 = sbr.rel (%p138_p2) target bundleno = 1035 (0x40b), region = 32 }
   0xb   : > { %p161_p3 = scmp.lt.s32.totalorder %s4159_s13, 1  ;;  %v7657_v0 = vmov 0.0   ;;  %s5689_s18 = smov 127   ;;  %vm5690_vm0 = vmmov 0   ;;  %v5764_v6 = vld [vmem:[%s7639_s1] ss:$8 sps:$4 sm:$0xff]  }
   0xc   : > { %4679 = vmatprep.subr.bf16.mxu0 %v7657_v0  ;;  %4707 = vmatprep.subr.bf16.mxu1 %v7657_v0  ;;  %v5770_v7 = vld [vmem:[%s7639_s1 + $0x4] ss:$8 sps:$4 sm:$0xff]   ;;  %s5691_s23 = smov 8   ;;  %v5778_v9 = vld [vmem:[%s7639_s1 + $0x10] ss:$8 sps:$4 sm:$0xff]   ;;  %vm290_vm1 = vcmask 1043456  }
   0xd   : > { %s7782_s13 = smov (!%p161_p3, %s4159_s13), 1  ;;  %4695 = vmatprep.mubr.msk.bf16.mxu0 %vm5690_vm0, %v7657_v0  ;;  %4717 = vmatprep.mubr.msk.bf16.mxu1 %vm5690_vm0, %v7657_v0  ;;  %v5784_v10 = vld [vmem:[%s7639_s1 + $0x14] ss:$8 sps:$4 sm:$0xff]   ;;  %v176_v11 = vld [vmem:[%s7639_s1 + $0x20] sm:$0xff]  ;;  %s5692_s30 = smov 16   ;;  %vm280_vm2 = vcmask 982016  }
   0xe   : > { %s5547_s14 = smul.u32 60, %s7782_s13  ;;  %v5794_v14 = vcombine.low %v176_v11, %v176_v11  ;;  %v5797_v15 = vcombine.high %v176_v11, %v176_v11  ;;  %s5693_s4 = smov 24   ;;  %vm385_vm3 = vcmask 64512   ;;  %vm429_vm4 = vcmask 654336  }
   0xf   : > { %s5694_s5 = smov 32   ;;  %s5695_s6 = smov 40   ;;  %vm615_vm5 = vcmask 130048   ;;  %vm664_vm6 = vcmask 719872   ;;  %vm7642_vm7 = vcmask 916480   ;;  %vm840_vm8 = vcmask 195584  }
  0x10   : > { %s5746_s17 = scalar_lea.vmem %s7638_s0, %s5547_s14  ;;  %7665 = vst [vmem:[#allocation3_spill] sm:$0xff] %v5797_v15  ;;  %s5696_s7 = smov 48   ;;  %vm892_vm9 = vcmask 785408   ;;  %vm748_vm10 = vcmask 850944   ;;  %vm1065_vm11 = vcmask 261120   ;;  %vm1298_vm12 = vcmask 326656  }
  0x11   : > { %v5581_v1 = vld [vmem:[%s5746_s17 + $0x20] sm:$0xff]   ;;  %v5582_v2 = vld [vmem:[%s5746_s17 + $0x10] sm:$0xff]   ;;  %v5583_v3 = vld [vmem:[%s5746_s17 + $0x18] sm:$0xff]   ;;  %s5697_s8 = smov 126   ;;  %s5698_s9 = smov 64   ;;  %vm1517_vm13 = vcmask 392192  }
  0x12   : > { %422 = vrot.lane.b32.xlu0 %v5581_v1, %s5689_s18  ;;  %418 = vrot.lane.b32.xlu1 %v5582_v2, %s5689_s18  ;;  %v5584_v4 = vld [vmem:[%s5746_s17 + $0x8] sm:$0xff]   ;;  %v5587_v5 = vld [vmem:[%s5746_s17] sm:$0xff]   ;;  %s5699_s10 = smov 56   ;;  %s5700_s11 = smov 72   ;;  %vm1627_vm14 = vcmask 588800   ;;  %vm1707_vm15 = vcmask 457728  }
  0x13   : > { %v5588_v8 = vld [vmem:[%s5746_s17 + $0x28] ss:$0 sps:$4 sm:$0xff]   ;;  %v5594_v12 = vld [vmem:[%s5746_s17 + $0x20] sm:$0xff]   ;;  %v5593_v13 = vld [vmem:[%s5746_s17 + $0x18] sm:$0xff]   ;;  %s5702_s14 = smov 80   ;;  %s5703_s15 = smov 88  }
  0x14   : > { %v5598_v16 = vld [vmem:[%s5746_s17 + $0x10] sm:$0xff]   ;;  %v5597_v17 = vld [vmem:[%s5746_s17 + $0x8] sm:$0xff]   ;;  %v5805_v19 = vld [vmem:[%s5746_s17 + $0x38] sm:$0xf]  ;;  %s5704_s22 = smov 96   ;;  %s5705_s27 = smov 104  }
  0x15   : > { %v219_v18 = vld [vmem:[%s5746_s17 + $0x30] sm:$0xf]  ;;  %v5808_v20 = vld [vmem:[%s5746_s17 + $0x34] sm:$0xf]  ;;  %v5812_v21 = vcombine.low %v5805_v19, %v5805_v19  ;;  %v5599_v22 = vld [vmem:[%s5746_s17] sm:$0xff]   ;;  %s5706_s28 = smov 112  }
  0x16   : > { %420 = vrot.lane.b32.xlu0 %v5583_v3, %s5689_s18  ;;  %416 = vrot.lane.b32.xlu1 %v5584_v4, %s5689_s18  ;;  %v218_v23 = vld [vmem:[%s5746_s17 + $0x2c] sm:$0xf]  ;;  %v5825_v26 = vcombine.low %v219_v18, %v5808_v20  ;;  %v217_v27 = vld [vmem:[%s5746_s17 + $0x28] sm:$0xf]  ;;  %s5707_s29 = smov 120  }
  0x17   : > { %v5820_v24 = vsel %vm290_vm1, %v5812_v21, 0  ;;  %v5822_v25 = vcombine.low %v218_v23, %v219_v18  ;;  %v215_v28 = vld [vmem:[%s5746_s17 + $0x20] sm:$0xf]  ;;  %v216_v29 = vld [vmem:[%s5746_s17 + $0x24] sm:$0xf]  ;;  %v5600_v34 = vld [vmem:[%s5746_s17 + $0x28] sm:$0xff]   ;;  %v5857_v43 = vcombine.low %v217_v27, %v218_v23 }
  0x18   : > { %7666 = vst [vmem:[#allocation4_spill] sm:$0xff] %v5820_v24  ;;  %7668 = vst [vmem:[#allocation6_spill] sm:$0xff] %v5825_v26  ;;  %4680 = vmatpush3.bf16.msra.mxu0 %v5820_v24  ;;  %v213_v30 = vld [vmem:[%s5746_s17 + $0x18] sm:$0xf]  ;;  %v214_v31 = vld [vmem:[%s5746_s17 + $0x1c] sm:$0xf]  ;;  %v5835_v33 = vcombine.low %v216_v29, %v217_v27  ;;  %v5866_v45 = vcombine.low %v215_v28, %v216_v29  ;;  %v5989_v27 = vcombine.low %v5808_v20, %v5805_v19 }
  0x19   : > { %7667 = vst [vmem:[#allocation5_spill] sm:$0xff] %v5822_v25  ;;  %4681 = vmatprep.subr.bf16.mxu0 %v7657_v0  ;;  %v212_v32 = vld [vmem:[%s5746_s17 + $0x14] sm:$0xf]  ;;  %v211_v35 = vld [vmem:[%s5746_s17 + $0x10] sm:$0xf]  ;;  %v5841_v37 = vcombine.low %v214_v31, %v215_v28  ;;  %v5601_v42 = vld [vmem:[%s5746_s17 + $0x20] sm:$0xff]   ;;  %v5874_v47 = vcombine.low %v213_v30, %v214_v31 }
  0x1a   : > { %414 = vrot.lane.b32.xlu0 %v5587_v5, %s5689_s18  ;;  %373 = vrot.lane.b32.xlu1 %v5764_v6, %s5691_s23  ;;  %v210_v36 = vld [vmem:[%s5746_s17 + $0xc] sm:$0xf]  ;;  %v5843_v38 = vcombine.low %v212_v32, %v213_v30  ;;  %v5848_v39 = vld [vmem:[%s5746_s17 + $0x8] sm:$0xf]  ;;  %v5882_v49 = vcombine.low %v211_v35, %v212_v32  ;;  %7669 = vst [vmem:[#allocation7_spill] sm:$0xff] %v5989_v27 }
  0x1b   : > { %v5850_v40 = vcombine.low %v210_v36, %v211_v35  ;;  %v5853_v41 = vld [vmem:[%s5746_s17 + $0x4] sm:$0xf]  ;;  %v5602_v46 = vld [vmem:[%s5746_s17 + $0x18] sm:$0xff]   ;;  %v5603_v48 = vld [vmem:[%s5746_s17 + $0x10] sm:$0xff]   ;;  %v5891_v51 = vcombine.low %v5848_v39, %v210_v36 }
  0x1c   : > { %4682 = vmatpush3.bf16.msra.mxu0 %v5825_v26  ;;  %v4191_v44 = vcombine.low %v5853_v41, %v5848_v39  ;;  %v5604_v50 = vld [vmem:[%s5746_s17 + $0x8] sm:$0xff]   ;;  %v207_v52 = vld [vmem:[%s5746_s17] sm:$0xf]  ;;  %v5606_v55 = vld [vmem:[%s5746_s17 + $0x30] ss:$0 sps:$4 sm:$0xff]  }
  0x1d   : > { %4683 = vmatprep.subr.bf16.mxu0 %v7657_v0  ;;  %v5605_v53 = vld [vmem:[%s5746_s17] sm:$0xff]   ;;  %v5901_v54 = vcombine.low %v207_v52, %v5853_v41  ;;  %v5608_v56 = vld [vmem:[%s5746_s17 + $0x28] sm:$0xff]   ;;  %v5610_v58 = vld [vmem:[%s5746_s17 + $0x18] sm:$0xff]  }
  0x1e   : > { %375 = vrot.lane.b32.xlu0 %v5770_v7, %s5691_s23  ;;  %657 = vrot.lane.b32.xlu1 %v5588_v8, %s5689_s18  ;;  %v5607_v57 = vld [vmem:[%s5746_s17 + $0x20] sm:$0xff]   ;;  %v5609_v59 = vld [vmem:[%s5746_s17 + $0x10] sm:$0xff]  }
  0x1f   : > { %v5612_v60 = vld [vmem:[%s5746_s17 + $0x8] sm:$0xff]   ;;  %v5611_v61 = vld [vmem:[%s5746_s17] sm:$0xff]   ;;  %v5614_v62 = vld [vmem:[%s5746_s17 + $0x30] sm:$0xff]  }
  0x20   : > { %4684 = vmatpush3.bf16.msra.mxu0 %v5857_v43  ;;  %v5613_v63 = vld [vmem:[%s5746_s17 + $0x28] sm:$0xff]   ;;  %v5615_v1 = vld [vmem:[%s5746_s17 + $0x20] sm:$0xff]   ;;  %v5616_v2 = vld [vmem:[%s5746_s17 + $0x18] sm:$0xff]  }
  0x21   : > { %4685 = vmatprep.subr.bf16.mxu0 %v7657_v0  ;;  %v5620_v3 = vld [vmem:[%s5746_s17 + $0x10] sm:$0xff]   ;;  %v5621_v4 = vld [vmem:[%s5746_s17 + $0x8] sm:$0xff]   ;;  %v5623_v5 = vld [vmem:[%s5746_s17] sm:$0xff]  }
  0x22   : > { %377 = vrot.lane.b32.xlu0 %v5778_v9, %s5691_s23  ;;  %379 = vrot.lane.b32.xlu1 %v5784_v10, %s5691_s23  ;;  %v5634_v36 = vld [vmem:[%s5746_s17] ss:$0 sps:$4 sm:$0xff]  }
  0x24   : > { %4686 = vmatpush3.bf16.msra.mxu0 %v5866_v45 }
  0x25   : > { %4687 = vmatprep.subr.bf16.mxu0 %v7657_v0 }
  0x26   : > { %655 = vrot.lane.b32.xlu0 %v5594_v12, %s5689_s18  ;;  %653 = vrot.lane.b32.xlu1 %v5593_v13, %s5689_s18 }
  0x28   : > { %4688 = vmatpush3.bf16.msra.mxu0 %v5874_v47 }
  0x29   : > { %4689 = vmatprep.subr.bf16.mxu0 %v7657_v0 }
  0x2a   : > { %381 = vrot.lane.b32.xlu0 %v5794_v14, %s5691_s23  ;;  %383 = vrot.lane.b32.xlu1 %v5797_v15, %s5691_s23 }
  0x2c   : > { %4690 = vmatpush3.bf16.msra.mxu0 %v5882_v49 }
  0x2d   : > { %4691 = vmatprep.subr.bf16.mxu0 %v7657_v0 }
  0x2e   : > { %651 = vrot.lane.b32.xlu0 %v5598_v16, %s5689_s18  ;;  %649 = vrot.lane.b32.xlu1 %v5597_v17, %s5689_s18 }
  0x30   : > { %4692 = vmatpush3.bf16.msra.mxu0 %v5891_v51 }
  0x31   : > { %4693 = vmatprep.subr.bf16.mxu0 %v7657_v0 }
  0x32   : > { %647 = vrot.lane.b32.xlu0 %v5599_v22, %s5689_s18  ;;  %603 = vrot.lane.b32.xlu1 %v5764_v6, %s5692_s30 }
  0x34   : > { %4694 = vmatpush3.bf16.msra.mxu0 %v5901_v54 }
  0x35   : > { %4755 = vmatprep.subr.bf16.mxu0 %v7657_v0 }
  0x36   : > { %605 = vrot.lane.b32.xlu0 %v5770_v7, %s5692_s30  ;;  %884 = vrot.lane.b32.xlu1 %v5600_v34, %s5689_s18 }
  0x37   : > { %4696 = vmatmul.mubr.msk.bf16.vlgmr.msra.gmra.mxu0 %vm280_vm2, %v5764_v6 }
  0x38   : > { %4699 = vmatprep.mubr.msk.bf16.mxu0 %vm5690_vm0, %v7657_v0 }
  0x3a   : > { %882 = vrot.lane.b32.xlu0 %v5601_v42, %s5689_s18  ;;  %607 = vrot.lane.b32.xlu1 %v5778_v9, %s5692_s30 }
  0x3e   : > { %609 = vrot.lane.b32.xlu0 %v5784_v10, %s5692_s30  ;;  %880 = vrot.lane.b32.xlu1 %v5602_v46, %s5689_s18 }
  0x3f   : > { %4700 = vmatmul.mubr.msk.bf16.gmra.mxu0 %vm280_vm2, %v5778_v9 }
  0x40   : > { %4703 = vmatprep.mubr.msk.bf16.mxu0 %vm5690_vm0, %v7657_v0 }
  0x42   : > { %878 = vrot.lane.b32.xlu0 %v5603_v48, %s5689_s18  ;;  %611 = vrot.lane.b32.xlu1 %v5794_v14, %s5692_s30 }
  0x46   : > { %613 = vrot.lane.b32.xlu0 %v5797_v15, %s5692_s30  ;;  %876 = vrot.lane.b32.xlu1 %v5604_v50, %s5689_s18 }
  0x47   : > { %4704 = vmatmul.mubr.msk.bf16.gmra.mxu0 %vm280_vm2, %v5794_v14 }
  0x48   : > { %4767 = vmatprep.mubr.msk.bf16.mxu0 %vm5690_vm0, %v7657_v0 }
  0x4a   : > { %874 = vrot.lane.b32.xlu0 %v5605_v53, %s5689_s18  ;;  %828 = vrot.lane.b32.xlu1 %v5764_v6, %s5693_s4 }
  0x4e   : > { %830 = vrot.lane.b32.xlu0 %v5770_v7, %s5693_s4  ;;  %1114 = vrot.lane.b32.xlu1 %v5606_v55, %s5689_s18 }
  0x52   : > { %1112 = vrot.lane.b32.xlu0 %v5608_v56, %s5689_s18  ;;  %1110 = vrot.lane.b32.xlu1 %v5607_v57, %s5689_s18 }
  0x56   : > { %832 = vrot.lane.b32.xlu0 %v5778_v9, %s5693_s4  ;;  %834 = vrot.lane.b32.xlu1 %v5784_v10, %s5693_s4 }
  0x5a   : > { %1108 = vrot.lane.b32.xlu0 %v5610_v58, %s5689_s18  ;;  %1106 = vrot.lane.b32.xlu1 %v5609_v59, %s5689_s18 }
  0x5e   : > { %836 = vrot.lane.b32.xlu0 %v5794_v14, %s5693_s4  ;;  %838 = vrot.lane.b32.xlu1 %v5797_v15, %s5693_s4 }
  0x62   : > { %1104 = vrot.lane.b32.xlu0 %v5612_v60, %s5689_s18  ;;  %1102 = vrot.lane.b32.xlu1 %v5611_v61, %s5689_s18  ;;  %v5636_v61 = vld [vmem:[%s5746_s17] sm:$0xff]  }
  0x66   : > { %1053 = vrot.lane.b32.xlu0 %v5764_v6, %s5694_s5  ;;  %1055 = vrot.lane.b32.xlu1 %v5770_v7, %s5694_s5 }
  0x6a   : > { %1349 = vrot.lane.b32.xlu0 %v5614_v62, %s5689_s18  ;;  %1347 = vrot.lane.b32.xlu1 %v5613_v63, %s5689_s18 }
  0x6e   : > { %1345 = vrot.lane.b32.xlu0 %v5615_v1, %s5689_s18  ;;  %1057 = vrot.lane.b32.xlu1 %v5778_v9, %s5694_s5 }
  0x72   : > { %1059 = vrot.lane.b32.xlu0 %v5784_v10, %s5694_s5  ;;  %1343 = vrot.lane.b32.xlu1 %v5616_v2, %s5689_s18 }
  0x76   : > { %1341 = vrot.lane.b32.xlu0 %v5620_v3, %s5689_s18  ;;  %1061 = vrot.lane.b32.xlu1 %v5794_v14, %s5694_s5 }
  0x7a   : > { %1063 = vrot.lane.b32.xlu0 %v5797_v15, %s5694_s5  ;;  %1339 = vrot.lane.b32.xlu1 %v5621_v4, %s5689_s18 }
  0x7e   : > { %1337 = vrot.lane.b32.xlu0 %v5623_v5, %s5689_s18  ;;  %1286 = vrot.lane.b32.xlu1 %v5764_v6, %s5695_s6 }
  0x82   : > { %1288 = vrot.lane.b32.xlu0 %v5770_v7, %s5695_s6  ;;  %1535 = vrot.lane.b32.xlu1 %v5812_v21, %s5689_s18 }
  0x84   : > { %v423_v8 = vpop.permute.xlu0 %422  ;;  %v419_v11 = vpop.permute.xlu1 %418 }
  0x85   : > { %4708 = vmatpush3.bf16.msra.mxu1 %v423_v8 }
  0x86   : > { %1533 = vrot.lane.b32.xlu0 %v5825_v26, %s5689_s18  ;;  %4709 = vmatprep.subr.bf16.mxu1 %v7657_v0 }
  0x87   : > { %1531 = vrot.lane.b32.xlu1 %v5857_v43, %s5689_s18 }
  0x88   : > { %v421_v12 = vpop.permute.xlu0 %420  ;;  %v417_v13 = vpop.permute.xlu1 %416 }
  0x89   : > { %4710 = vmatpush3.bf16.msra.mxu1 %v421_v12  ;;  %v5637_v12 = vld [vmem:[%s5746_s17] sm:$0xff]  }
  0x8a   : > { %1529 = vrot.lane.b32.xlu0 %v5866_v45, %s5689_s18  ;;  %4711 = vmatprep.subr.bf16.mxu1 %v7657_v0 }
  0x8b   : > { %1290 = vrot.lane.b32.xlu1 %v5778_v9, %s5695_s6 }
  0x8c   : > { %v415_v16 = vpop.permute.xlu0 %414  ;;  %v374_v17 = vpop.permute.xlu1 %373 }
  0x8d   : > { %4712 = vmatpush3.bf16.msra.mxu1 %v419_v11  ;;  %v5638_v11 = vld [vmem:[%s5746_s17 + $0x8] ss:$0 sps:$4 sm:$0xff]  }
  0x8e   : > { %1292 = vrot.lane.b32.xlu0 %v5784_v10, %s5695_s6  ;;  %4713 = vmatprep.subr.bf16.mxu1 %v7657_v0 }
  0x8f   : > { %1527 = vrot.lane.b32.xlu1 %v5874_v47, %s5689_s18 }
  0x90   : > { %v376_v18 = vpop.permute.xlu0 %375  ;;  %v658_v21 = vpop.permute.xlu1 %657 }
  0x91   : > { %4714 = vmatpush3.bf16.msra.mxu1 %v417_v13  ;;  %v675_v22 = vsel %vm290_vm1, %v658_v21, 0  ;;  %v386_v28 = vsel %vm385_vm3, %v374_v17, %v376_v18  ;;  %v5701_v21 = vmov 0  }
  0x92   : > { %1525 = vrot.lane.b32.xlu0 %v5882_v49, %s5689_s18  ;;  %4715 = vmatprep.subr.bf16.mxu1 %v7657_v0 }
  0x93   : > { %1294 = vrot.lane.b32.xlu1 %v5794_v14, %s5695_s6  ;;  %4756 = vmatpush3.bf16.msra.mxu0 %v675_v22 }
  0x94   : > { %v378_v23 = vpop.permute.xlu0 %377  ;;  %4757 = vmatprep.subr.bf16.mxu0 %v7657_v0  ;;  %v380_v29 = vpop.permute.xlu1 %379  ;;  %5580 = vset.pattern.permute.xlu1 %v5701_v21 }
  0x95   : > { %4716 = vmatpush3.bf16.msra.mxu1 %v415_v16  ;;  %v387_v31 = vsel %vm385_vm3, %v378_v23, %v380_v29  ;;  %5579 = vset.pattern.permute.xlu0 %v5701_v21 }
  0x96   : > { %1296 = vrot.lane.b32.xlu0 %v5797_v15, %s5695_s6  ;;  %4729 = vmatprep.subr.bf16.mxu1 %v7657_v0 }
  0x97   : > { %1523 = vrot.lane.b32.xlu1 %v5891_v51, %s5689_s18 }
  0x98   : > { %4718 = vmatmul.mubr.msk.bf16.vlgmr.msra.gmra.mxu1 %vm429_vm4, %v386_v28  ;;  %v656_v30 = vpop.permute.xlu0 %655  ;;  %v654_v19 = vpop.permute.xlu1 %653 }
  0x99   : > { %4730 = vmatpush3.bf16.msra.mxu1 %v5989_v27  ;;  %4758 = vmatpush3.bf16.msra.mxu0 %v656_v30 }
  0x9a   : > { %1521 = vrot.lane.b32.xlu0 %v5901_v54, %s5689_s18  ;;  %4731 = vmatprep.subr.bf16.mxu1 %v7657_v0 }
  0x9b   : > { %1505 = vrot.lane.b32.xlu1 %v5764_v6, %s5696_s7  ;;  %4759 = vmatprep.subr.bf16.mxu0 %v7657_v0 }
  0x9c   : > { %v382_v20 = vpop.permute.xlu0 %381  ;;  %4721 = vmatprep.mubr.msk.bf16.mxu1 %vm5690_vm0, %v7657_v0  ;;  %v384_v32 = vpop.permute.xlu1 %383 }
  0x9d   : > { %4732 = vmatpush3.bf16.msra.mxu1 %v5822_v25  ;;  %4760 = vmatpush3.bf16.msra.mxu0 %v654_v19  ;;  %v388_v46 = vsel %vm385_vm3, %v382_v20, %v384_v32  ;;  %v5639_v32 = vld [vmem:[%s5746_s17] sm:$0xff]  }
  0x9e   : > { %1507 = vrot.lane.b32.xlu0 %v5770_v7, %s5696_s7  ;;  %4733 = vmatprep.subr.bf16.mxu1 %v7657_v0 }
  0x9f   : > { %1509 = vrot.lane.b32.xlu1 %v5778_v9, %s5696_s7  ;;  %4761 = vmatprep.subr.bf16.mxu0 %v7657_v0 }
  0xa0   : > { %4722 = vmatmul.mubr.msk.bf16.gmra.mxu1 %vm429_vm4, %v387_v31  ;;  %v652_v34 = vpop.permute.xlu0 %651  ;;  %v650_v35 = vpop.permute.xlu1 %649  ;;  %v5640_v31 = vld [vmem:[%s5746_s17 + $0x8] sm:$0xff]  }
  0xa1   : > { %4734 = vmatpush3.bf16.msra.mxu1 %v5835_v33  ;;  %4762 = vmatpush3.bf16.msra.mxu0 %v652_v34 }
  0xa2   : > { %1511 = vrot.lane.b32.xlu0 %v5784_v10, %s5696_s7  ;;  %4735 = vmatprep.subr.bf16.mxu1 %v7657_v0 }
  0xa3   : > { %1513 = vrot.lane.b32.xlu1 %v5794_v14, %s5696_s7  ;;  %4763 = vmatprep.subr.bf16.mxu0 %v7657_v0 }
  0xa4   : > { %4725 = vmatprep.mubr.msk.bf16.mxu1 %vm5690_vm0, %v7657_v0  ;;  %v648_v42 = vpop.permute.xlu0 %647  ;;  %v604_v48 = vpop.permute.xlu1 %603 }
  0xa5   : > { %4736 = vmatpush3.bf16.msra.mxu1 %v5841_v37  ;;  %4764 = vmatpush3.bf16.msra.mxu0 %v650_v35 }
  0xa6   : > { %1515 = vrot.lane.b32.xlu0 %v5797_v15, %s5696_s7  ;;  %4737 = vmatprep.subr.bf16.mxu1 %v7657_v0 }
  0xa7   : > { %1791 = vrot.lane.b32.xlu1 %v5634_v36, %s5697_s8  ;;  %4765 = vmatprep.subr.bf16.mxu0 %v7657_v0 }
  0xa8   : > { %4726 = vmatmul.mubr.msk.bf16.gmra.mxu1 %vm429_vm4, %v388_v46  ;;  %v606_v50 = vpop.permute.xlu0 %605  ;;  %v885_v52 = vpop.permute.xlu1 %884 }
  0xa9   : > { %4738 = vmatpush3.bf16.msra.mxu1 %v5843_v38  ;;  %4766 = vmatpush3.bf16.msra.mxu0 %v648_v42  ;;  %v616_v53 = vsel %vm615_vm5, %v604_v48, %v606_v50  ;;  %v5641_v48 = vld [vmem:[%s5746_s17 + $0x10] ss:$0 sps:$4 sm:$0xff]  }
  0xaa   : > { %1782 = vrot.lane.b32.xlu0 %v5770_v7, %s5698_s9  ;;  %4739 = vmatprep.subr.bf16.mxu1 %v7657_v0 }
  0xab   : > { %1695 = vrot.lane.b32.xlu1 %v5764_v6, %s5699_s10  ;;  %4805 = vmatprep.subr.bf16.mxu0 %v7657_v0 }
  0xac   : > { %4768 = vmatmul.mubr.msk.bf16.vlgmr.msra.gmra.mxu0 %vm664_vm6, %v616_v53  ;;  %v883_v54 = vpop.permute.xlu0 %882  ;;  %4743 = vmatprep.mubr.msk.bf16.mxu1 %vm5690_vm0, %v7657_v0  ;;  %v608_v55 = vpop.permute.xlu1 %607 }
  0xad   : > { %4740 = vmatpush3.bf16.msra.mxu1 %v5850_v40  ;;  %4806 = vmatpush3.bf16.msra.mxu0 %v885_v52 }
  0xae   : > { %1697 = vrot.lane.b32.xlu0 %v5770_v7, %s5699_s10  ;;  %4741 = vmatprep.subr.bf16.mxu1 %v7657_v0 }
  0xaf   : > { %1784 = vrot.lane.b32.xlu1 %v5784_v10, %s5698_s9  ;;  %4807 = vmatprep.subr.bf16.mxu0 %v7657_v0 }
  0xb0   : > { %v610_v56 = vpop.permute.xlu0 %609  ;;  %4771 = vmatprep.mubr.msk.bf16.mxu0 %vm5690_vm0, %v7657_v0  ;;  %v881_v57 = vpop.permute.xlu1 %880 }
  0xb1   : > { %4742 = vmatpush3.bf16.msra.mxu1 %v4191_v44  ;;  %4808 = vmatpush3.bf16.msra.mxu0 %v883_v54  ;;  %v617_v58 = vsel %vm615_vm5, %v608_v55, %v610_v56 }
  0xb2   : > { %1699 = vrot.lane.b32.xlu0 %v5778_v9, %s5699_s10  ;;  %4779 = vmatprep.subr.bf16.mxu1 %v7657_v0 }
  0xb3   : > { %1701 = vrot.lane.b32.xlu1 %v5784_v10, %s5699_s10  ;;  %4809 = vmatprep.subr.bf16.mxu0 %v7657_v0 }
  0xb4   : > { %4744 = vmatmul.mubr.msk.bf16.vlgmr.msra.gmra.mxu1 %vm7642_vm7, %v5764_v6  ;;  %4772 = vmatmul.mubr.msk.bf16.gmra.mxu0 %vm664_vm6, %v617_v58  ;;  %v879_v39 = vpop.permute.xlu0 %878  ;;  %v612_v41 = vpop.permute.xlu1 %611 }
  0xb5   : > { %4780 = vmatpush3.bf16.msra.mxu1 %v5820_v24  ;;  %4810 = vmatpush3.bf16.msra.mxu0 %v881_v57  ;;  %v6220_v57 = vld [vmem:[%s7639_s1] ss:$8 sps:$4 sm:$0xff]  }
  0xb6   : > { %1786 = vrot.lane.b32.xlu0 %v5797_v15, %s5698_s9  ;;  %4781 = vmatprep.subr.bf16.mxu1 %v7657_v0 }
  0xb7   : > { %1703 = vrot.lane.b32.xlu1 %v5794_v14, %s5699_s10  ;;  %4811 = vmatprep.subr.bf16.mxu0 %v7657_v0 }
  0xb8   : > { %v614_v44 = vpop.permute.xlu0 %613  ;;  %4747 = vmatprep.mubr.msk.bf16.mxu1 %vm5690_vm0, %v7657_v0  ;;  %4775 = vmatprep.mubr.msk.bf16.mxu0 %vm5690_vm0, %v7657_v0  ;;  %v877_v59 = vpop.permute.xlu1 %876 }
  0xb9   : > { %4782 = vmatpush3.bf16.msra.mxu1 %v5825_v26  ;;  %4812 = vmatpush3.bf16.msra.mxu0 %v879_v39  ;;  %v618_v60 = vsel %vm615_vm5, %v612_v41, %v614_v44  ;;  %v6232_v41 = vld [vmem:[%s7639_s1 + $0x4] ss:$8 sps:$4 sm:$0xff]  }
  0xba   : > { %1705 = vrot.lane.b32.xlu0 %v5797_v15, %s5699_s10  ;;  %4783 = vmatprep.subr.bf16.mxu1 %v7657_v0 }
  0xbb   : > { %1945 = vrot.lane.b32.xlu1 %v5764_v6, %s5698_s9  ;;  %4813 = vmatprep.subr.bf16.mxu0 %v7657_v0 }
  0xbc   : > { %4748 = vmatmul.mubr.msk.bf16.gmra.mxu1 %vm7642_vm7, %v5778_v9  ;;  %4776 = vmatmul.mubr.msk.bf16.gmra.mxu0 %vm664_vm6, %v618_v60  ;;  %v875_v62 = vpop.permute.xlu0 %874  ;;  %v829_v63 = vpop.permute.xlu1 %828  ;;  %v6256_v60 = vld [vmem:[%s7639_s1 + $0x14] ss:$8 sps:$4 sm:$0xff]  }
  0xbd   : > { %4784 = vmatpush3.bf16.msra.mxu1 %v5857_v43  ;;  %4814 = vmatpush3.bf16.msra.mxu0 %v877_v59 }
  0xbe   : > { %1947 = vrot.lane.b32.xlu0 %v5778_v9, %s5698_s9  ;;  %4785 = vmatprep.subr.bf16.mxu1 %v7657_v0 }
  0xbf   : > { %2038 = vrot.lane.b32.xlu1 %v5636_v61, %s5697_s8  ;;  %4815 = vmatprep.subr.bf16.mxu0 %v7657_v0 }
  0xc0   : > { %v831_v1 = vpop.permute.xlu0 %830  ;;  %4751 = vmatprep.mubr.msk.bf16.mxu1 %vm5690_vm0, %v7657_v0  ;;  %4817 = vmatprep.mubr.msk.bf16.mxu0 %vm5690_vm0, %v7657_v0  ;;  %v1115_v2 = vpop.permute.xlu1 %1114 }
  0xc1   : > { %4786 = vmatpush3.bf16.msra.mxu1 %v5866_v45  ;;  %4816 = vmatpush3.bf16.msra.mxu0 %v875_v62  ;;  %v841_v3 = vsel %vm840_vm8, %v829_v63, %v831_v1  ;;  %v1132_v4 = vsel %vm290_vm1, %v1115_v2, 0  ;;  %v5644_v2 = vld [vmem:[%s5746_s17 + $0x10] sm:$0xff]  }
  0xc2   : > { %1949 = vrot.lane.b32.xlu0 %v5794_v14, %s5698_s9  ;;  %4787 = vmatprep.subr.bf16.mxu1 %v7657_v0 }
  0xc3   : > { %2027 = vrot.lane.b32.xlu1 %v5770_v7, %s5700_s11  ;;  %4853 = vmatprep.subr.bf16.mxu0 %v7657_v0 }
  0xc4   : > { %4752 = vmatmul.mubr.msk.bf16.gmra.mxu1 %vm7642_vm7, %v5794_v14  ;;  %4818 = vmatmul.mubr.msk.bf16.vlgmr.msra.gmra.mxu0 %vm892_vm9, %v841_v3  ;;  %v1113_v5 = vpop.permute.xlu0 %1112  ;;  %v1111_v8 = vpop.permute.xlu1 %1110 }
  0xc5   : > { %4788 = vmatpush3.bf16.msra.mxu1 %v5874_v47  ;;  %4854 = vmatpush3.bf16.msra.mxu0 %v1132_v4 }
  0xc6   : > { %2029 = vrot.lane.b32.xlu0 %v5784_v10, %s5700_s11  ;;  %4789 = vmatprep.subr.bf16.mxu1 %v7657_v0 }
  0xc7   : > { %2031 = vrot.lane.b32.xlu1 %v5797_v15, %s5700_s11  ;;  %4855 = vmatprep.subr.bf16.mxu0 %v7657_v0 }
  0xc8   : > { %v833_v13 = vpop.permute.xlu0 %832  ;;  %4793 = vmatprep.mubr.msk.bf16.mxu1 %vm5690_vm0, %v7657_v0  ;;  %4821 = vmatprep.mubr.msk.bf16.mxu0 %vm5690_vm0, %v7657_v0  ;;  %v835_v16 = vpop.permute.xlu1 %834 }
  0xc9   : > { %4790 = vmatpush3.bf16.msra.mxu1 %v5882_v49  ;;  %4856 = vmatpush3.bf16.msra.mxu0 %v1113_v5  ;;  %v842_v17 = vsel %vm840_vm8, %v833_v13, %v835_v16  ;;  %v5646_v5 = vld [vmem:[%s5746_s17 + $0x8] sm:$0xff]  }
  0xca   : > { %2289 = vrot.lane.b32.xlu0 %v5638_v11, %s5697_s8  ;;  %4791 = vmatprep.subr.bf16.mxu1 %v7657_v0 }
  0xcb   : > { %2287 = vrot.lane.b32.xlu1 %v5637_v12, %s5697_s8  ;;  %4857 = vmatprep.subr.bf16.mxu0 %v7657_v0 }
  0xcc   : > { %v1109_v18 = vpop.permute.xlu0 %1108  ;;  %4822 = vmatmul.mubr.msk.bf16.gmra.mxu0 %vm892_vm9, %v842_v17  ;;  %v1107_v22 = vpop.permute.xlu1 %1106  ;;  %v5647_v17 = vld [vmem:[%s5746_s17 + $0x18] ss:$0 sps:$4 sm:$0xff]  }
  0xcd   : > { %4792 = vmatpush3.bf16.msra.mxu1 %v5891_v51  ;;  %4858 = vmatpush3.bf16.msra.mxu0 %v1111_v8  ;;  %v5645_v8 = vld [vmem:[%s5746_s17] sm:$0xff]  }
  0xce   : > { %2190 = vrot.lane.b32.xlu0 %v5764_v6, %s5700_s11  ;;  %4829 = vmatprep.subr.bf16.mxu1 %v7657_v0 }
  0xcf   : > { %2273 = vrot.lane.b32.xlu1 %v5770_v7, %s5702_s14  ;;  %4859 = vmatprep.subr.bf16.mxu0 %v7657_v0 }
  0xd0   : > { %4794 = vmatmul.mubr.msk.bf16.vlgmr.msra.gmra.mxu1 %vm748_vm10, %v5764_v6  ;;  %v837_v23 = vpop.permute.xlu0 %836  ;;  %4825 = vmatprep.mubr.msk.bf16.mxu0 %vm5690_vm0, %v7657_v0  ;;  %v839_v51 = vpop.permute.xlu1 %838 }
  0xd1   : > { %4830 = vmatpush3.bf16.msra.mxu1 %v5989_v27  ;;  %4860 = vmatpush3.bf16.msra.mxu0 %v1109_v18  ;;  %v843_v28 = vsel %vm840_vm8, %v837_v23, %v839_v51  ;;  %v5648_v23 = vld [vmem:[%s5746_s17 + $0x10] sm:$0xff]  }
  0xd2   : > { %2192 = vrot.lane.b32.xlu0 %v5778_v9, %s5700_s11  ;;  %4831 = vmatprep.subr.bf16.mxu1 %v7657_v0 }
  0xd3   : > { %2194 = vrot.lane.b32.xlu1 %v5794_v14, %s5700_s11  ;;  %4861 = vmatprep.subr.bf16.mxu0 %v7657_v0 }
  0xd4   : > { %4797 = vmatprep.mubr.msk.bf16.mxu1 %vm5690_vm0, %v7657_v0  ;;  %v1105_v29 = vpop.permute.xlu0 %1104  ;;  %4826 = vmatmul.mubr.msk.bf16.gmra.mxu0 %vm892_vm9, %v843_v28  ;;  %v1103_v30 = vpop.permute.xlu1 %1102 }
  0xd5   : > { %4832 = vmatpush3.bf16.msra.mxu1 %v5822_v25  ;;  %4862 = vmatpush3.bf16.msra.mxu0 %v1107_v22 }
  0xd6   : > { %2275 = vrot.lane.b32.xlu0 %v5784_v10, %s5702_s14  ;;  %4833 = vmatprep.subr.bf16.mxu1 %v7657_v0 }
  0xd7   : > { %2277 = vrot.lane.b32.xlu1 %v5797_v15, %s5702_s14  ;;  %4863 = vmatprep.subr.bf16.mxu0 %v7657_v0 }
  0xd8   : > { %4798 = vmatmul.mubr.msk.bf16.gmra.mxu1 %vm748_vm10, %v5778_v9  ;;  %v1054_v19 = vpop.permute.xlu0 %1053  ;;  %4867 = vmatprep.mubr.msk.bf16.mxu0 %vm5690_vm0, %v7657_v0  ;;  %v1056_v20 = vpop.permute.xlu1 %1055 }
  0xd9   : > { %4834 = vmatpush3.bf16.msra.mxu1 %v5835_v33  ;;  %4864 = vmatpush3.bf16.msra.mxu0 %v1105_v29  ;;  %v1066_v35 = vsel %vm1065_vm11, %v1054_v19, %v1056_v20  ;;  %v5650_v29 = vld [vmem:[%s5746_s17 + $0x8] sm:$0xff]  }
  0xda   : > { %2444 = vrot.lane.b32.xlu0 %v5764_v6, %s5702_s14  ;;  %4835 = vmatprep.subr.bf16.mxu1 %v7657_v0 }
  0xdb   : > { %2446 = vrot.lane.b32.xlu1 %v5778_v9, %s5702_s14  ;;  %4865 = vmatprep.subr.bf16.mxu0 %v7657_v0 }
  0xdc   : > { %4801 = vmatprep.mubr.msk.bf16.mxu1 %vm5690_vm0, %v7657_v0  ;;  %v1350_v34 = vpop.permute.xlu0 %1349  ;;  %v1348_v36 = vpop.permute.xlu1 %1347 }
  0xdd   : > { %4836 = vmatpush3.bf16.msra.mxu1 %v5841_v37  ;;  %4866 = vmatpush3.bf16.msra.mxu0 %v1103_v30  ;;  %v5649_v30 = vld [vmem:[%s5746_s17] sm:$0xff]  }
  0xde   : > { %2546 = vrot.lane.b32.xlu0 %v5640_v31, %s5697_s8  ;;  %4837 = vmatprep.subr.bf16.mxu1 %v7657_v0 }
  0xdf   : > { %2544 = vrot.lane.b32.xlu1 %v5639_v32, %s5697_s8  ;;  %4903 = vmatprep.subr.bf16.mxu0 %v7657_v0 }
  0xe0   : > { %4802 = vmatmul.mubr.msk.bf16.gmra.mxu1 %vm748_vm10, %v5794_v14  ;;  %4868 = vmatmul.mubr.msk.bf16.vlgmr.msra.gmra.mxu0 %vm748_vm10, %v1066_v35  ;;  %v1346_v42 = vpop.permute.xlu0 %1345  ;;  %v1058_v46 = vpop.permute.xlu1 %1057 }
  0xe1   : > { %4838 = vmatpush3.bf16.msra.mxu1 %v5843_v38  ;;  %4904 = vmatpush3.bf16.msra.mxu0 %v1350_v34 }
  0xe2   : > { %2448 = vrot.lane.b32.xlu0 %v5794_v14, %s5702_s14  ;;  %4839 = vmatprep.subr.bf16.mxu1 %v7657_v0 }
  0xe3   : > { %2528 = vrot.lane.b32.xlu1 %v5770_v7, %s5703_s15  ;;  %4905 = vmatprep.subr.bf16.mxu0 %v7657_v0  ;;  %v5642_v7 = vld [vmem:[%s5746_s17 + $0x8] sm:$0xff]  }
  0xe4   : > { %4841 = vmatprep.mubr.msk.bf16.mxu1 %vm5690_vm0, %v7657_v0  ;;  %v1060_v50 = vpop.permute.xlu0 %1059  ;;  %4871 = vmatprep.mubr.msk.bf16.mxu0 %vm5690_vm0, %v7657_v0  ;;  %v1344_v52 = vpop.permute.xlu1 %1343 }
  0xe5   : > { %4840 = vmatpush3.bf16.msra.mxu1 %v5850_v40  ;;  %4906 = vmatpush3.bf16.msra.mxu0 %v1348_v36  ;;  %v1067_v53 = vsel %vm1065_vm11, %v1058_v46, %v1060_v50 }
  0xe6   : > { %2530 = vrot.lane.b32.xlu0 %v5784_v10, %s5703_s15  ;;  %4879 = vmatprep.subr.bf16.mxu1 %v7657_v0  ;;  %v5643_v10 = vld [vmem:[%s5746_s17] sm:$0xff]  }
  0xe7   : > { %2807 = vrot.lane.b32.xlu1 %v5641_v48, %s5697_s8  ;;  %4907 = vmatprep.subr.bf16.mxu0 %v7657_v0 }
  0xe8   : > { %4842 = vmatmul.mubr.msk.bf16.vlgmr.msra.gmra.mxu1 %vm892_vm9, %v5764_v6  ;;  %4872 = vmatmul.mubr.msk.bf16.gmra.mxu0 %vm748_vm10, %v1067_v53  ;;  %v1342_v40 = vpop.permute.xlu0 %1341  ;;  %v1062_v54 = vpop.permute.xlu1 %1061 }
  0xe9   : > { %4880 = vmatpush3.bf16.msra.mxu1 %v5820_v24  ;;  %4908 = vmatpush3.bf16.msra.mxu0 %v1346_v42 }
  0xea   : > { %2532 = vrot.lane.b32.xlu0 %v5797_v15, %s5703_s15  ;;  %4881 = vmatprep.subr.bf16.mxu1 %v7657_v0 }
  0xeb   : > { %2805 = vrot.lane.b32.xlu1 %v5642_v7, %s5697_s8  ;;  %4909 = vmatprep.subr.bf16.mxu0 %v7657_v0 }
  0xec   : > { %4845 = vmatprep.mubr.msk.bf16.mxu1 %vm5690_vm0, %v7657_v0  ;;  %v1064_v6 = vpop.permute.xlu0 %1063  ;;  %4875 = vmatprep.mubr.msk.bf16.mxu0 %vm5690_vm0, %v7657_v0  ;;  %v1340_v55 = vpop.permute.xlu1 %1339 }
  0xed   : > { %4882 = vmatpush3.bf16.msra.mxu1 %v5825_v26  ;;  %4910 = vmatpush3.bf16.msra.mxu0 %v1344_v52  ;;  %v1068_v56 = vsel %vm1065_vm11, %v1062_v54, %v1064_v6 }
  0xee   : > { %2803 = vrot.lane.b32.xlu0 %v5643_v10, %s5697_s8  ;;  %4883 = vmatprep.subr.bf16.mxu1 %v7657_v0  ;;  %v5651_v10 = vld [vmem:[%s5746_s17 + $0x18] sm:$0xff]  }
  0xef   : > { %2699 = vrot.lane.b32.xlu1 %v6220_v57, %s5703_s15  ;;  %4911 = vmatprep.subr.bf16.mxu0 %v7657_v0 }
  0xf0   : > { %4846 = vmatmul.mubr.msk.bf16.gmra.mxu1 %vm892_vm9, %v5778_v9  ;;  %4876 = vmatmul.mubr.msk.bf16.gmra.mxu0 %vm748_vm10, %v1068_v56  ;;  %v1338_v58 = vpop.permute.xlu0 %1337  ;;  %v1287_v39 = vpop.permute.xlu1 %1286  ;;  %v6240_v9 = vld [vmem:[%s7639_s1 + $0x10] ss:$8 sps:$4 sm:$0xff]  }
  0xf1   : > { %4884 = vmatpush3.bf16.msra.mxu1 %v5857_v43  ;;  %4912 = vmatpush3.bf16.msra.mxu0 %v1342_v40 }
  0xf2   : > { %2784 = vrot.lane.b32.xlu0 %v6232_v41, %s5704_s22  ;;  %4885 = vmatprep.subr.bf16.mxu1 %v7657_v0 }
  0xf3   : > { %2701 = vrot.lane.b32.xlu1 %v6240_v9, %s5703_s15  ;;  %4913 = vmatprep.subr.bf16.mxu0 %v7657_v0 }
  0xf4   : > { %4849 = vmatprep.mubr.msk.bf16.mxu1 %vm5690_vm0, %v7657_v0  ;;  %v1289_v44 = vpop.permute.xlu0 %1288  ;;  %4917 = vmatprep.mubr.msk.bf16.mxu0 %vm5690_vm0, %v7657_v0  ;;  %v1536_v59 = vpop.permute.xlu1 %1535 }
  0xf5   : > { %4886 = vmatpush3.bf16.msra.mxu1 %v5866_v45  ;;  %4914 = vmatpush3.bf16.msra.mxu0 %v1340_v55  ;;  %v1299_v62 = vsel %vm1298_vm12, %v1287_v39, %v1289_v44  ;;  %v6272_v1 = vsel %vm290_vm1, %v1536_v59, 0  ;;  %v5652_v44 = vld [vmem:[%s5746_s17 + $0x10] sm:$0xff]  }
  0xf6   : > { %2703 = vrot.lane.b32.xlu0 %v5794_v14, %s5703_s15  ;;  %4887 = vmatprep.subr.bf16.mxu1 %v7657_v0 }
  0xf7   : > { %2786 = vrot.lane.b32.xlu1 %v6256_v60, %s5704_s22  ;;  %4915 = vmatprep.subr.bf16.mxu0 %v7657_v0  ;;  %v6349_v19 = vpop.f32.mrf.mxu0 }
  0xf8   : > { %4850 = vmatmul.mubr.msk.bf16.gmra.mxu1 %vm892_vm9, %v5794_v14  ;;  %v6263_v61 = vpop.permute.xlu0 %1533 }
  0xf9   : > { %4888 = vmatpush3.bf16.msra.mxu1 %v5874_v47  ;;  %4916 = vmatpush3.bf16.msra.mxu0 %v1338_v58  ;;  %v6267_v63 = vpop.permute.xlu1 %1531  ;;  %v4697_v32 = vpop.f32.mrf.mxu0 }
  0xfa   : > { %2788 = vrot.lane.b32.xlu0 %v5797_v15, %s5704_s22  ;;  %4889 = vmatprep.subr.bf16.mxu1 %v7657_v0 }
  0xfb   : > { %2961 = vrot.lane.b32.xlu1 %v6220_v57, %s5704_s22  ;;  %4951 = vmatprep.subr.bf16.mxu0 %v7657_v0  ;;  %v6362_v34 = vpop.f32.mrf.mxu0 }
  0xfc   : > { %4918 = vmatmul.mubr.msk.bf16.vlgmr.msra.gmra.mxu0 %vm7642_vm7, %v1299_v62  ;;  %4891 = vmatprep.mubr.msk.bf16.mxu1 %vm5690_vm0, %v7657_v0  ;;  %v6282_v3 = vpop.permute.xlu0 %1529 }
  0xfd   : > { %4890 = vmatpush3.bf16.msra.mxu1 %v5882_v49  ;;  %4952 = vmatpush3.bf16.msra.mxu0 %v6272_v1  ;;  %v1291_v4 = vpop.permute.xlu1 %1290 }
  0xfe   : > { %3072 = vrot.lane.b32.xlu0 %v5644_v2, %s5697_s8  ;;  %4929 = vmatprep.subr.bf16.mxu1 %v7657_v0 }
  0xff   : > { %2963 = vrot.lane.b32.xlu1 %v6240_v9, %s5704_s22  ;;  %4953 = vmatprep.subr.bf16.mxu0 %v7657_v0 }
 0x100   : > { %4892 = vmatmul.mubr.msk.bf16.vlgmr.msra.gmra.mxu1 %vm664_vm6, %v6220_v57  ;;  %v1293_v11 = vpop.permute.xlu0 %1292  ;;  %4921 = vmatprep.mubr.msk.bf16.mxu0 %vm5690_vm0, %v7657_v0 }
 0x101   : > { %4930 = vmatpush3.bf16.msra.mxu1 %v5989_v27  ;;  %4954 = vmatpush3.bf16.msra.mxu0 %v6263_v61  ;;  %v1300_v49 = vsel %vm1298_vm12, %v1291_v4, %v1293_v11  ;;  %v6300_v12 = vpop.permute.xlu1 %1527 }
 0x102   : > { %3070 = vrot.lane.b32.xlu0 %v5646_v5, %s5697_s8  ;;  %4955 = vmatprep.subr.bf16.mxu0 %v7657_v0  ;;  %v5654_v5 = vld [vmem:[%s5746_s17 + $0x8] sm:$0xff]  }
 0x103   : > { %3068 = vrot.lane.b32.xlu1 %v5645_v8, %s5697_s8  ;;  %4931 = vmatprep.subr.bf16.mxu1 %v7657_v0  ;;  %v5653_v8 = vld [vmem:[%s5746_s17] sm:$0xff]  }
 0x104   : > { %4895 = vmatprep.mubr.msk.bf16.mxu1 %vm5690_vm0, %v7657_v0  ;;  %4922 = vmatmul.mubr.msk.bf16.gmra.mxu0 %vm7642_vm7, %v1300_v49  ;;  %v6309_v13 = vpop.permute.xlu0 %1525 }
 0x105   : > { %4956 = vmatpush3.bf16.msra.mxu0 %v6267_v63  ;;  %4932 = vmatpush3.bf16.msra.mxu1 %v5822_v25  ;;  %v1295_v16 = vpop.permute.xlu1 %1294 }
 0x106   : > { %2965 = vrot.lane.b32.xlu0 %v5794_v14, %s5704_s22  ;;  %4957 = vmatprep.subr.bf16.mxu0 %v7657_v0 }
 0x107   : > { %3047 = vrot.lane.b32.xlu1 %v6232_v41, %s5705_s27  ;;  %4933 = vmatprep.subr.bf16.mxu1 %v7657_v0 }
 0x108   : > { %4896 = vmatmul.mubr.msk.bf16.gmra.mxu1 %vm664_vm6, %v6240_v9  ;;  %v1297_v18 = vpop.permute.xlu0 %1296  ;;  %4925 = vmatprep.mubr.msk.bf16.mxu0 %vm5690_vm0, %v7657_v0 }
 0x109   : > { %4958 = vmatpush3.bf16.msra.mxu0 %v6282_v3  ;;  %4934 = vmatpush3.bf16.msra.mxu1 %v5835_v33  ;;  %v1301_v21 = vsel %vm1298_vm12, %v1295_v16, %v1297_v18  ;;  %v6327_v22 = vpop.permute.xlu1 %1523 }
 0x10a   : > { %3049 = vrot.lane.b32.xlu0 %v6256_v60, %s5705_s27  ;;  %4959 = vmatprep.subr.bf16.mxu0 %v7657_v0 }
 0x10b   : > { %3341 = vrot.lane.b32.xlu1 %v5647_v17, %s5697_s8  ;;  %4899 = vmatprep.mubr.msk.bf16.mxu1 %vm5690_vm0, %v7657_v0 }
 0x10c   : > { %4935 = vmatprep.subr.bf16.mxu1 %v7657_v0  ;;  %4926 = vmatmul.mubr.msk.bf16.gmra.mxu0 %vm7642_vm7, %v1301_v21  ;;  %v6338_v51 = vpop.permute.xlu0 %1521  ;;  %v5655_v21 = vld [vmem:[%s5746_s17 + $0x20] ss:$0 sps:$4 sm:$0xff]   ;;  %vm1877_vm7 = vcmask 523264  }
 0x10d   : > { %7670 = vst [vmem:[#allocation8_spill] sm:$0xff] %v6338_v51  ;;  %4960 = vmatpush3.bf16.msra.mxu0 %v6300_v12  ;;  %4936 = vmatpush3.bf16.msra.mxu1 %v5841_v37  ;;  %v1506_v28 = vpop.permute.xlu1 %1505 }
 0x10e   : > { %3339 = vrot.lane.b32.xlu0 %v5648_v23, %s5697_s8  ;;  %4961 = vmatprep.subr.bf16.mxu0 %v7657_v0 }
 0x10f   : > { %3051 = vrot.lane.b32.xlu1 %v5797_v15, %s5705_s27  ;;  %4937 = vmatprep.subr.bf16.mxu1 %v7657_v0 }
 0x110   : > { %4900 = vmatmul.mubr.msk.bf16.gmra.mxu1 %vm664_vm6, %v5794_v14  ;;  %v1508_v20 = vpop.permute.xlu0 %1507  ;;  %4967 = vmatprep.mubr.msk.bf16.mxu0 %vm5690_vm0, %v7657_v0 }
 0x111   : > { %4962 = vmatpush3.bf16.msra.mxu0 %v6309_v13  ;;  %4938 = vmatpush3.bf16.msra.mxu1 %v5843_v38  ;;  %v1510_v31 = vpop.permute.xlu1 %1509  ;;  %v4698_v38 = vpop.f32.mrf.mxu0  ;;  %v1518_v48 = vsel %vm1517_vm13, %v1506_v28, %v1508_v20 }
 0x112   : > { %3337 = vrot.lane.b32.xlu0 %v5650_v29, %s5697_s8  ;;  %4963 = vmatprep.subr.bf16.mxu0 %v7657_v0  ;;  %v5657_v29 = vld [vmem:[%s5746_s17 + $0x18] sm:$0xff]  }
 0x113   : > { %3335 = vrot.lane.b32.xlu1 %v5649_v30, %s5697_s8  ;;  %4939 = vmatprep.mubr.msk.bf16.mxu1 %vm5690_vm0, %v7657_v0  ;;  %v6373_v42 = vpop.f32.mrf.mxu0 }
 0x114   : > { %4979 = vmatprep.subr.bf16.mxu1 %v7657_v0  ;;  %v1512_v35 = vpop.permute.xlu0 %1511 }
 0x115   : > { %4964 = vmatpush3.bf16.msra.mxu0 %v6327_v22  ;;  %v6366_v36 = vpop.permute.xlu1 %1513  ;;  %v4701_v52 = vpop.f32.mrf.mxu0  ;;  %v1519_v56 = vsel %vm1517_vm13, %v1510_v31, %v1512_v35 }
 0x116   : > { %3224 = vrot.lane.b32.xlu0 %v6220_v57, %s5705_s27  ;;  %4965 = vmatprep.subr.bf16.mxu0 %v7657_v0 }
 0x117   : > { %3311 = vrot.lane.b32.xlu1 %v6232_v41, %s5706_s28  ;;  %v6388_v53 = vpop.f32.mrf.mxu0 }
 0x118   : > { %4940 = vmatmul.mubr.msk.bf16.vlgmr.msra.gmra.mxu1 %vm429_vm4, %v6220_v57  ;;  %v1516_v46 = vpop.permute.xlu0 %1515 }
 0x119   : > { %4980 = vmatpush3.bf16.msra.mxu1 %v5820_v24  ;;  %4966 = vmatpush3.bf16.msra.mxu0 %v6338_v51  ;;  %v6380_v50 = vpop.permute.xlu1 %1791  ;;  %v4702_v54 = vpop.f32.mrf.mxu0  ;;  %v1520_v49 = vsel %vm1517_vm13, %v6366_v36, %v1516_v46  ;;  %v5659_v36 = vld [vmem:[%s5746_s17] sm:$0xff]  }
 0x11a   : > { %3226 = vrot.lane.b32.xlu0 %v6240_v9, %s5705_s27  ;;  %5001 = vmatprep.subr.bf16.mxu0 %v7657_v0  ;;  %v1804_v18 = vsel %vm290_vm1, %v6380_v50, 0  ;;  %v178_v54 = vld [vmem:[%s7640_s2 + $0x8] sm:$0xff] }
 0x11b   : > { %3228 = vrot.lane.b32.xlu1 %v5794_v14, %s5705_s27  ;;  %4981 = vmatprep.subr.bf16.mxu1 %v7657_v0  ;;  %v6406_v6 = vpop.f32.mrf.mxu0  ;;  %s5708_s27 = smov 124  }
 0x11c   : > { %4968 = vmatmul.mubr.msk.bf16.vlgmr.msra.gmra.mxu0 %vm280_vm2, %v1518_v48  ;;  %4943 = vmatprep.mubr.msk.bf16.mxu1 %vm5690_vm0, %v7657_v0  ;;  %v6393_v7 = vpop.permute.xlu0 %1782 }
 0x11d   : > { %5002 = vmatpush3.bf16.msra.mxu0 %v6272_v1  ;;  %4982 = vmatpush3.bf16.msra.mxu1 %v5825_v26  ;;  %v6397_v40 = vpop.permute.xlu1 %1695  ;;  %v4705_v39 = vpop.f32.mrf.mxu0 }
 0x11e   : > { %3313 = vrot.lane.b32.xlu0 %v6256_v60, %s5706_s28  ;;  %5003 = vmatprep.subr.bf16.mxu0 %v7657_v0  ;;  %v179_v39 = vld [vmem:[%s7640_s2 + $0x10] sm:$0xff] }
 0x11f   : > { %3315 = vrot.lane.b32.xlu1 %v5797_v15, %s5706_s28  ;;  %4983 = vmatprep.subr.bf16.mxu1 %v7657_v0  ;;  %v347_v59 = vpop.f32.mrf.mxu0 }
 0x120   : > { %4944 = vmatmul.mubr.msk.bf16.gmra.mxu1 %vm429_vm4, %v6240_v9  ;;  %4971 = vmatprep.mubr.msk.bf16.mxu0 %vm5690_vm0, %v7657_v0  ;;  %v6412_v55 = vpop.permute.xlu0 %1697 }
 0x121   : > { %5004 = vmatpush3.bf16.msra.mxu0 %v6263_v61  ;;  %4984 = vmatpush3.bf16.msra.mxu1 %v5857_v43  ;;  %v6417_v58 = vpop.permute.xlu1 %1784  ;;  %v4706_v4 = vpop.f32.mrf.mxu0  ;;  %v1708_v32 = vsel %vm1707_vm15, %v6397_v40, %v6412_v55  ;;  %v177_v40 = vld [vmem:[%s7640_s2] sm:$0xff] }
 0x122   : > { %3496 = vrot.lane.b32.xlu0 %v6220_v57, %s5706_s28  ;;  %5005 = vmatprep.subr.bf16.mxu0 %v7657_v0 }
 0x123   : > { %3616 = vrot.lane.b32.xlu1 %v5651_v10, %s5697_s8  ;;  %4947 = vmatprep.mubr.msk.bf16.mxu1 %vm5690_vm0, %v7657_v0 }
 0x124   : > { %4972 = vmatmul.mubr.msk.bf16.gmra.mxu0 %vm280_vm2, %v1519_v56  ;;  %4985 = vmatprep.subr.bf16.mxu1 %v7657_v0  ;;  %v6428_v62 = vpop.permute.xlu0 %1699  ;;  %v180_v56 = vld [vmem:[%s7640_s2 + $0x18] sm:$0xff] }
 0x125   : > { %5006 = vmatpush3.bf16.msra.mxu0 %v6267_v63  ;;  %4986 = vmatpush3.bf16.msra.mxu1 %v5866_v45  ;;  %v6432_v2 = vpop.permute.xlu1 %1701 }
 0x126   : > { %3614 = vrot.lane.b32.xlu0 %v5652_v44, %s5697_s8  ;;  %5007 = vmatprep.subr.bf16.mxu0 %v7657_v0  ;;  %v1709_v50 = vsel %vm1707_vm15, %v6428_v62, %v6432_v2  ;;  %v181_v2 = vld [vmem:[%s7640_s2 + $0x20] sm:$0xff] }
 0x127   : > { %3498 = vrot.lane.b32.xlu1 %v6240_v9, %s5706_s28  ;;  %4975 = vmatprep.mubr.msk.bf16.mxu0 %vm5690_vm0, %v7657_v0 }
 0x128   : > { %4948 = vmatmul.mubr.msk.bf16.gmra.mxu1 %vm429_vm4, %v5794_v14  ;;  %4987 = vmatprep.subr.bf16.mxu1 %v7657_v0  ;;  %v6445_v11 = vpop.permute.xlu0 %1786 }
 0x129   : > { %5008 = vmatpush3.bf16.msra.mxu0 %v6282_v3  ;;  %4988 = vmatpush3.bf16.msra.mxu1 %v5874_v47  ;;  %v6451_v16 = vpop.permute.xlu1 %1703 }
 0x12a   : > { %3612 = vrot.lane.b32.xlu0 %v5654_v5, %s5697_s8  ;;  %5009 = vmatprep.subr.bf16.mxu0 %v7657_v0 }
 0x12b   : > { %3610 = vrot.lane.b32.xlu1 %v5653_v8, %s5697_s8  ;;  %4989 = vmatprep.mubr.msk.bf16.mxu1 %vm5690_vm0, %v7657_v0 }
 0x12c   : > { %4976 = vmatmul.mubr.msk.bf16.gmra.mxu0 %vm280_vm2, %v1520_v49  ;;  %5029 = vmatprep.subr.bf16.mxu1 %v7657_v0  ;;  %v6460_v17 = vpop.permute.xlu0 %1705 }
 0x12d   : > { %5010 = vmatpush3.bf16.msra.mxu0 %v6300_v12  ;;  %v6463_v47 = vpop.permute.xlu1 %1945  ;;  %5017 = vmatprep.mubr.msk.bf16.mxu0 %vm5690_vm0, %v7657_v0  ;;  %v1710_v59 = vsel %vm1707_vm15, %v6451_v16, %v6460_v17 }
 0x12e   : > { %3500 = vrot.lane.b32.xlu0 %v5794_v14, %s5706_s28  ;;  %5011 = vmatprep.subr.bf16.mxu0 %v7657_v0  ;;  %s5709_s28 = smov 125  }
 0x12f   : > { %3584 = vrot.lane.b32.xlu1 %v6232_v41, %s5707_s29  ;;  %v5656_v41 = vld [vmem:[%s5746_s17 + $0x10] sm:$0xff]  }
 0x130   : > { %4990 = vmatmul.mubr.msk.bf16.vlgmr.msra.gmra.mxu1 %vm1627_vm14, %v6220_v57  ;;  %v6477_v23 = vpop.permute.xlu0 %1947 }
 0x131   : > { %5030 = vmatpush3.bf16.msra.mxu1 %v1804_v18  ;;  %5012 = vmatpush3.bf16.msra.mxu0 %v6309_v13  ;;  %v6480_v28 = vpop.permute.xlu1 %2038 }
 0x132   : > { %3888 = vrot.lane.b32.xlu0 %v5655_v21, %s5697_s8  ;;  %5013 = vmatprep.subr.bf16.mxu0 %v7657_v0 }
 0x133   : > { %3586 = vrot.lane.b32.xlu1 %v6256_v60, %s5707_s29  ;;  %4993 = vmatprep.mubr.msk.bf16.mxu1 %vm5690_vm0, %v7657_v0  ;;  %v5658_v60 = vld [vmem:[%s5746_s17 + $0x8] sm:$0xff]  }
 0x134   : > { %v6490_v30 = vpop.permute.xlu0 %1949  ;;  %5043 = vmatprep.subr.bf16.mxu1 %v7657_v0 }
 0x135   : > { %5014 = vmatpush3.bf16.msra.mxu0 %v6327_v22  ;;  %v6494_v20 = vpop.permute.xlu1 %2027 }
 0x136   : > { %3886 = vrot.lane.b32.xlu0 %v5657_v29, %s5697_s8  ;;  %5015 = vmatprep.subr.bf16.mxu0 %v7657_v0 }
 0x137   : > { %3884 = vrot.lane.b32.xlu1 %v5656_v41, %s5697_s8  ;;  %v1952_v41 = vsel %vm1877_vm7, %v6463_v47, %v6393_v7 }
 0x138   : > { %4994 = vmatmul.mubr.msk.bf16.gmra.mxu1 %vm1627_vm14, %v6240_v9  ;;  %v6502_v31 = vpop.permute.xlu0 %2029 }
 0x139   : > { %5016 = vmatpush3.bf16.msra.mxu0 %v6338_v51  ;;  %4997 = vmatprep.mubr.msk.bf16.mxu1 %vm5690_vm0, %v7657_v0  ;;  %v6510_v35 = vpop.permute.xlu1 %2031 }
 0x13a   : > { %3588 = vrot.lane.b32.xlu0 %v5797_v15, %s5707_s29  ;;  %5063 = vmatprep.subr.bf16.mxu0 %v7657_v0 }
 0x13b   : > { %3882 = vrot.lane.b32.xlu1 %v5658_v60, %s5697_s8 }
 0x13c   : > { %5018 = vmatmul.mubr.msk.bf16.vlgmr.msra.gmra.mxu0 %vm280_vm2, %v1708_v32  ;;  %v6518_v38 = vpop.permute.xlu0 %2289 }
 0x13d   : > { %5064 = vmatpush3.bf16.msra.mxu0 %v6272_v1  ;;  %5021 = vmatprep.mubr.msk.bf16.mxu0 %vm5690_vm0, %v7657_v0  ;;  %v6523_v46 = vpop.permute.xlu1 %2287 }
 0x13e   : > { %3880 = vrot.lane.b32.xlu0 %v5659_v36, %s5697_s8  ;;  %5065 = vmatprep.subr.bf16.mxu0 %v7657_v0 }
 0x13f   : > { %3772 = vrot.lane.b32.xlu1 %v6220_v57, %s5707_s29 }
 0x140   : > { %4998 = vmatmul.mubr.msk.bf16.gmra.mxu1 %vm1627_vm14, %v5794_v14  ;;  %v6531_v48 = vpop.permute.xlu0 %2190 }
 0x141   : > { %5066 = vmatpush3.bf16.msra.mxu0 %v6263_v61  ;;  %5031 = vmatprep.mubr.msk.bf16.mxu1 %vm5690_vm0, %v7657_v0  ;;  %v6539_v52 = vpop.permute.xlu1 %2273 }
 0x142   : > { %3774 = vrot.lane.b32.xlu0 %v6240_v9, %s5707_s29  ;;  %5067 = vmatprep.subr.bf16.mxu0 %v7657_v0 }
 0x143   : > { %3776 = vrot.lane.b32.xlu1 %v5794_v14, %s5707_s29 }
 0x144   : > { %5022 = vmatmul.mubr.msk.bf16.gmra.mxu0 %vm280_vm2, %v1709_v50  ;;  %v6553_v10 = vpop.permute.xlu0 %2192 }
 0x145   : > { %5068 = vmatpush3.bf16.msra.mxu0 %v6267_v63  ;;  %5025 = vmatprep.mubr.msk.bf16.mxu0 %vm5690_vm0, %v7657_v0  ;;  %v6558_v55 = vpop.permute.xlu1 %2194 }
 0x146   : > { %184 = vperm.xlu0 %5579, %v177_v40   ;;  %5069 = vmatprep.subr.bf16.mxu0 %v7657_v0 }
 0x147   : > { %189 = vperm.xlu1 %5580, %v178_v54  }
 0x148   : > { %5032 = vmatmul.mubr.msk.bf16.vlgmr.msra.gmra.mxu1 %vm385_vm3, %v6393_v7  ;;  %v6569_v44 = vpop.permute.xlu0 %2275 }
 0x149   : > { %5044 = vmatpush3.bf16.msra.mxu1 %v5989_v27  ;;  %5070 = vmatpush3.bf16.msra.mxu0 %v6282_v3  ;;  %v6576_v62 = vpop.permute.xlu1 %2277 }
 0x14a   : > { %199 = vperm.xlu0 %5579, %v180_v56   ;;  %5071 = vmatprep.subr.bf16.mxu0 %v7657_v0  ;;  %v1953_v56 = vsel %vm1877_vm7, %v6477_v23, %v6417_v58 }
 0x14b   : > { %194 = vperm.xlu1 %5580, %v179_v39   ;;  %5045 = vmatprep.subr.bf16.mxu1 %v7657_v0 }
 0x14c   : > { %5026 = vmatmul.mubr.msk.bf16.gmra.mxu0 %vm280_vm2, %v1710_v59  ;;  %5035 = vmatprep.mubr.msk.bf16.mxu1 %vm5690_vm0, %v7657_v0  ;;  %v6586_v4 = vpop.permute.xlu0 %2444 }
 0x14d   : > { %5072 = vmatpush3.bf16.msra.mxu0 %v6300_v12  ;;  %5046 = vmatpush3.bf16.msra.mxu1 %v5822_v25  ;;  %v6590_v5 = vpop.permute.xlu1 %2446 }
 0x14e   : > { %5073 = vmatprep.subr.bf16.mxu0 %v7657_v0  ;;  %5047 = vmatprep.subr.bf16.mxu1 %v7657_v0 }
 0x14f   : > { %204 = vperm.xlu1 %5580, %v181_v2   ;;  %5079 = vmatprep.mubr.msk.bf16.mxu0 %vm5690_vm0, %v7657_v0 }
 0x150   : > { %5036 = vmatmul.mubr.msk.bf16.gmra.mxu1 %vm385_vm3, %v6417_v58  ;;  %v6598_v8 = vpop.permute.xlu0 %2546 }
 0x151   : > { %5074 = vmatpush3.bf16.msra.mxu0 %v6309_v13  ;;  %5048 = vmatpush3.bf16.msra.mxu1 %v5835_v33  ;;  %v6602_v49 = vpop.permute.xlu1 %2544 }
 0x152   : > { %5075 = vmatprep.subr.bf16.mxu0 %v7657_v0  ;;  %5039 = vmatprep.mubr.msk.bf16.mxu1 %vm5690_vm0, %v7657_v0 }
 0x153   : > { %5049 = vmatprep.subr.bf16.mxu1 %v7657_v0 }
 0x154   : > { %v6608_v16 = vpop.permute.xlu0 %2448 }
 0x155   : > { %5076 = vmatpush3.bf16.msra.mxu0 %v6327_v22  ;;  %5050 = vmatpush3.bf16.msra.mxu1 %v5841_v37  ;;  %v6612_v17 = vpop.permute.xlu1 %2528 }
 0x156   : > { %5077 = vmatprep.subr.bf16.mxu0 %v7657_v0  ;;  %5091 = vmatprep.subr.bf16.mxu1 %v7657_v0 }
 0x158   : > { %v6616_v18 = vpop.f32.mrf.mxu1  ;;  %5040 = vmatmul.mubr.msk.bf16.gmra.mxu1 %vm385_vm3, %v6445_v11  ;;  %v6620_v21 = vpop.permute.xlu0 %2530 }
 0x159   : > { %5078 = vmatpush3.bf16.msra.mxu0 %v6338_v51  ;;  %5051 = vmatprep.mubr.msk.bf16.mxu1 %vm5690_vm0, %v7657_v0  ;;  %v6625_v37 = vpop.permute.xlu1 %2807 }
 0x15a   : > { %v4719_v29 = vpop.f32.mrf.mxu1  ;;  %5105 = vmatprep.subr.bf16.mxu0 %v7657_v0 }
 0x15c   : > { %v6631_v60 = vpop.f32.mrf.mxu1  ;;  %5080 = vmatmul.mubr.msk.bf16.vlgmr.msra.gmra.mxu0 %vm280_vm2, %v1952_v41  ;;  %v6634_v32 = vpop.permute.xlu0 %2532 }
 0x15d   : > { %7671 = vst [vmem:[#allocation9_spill] sm:$0xff] %v6634_v32  ;;  %5083 = vmatprep.mubr.msk.bf16.mxu0 %vm5690_vm0, %v7657_v0  ;;  %v6638_v36 = vpop.permute.xlu1 %2805  ;;  %5106 = vmatpush3.bf16.msra.mxu0 %v5820_v24 }
 0x15e   : > { %7672 = vst [vmem:[#allocation10_spill] sm:$0xff] %v6638_v36  ;;  %v4720_v50 = vpop.f32.mrf.mxu1  ;;  %5107 = vmatprep.subr.bf16.mxu0 %v7657_v0 }
 0x15f   : > { %v1954_v50 = vsel %vm1877_vm7, %v6490_v30, %v6445_v11 }
 0x160   : > { %v6642_v40 = vpop.f32.mrf.mxu1  ;;  %5052 = vmatmul.mubr.msk.bf16.vlgmr.msra.gmra.mxu1 %vm1877_vm7, %v6220_v57  ;;  %v6646_v7 = vpop.permute.xlu0 %2803 }
 0x161   : > { %7673 = vst [vmem:[#allocation11_spill] sm:$0xff] %v6646_v7  ;;  %5092 = vmatpush3.bf16.msra.mxu1 %v6480_v28  ;;  %5055 = vmatprep.mubr.msk.bf16.mxu1 %vm5690_vm0, %v7657_v0  ;;  %v6651_v47 = vpop.permute.xlu1 %2699 }
 0x162   : > { %7674 = vst [vmem:[#allocation12_spill] sm:$0xff] %v6651_v47  ;;  %v4723_v54 = vpop.f32.mrf.mxu1  ;;  %5108 = vmatpush3.bf16.msra.mxu0 %v5825_v26  ;;  %5125 = vmatprep.subr.bf16.mxu1 %v7657_v0 }
 0x163   : > { %5109 = vmatprep.subr.bf16.mxu0 %v7657_v0 }
 0x164   : > { %v6659_v39 = vpop.f32.mrf.mxu1  ;;  %5084 = vmatmul.mubr.msk.bf16.gmra.mxu0 %vm280_vm2, %v1953_v56  ;;  %v6662_v28 = vpop.permute.xlu0 %2784 }
 0x165   : > { %7675 = vst [vmem:[#allocation13_spill] sm:$0xff] %v6662_v28  ;;  %5087 = vmatprep.mubr.msk.bf16.mxu0 %vm5690_vm0, %v7657_v0  ;;  %v6666_v59 = vpop.permute.xlu1 %2701 }
 0x166   : > { %7676 = vst [vmem:[#allocation14_spill] sm:$0xff] %v6666_v59  ;;  %v4724_v2 = vpop.f32.mrf.mxu1  ;;  %5110 = vmatpush3.bf16.msra.mxu0 %v5857_v43 }
 0x167   : > { %5111 = vmatprep.subr.bf16.mxu0 %v7657_v0 }
 0x168   : > { %v6670_v29 = vpop.f32.mrf.mxu1  ;;  %5056 = vmatmul.mubr.msk.bf16.gmra.mxu1 %vm1877_vm7, %v6240_v9  ;;  %v6674_v58 = vpop.permute.xlu0 %2703 }
 0x169   : > { %7677 = vst [vmem:[#allocation15_spill] sm:$0xff] %v6670_v29  ;;  %7678 = vst [vmem:[#allocation16_spill] sm:$0xff] %v6674_v58  ;;  %5059 = vmatprep.mubr.msk.bf16.mxu1 %vm5690_vm0, %v7657_v0  ;;  %v6678_v23 = vpop.permute.xlu1 %2786  ;;  %v2197_v29 = vsel %vm1627_vm14, %v6531_v48, %v6494_v20 }
 0x16a   : > { %7679 = vst [vmem:[#allocation17_spill] sm:$0xff] %v6678_v23  ;;  %v4727_v41 = vpop.f32.mrf.mxu1  ;;  %5112 = vmatpush3.bf16.msra.mxu0 %v5866_v45 }
 0x16b   : > { %5153 = vmatprep.subr.bf16.mxu0 %v7657_v0 }
 0x16c   : > { %v492_v54 = vpop.f32.mrf.mxu1  ;;  %5088 = vmatmul.mubr.msk.bf16.gmra.mxu0 %vm280_vm2, %v1954_v50  ;;  %v6686_v56 = vpop.f32.mrf.mxu0 }
 0x16d   : > { %5113 = vmatprep.mubr.msk.bf16.mxu0 %vm5690_vm0, %v7657_v0  ;;  %v6690_v2 = vpop.permute.xlu1 %2961  ;;  %v6692_v15 = vpop.permute.xlu0 %2788  ;;  %v2303_v54 = vsel %vm290_vm1, %v6518_v38, 0 }
 0x16e   : > { %7680 = vst [vmem:[#allocation18_spill] sm:$0xff] %v6690_v2  ;;  %7681 = vst [vmem:[#allocation19_spill] sm:$0xff] %v6692_v15  ;;  %v4728_v41 = vpop.f32.mrf.mxu1  ;;  %v4769_v45 = vpop.f32.mrf.mxu0 }
 0x170   : > { %5060 = vmatmul.mubr.msk.bf16.gmra.mxu1 %vm1877_vm7, %v5794_v14  ;;  %v6696_v11 = vpop.f32.mrf.mxu0 }
 0x171   : > { %5093 = vmatprep.mubr.msk.bf16.mxu1 %vm5690_vm0, %v7657_v0  ;;  %v6700_v30 = vpop.permute.xlu1 %2963  ;;  %v6702_v50 = vpop.permute.xlu0 %3072 }
 0x172   : > { %7682 = vst [vmem:[#allocation20_spill] sm:$0xff] %v6700_v30  ;;  %7683 = vst [vmem:[#allocation21_spill] sm:$0xff] %v6702_v50  ;;  %v4770_v2 = vpop.f32.mrf.mxu0 }
 0x174   : > { %v6706_v58 = vpop.f32.mrf.mxu1  ;;  %5114 = vmatmul.mubr.msk.bf16.vlgmr.msra.gmra.mxu0 %vm1707_vm15, %v6220_v57  ;;  %v6710_v41 = vpop.f32.mrf.mxu0 }
 0x175   : > { %5117 = vmatprep.mubr.msk.bf16.mxu0 %vm5690_vm0, %v7657_v0  ;;  %v6714_v45 = vpop.permute.xlu1 %3068  ;;  %v6716_v59 = vpop.permute.xlu0 %3070  ;;  %5154 = vmatpush3.bf16.msra.mxu0 %v2303_v54 }
 0x176   : > { %7684 = vst [vmem:[#allocation22_spill] sm:$0xff] %v6714_v45  ;;  %7685 = vst [vmem:[#allocation23_spill] sm:$0xff] %v6716_v59  ;;  %v4745_v30 = vpop.f32.mrf.mxu1  ;;  %v4773_v50 = vpop.f32.mrf.mxu0  ;;  %5155 = vmatprep.subr.bf16.mxu0 %v7657_v0 }
 0x178   : > { %v6719_v38 = vpop.f32.mrf.mxu1  ;;  %5094 = vmatmul.mubr.msk.bf16.vlgmr.msra.gmra.mxu1 %vm615_vm5, %v6494_v20  ;;  %v6723_v2 = vpop.f32.mrf.mxu0 }
 0x179   : > { %5126 = vmatpush3.bf16.msra.mxu1 %v6272_v1  ;;  %5097 = vmatprep.mubr.msk.bf16.mxu1 %vm5690_vm0, %v7657_v0  ;;  %v6728_v45 = vpop.permute.xlu1 %3047  ;;  %v6730_v59 = vpop.permute.xlu0 %2965 }
 0x17a   : > { %7686 = vst [vmem:[#allocation24_spill] sm:$0xff] %v6728_v45  ;;  %7687 = vst [vmem:[#allocation25_spill] sm:$0xff] %v6730_v59  ;;  %v4746_v30 = vpop.f32.mrf.mxu1  ;;  %5127 = vmatprep.subr.bf16.mxu1 %v7657_v0  ;;  %v4774_v50 = vpop.f32.mrf.mxu0  ;;  %5156 = vmatpush3.bf16.msra.mxu0 %v6523_v46 }
 0x17b   : > { %5187 = vmatprep.subr.bf16.mxu0 %v7657_v0 }
 0x17c   : > { %v6735_v54 = vpop.f32.mrf.mxu1  ;;  %5118 = vmatmul.mubr.msk.bf16.gmra.mxu0 %vm1707_vm15, %v6240_v9  ;;  %v6739_v15 = vpop.f32.mrf.mxu0 }
 0x17d   : > { %7688 = vst [vmem:[#allocation26_spill] sm:$0xff] %v6739_v15  ;;  %5128 = vmatpush3.bf16.msra.mxu1 %v6263_v61  ;;  %5121 = vmatprep.mubr.msk.bf16.mxu0 %vm5690_vm0, %v7657_v0  ;;  %v6744_v30 = vpop.permute.xlu1 %3341  ;;  %v6746_v45 = vpop.permute.xlu0 %3049 }
 0x17e   : > { %7689 = vst [vmem:[#allocation27_spill] sm:$0xff] %v6744_v30  ;;  %7690 = vst [vmem:[#allocation28_spill] sm:$0xff] %v6746_v45  ;;  %v4749_v50 = vpop.f32.mrf.mxu1  ;;  %5129 = vmatprep.subr.bf16.mxu1 %v7657_v0  ;;  %v4777_v46 = vpop.f32.mrf.mxu0 }
 0x180   : > { %v6749_v59 = vpop.f32.mrf.mxu1  ;;  %5098 = vmatmul.mubr.msk.bf16.gmra.mxu1 %vm615_vm5, %v6502_v31  ;;  %v730_v9 = vpop.f32.mrf.mxu0 }
 0x181   : > { %5130 = vmatpush3.bf16.msra.mxu1 %v6267_v63  ;;  %5101 = vmatprep.mubr.msk.bf16.mxu1 %vm5690_vm0, %v7657_v0  ;;  %v6756_v47 = vpop.permute.xlu1 %3051  ;;  %v6758_v30 = vpop.permute.xlu0 %3339 }
 0x182   : > { %7691 = vst [vmem:[#allocation29_spill] sm:$0xff] %v6756_v47  ;;  %7692 = vst [vmem:[#allocation30_spill] sm:$0xff] %v6758_v30  ;;  %v4750_v45 = vpop.f32.mrf.mxu1  ;;  %5131 = vmatprep.subr.bf16.mxu1 %v7657_v0  ;;  %v4778_v50 = vpop.f32.mrf.mxu0 }
 0x184   : > { %v6761_v46 = vpop.f32.mrf.mxu1  ;;  %5122 = vmatmul.mubr.msk.bf16.gmra.mxu0 %vm1707_vm15, %v5794_v14  ;;  %v6765_v23 = vpop.f32.mrf.mxu0 }
 0x185   : > { %5132 = vmatpush3.bf16.msra.mxu1 %v6282_v3  ;;  %5157 = vmatprep.mubr.msk.bf16.mxu0 %vm5690_vm0, %v7657_v0  ;;  %v6770_v9 = vpop.permute.xlu1 %3335  ;;  %v6772_v47 = vpop.permute.xlu0 %3337 }
 0x186   : > { %7693 = vst [vmem:[#allocation31_spill] sm:$0xff] %v6770_v9  ;;  %7694 = vst [vmem:[#allocation32_spill] sm:$0xff] %v6772_v47  ;;  %v4753_v45 = vpop.f32.mrf.mxu1  ;;  %5133 = vmatprep.subr.bf16.mxu1 %v7657_v0  ;;  %v4819_v50 = vpop.f32.mrf.mxu0 }
 0x188   : > { %v584_v30 = vpop.f32.mrf.mxu1  ;;  %5102 = vmatmul.mubr.msk.bf16.gmra.mxu1 %vm615_vm5, %v6510_v35  ;;  %v6777_v28 = vpop.f32.mrf.mxu0 }
 0x189   : > { %5134 = vmatpush3.bf16.msra.mxu1 %v6300_v12  ;;  %v6780_v32 = vpop.permute.xlu1 %3311  ;;  %v6782_v7 = vpop.permute.xlu0 %3224  ;;  %5141 = vmatprep.mubr.msk.bf16.mxu1 %vm5690_vm0, %v7657_v0 }
 0x18a   : > { %7695 = vst [vmem:[#allocation33_spill] sm:$0xff] %v6780_v32  ;;  %7696 = vst [vmem:[#allocation34_spill] sm:$0xff] %v6782_v7  ;;  %v4754_v9 = vpop.f32.mrf.mxu1  ;;  %5135 = vmatprep.subr.bf16.mxu1 %v7657_v0  ;;  %v4820_v45 = vpop.f32.mrf.mxu0 }
 0x18c   : > { %5158 = vmatmul.mubr.msk.bf16.vlgmr.msra.gmra.mxu0 %vm840_vm8, %v6539_v52  ;;  %v6789_v30 = vpop.f32.mrf.mxu0 }
 0x18d   : > { %5136 = vmatpush3.bf16.msra.mxu1 %v6309_v13  ;;  %5188 = vmatpush3.bf16.msra.mxu0 %v6272_v1  ;;  %v6793_v50 = vpop.permute.xlu1 %3228  ;;  %v6795_v32 = vpop.permute.xlu0 %3226 }
 0x18e   : > { %7697 = vst [vmem:[#allocation35_spill] sm:$0xff] %v6793_v50  ;;  %7698 = vst [vmem:[#allocation36_spill] sm:$0xff] %v6795_v32  ;;  %5137 = vmatprep.subr.bf16.mxu1 %v7657_v0  ;;  %5189 = vmatprep.subr.bf16.mxu0 %v7657_v0  ;;  %v4823_v9 = vpop.f32.mrf.mxu0 }
 0x18f   : > { %5161 = vmatprep.mubr.msk.bf16.mxu0 %vm5690_vm0, %v7657_v0 }
 0x190   : > { %v6801_v45 = vpop.f32.mrf.mxu1  ;;  %v6803_v7 = vpop.f32.mrf.mxu0 }
 0x191   : > { %5138 = vmatpush3.bf16.msra.mxu1 %v6327_v22  ;;  %5190 = vmatpush3.bf16.msra.mxu0 %v6263_v61  ;;  %v6807_v47 = vpop.permute.xlu1 %3315  ;;  %v6809_v50 = vpop.permute.xlu0 %3313 }
 0x192   : > { %7699 = vst [vmem:[#allocation37_spill] sm:$0xff] %v6807_v47  ;;  %7700 = vst [vmem:[#allocation38_spill] sm:$0xff] %v6809_v50  ;;  %v4795_v32 = vpop.f32.mrf.mxu1  ;;  %5139 = vmatprep.subr.bf16.mxu1 %v7657_v0  ;;  %5191 = vmatprep.subr.bf16.mxu0 %v7657_v0  ;;  %v4824_v9 = vpop.f32.mrf.mxu0 }
 0x194   : > { %v6813_v36 = vpop.f32.mrf.mxu1  ;;  %5162 = vmatmul.mubr.msk.bf16.gmra.mxu0 %vm840_vm8, %v6569_v44  ;;  %v6817_v15 = vpop.f32.mrf.mxu0 }
 0x195   : > { %7701 = vst [vmem:[#allocation39_spill] sm:$0xff] %v6817_v15  ;;  %5140 = vmatpush3.bf16.msra.mxu1 %v6338_v51  ;;  %5192 = vmatpush3.bf16.msra.mxu0 %v6267_v63  ;;  %v6821_v47 = vpop.permute.xlu1 %3616  ;;  %v6823_v50 = vpop.permute.xlu0 %3496 }
 0x196   : > { %7702 = vst [vmem:[#allocation40_spill] sm:$0xff] %v6821_v47  ;;  %7703 = vst [vmem:[#allocation41_spill] sm:$0xff] %v6823_v50  ;;  %v4796_v32 = vpop.f32.mrf.mxu1  ;;  %5169 = vmatprep.subr.bf16.mxu1 %v7657_v0  ;;  %5193 = vmatprep.subr.bf16.mxu0 %v7657_v0  ;;  %v4827_v9 = vpop.f32.mrf.mxu0 }
 0x197   : > { %5165 = vmatprep.mubr.msk.bf16.mxu0 %vm5690_vm0, %v7657_v0 }
 0x198   : > { %5142 = vmatmul.mubr.msk.bf16.vlgmr.msra.gmra.mxu1 %vm280_vm2, %v2197_v29  ;;  %v6833_v15 = vpop.f32.mrf.mxu1  ;;  %v955_v47 = vpop.f32.mrf.mxu0 }
 0x199   : > { %5170 = vmatpush3.bf16.msra.mxu1 %v5989_v27  ;;  %5194 = vmatpush3.bf16.msra.mxu0 %v6282_v3  ;;  %v6837_v32 = vpop.permute.xlu1 %3498  ;;  %v6839_v50 = vpop.permute.xlu0 %3614 }
 0x19a   : > { %7704 = vst [vmem:[#allocation42_spill] sm:$0xff] %v6837_v32  ;;  %7705 = vst [vmem:[#allocation43_spill] sm:$0xff] %v6839_v50  ;;  %v4799_v9 = vpop.f32.mrf.mxu1  ;;  %5195 = vmatprep.subr.bf16.mxu0 %v7657_v0  ;;  %5145 = vmatprep.mubr.msk.bf16.mxu1 %vm5690_vm0, %v7657_v0  ;;  %v4828_v20 = vpop.f32.mrf.mxu0 }
 0x19b   : > { %5171 = vmatprep.subr.bf16.mxu1 %v7657_v0  ;;  %v2198_v20 = vsel %vm1627_vm14, %v6553_v10, %v6502_v31 }
 0x19c   : > { %v6845_v48 = vpop.f32.mrf.mxu1  ;;  %5166 = vmatmul.mubr.msk.bf16.gmra.mxu0 %vm840_vm8, %v6576_v62 }
 0x19d   : > { %5196 = vmatpush3.bf16.msra.mxu0 %v6300_v12  ;;  %5172 = vmatpush3.bf16.msra.mxu1 %v5822_v25  ;;  %v6851_v47 = vpop.permute.xlu1 %3610  ;;  %v6853_v29 = vpop.permute.xlu0 %3612 }
 0x19e   : > { %7706 = vst [vmem:[#allocation44_spill] sm:$0xff] %v6851_v47  ;;  %7707 = vst [vmem:[#allocation45_spill] sm:$0xff] %v6853_v29  ;;  %v4800_v9 = vpop.f32.mrf.mxu1  ;;  %5197 = vmatprep.subr.bf16.mxu0 %v7657_v0  ;;  %5173 = vmatprep.subr.bf16.mxu1 %v7657_v0 }
 0x19f   : > { %5203 = vmatprep.mubr.msk.bf16.mxu0 %vm5690_vm0, %v7657_v0 }
 0x1a0   : > { %5146 = vmatmul.mubr.msk.bf16.gmra.mxu1 %vm280_vm2, %v2198_v20  ;;  %v6863_v50 = vpop.f32.mrf.mxu1  ;;  %v6865_v32 = vpop.f32.mrf.mxu0 }
 0x1a1   : > { %5198 = vmatpush3.bf16.msra.mxu0 %v6309_v13  ;;  %5149 = vmatprep.mubr.msk.bf16.mxu1 %vm5690_vm0, %v7657_v0  ;;  %v6870_v9 = vpop.permute.xlu1 %3584  ;;  %v6872_v47 = vpop.permute.xlu0 %3500 }
 0x1a2   : > { %7708 = vst [vmem:[#allocation46_spill] sm:$0xff] %v6870_v9  ;;  %7709 = vst [vmem:[#allocation47_spill] sm:$0xff] %v6872_v47  ;;  %v4803_v29 = vpop.f32.mrf.mxu1  ;;  %5199 = vmatprep.subr.bf16.mxu0 %v7657_v0  ;;  %v4869_v31 = vpop.f32.mrf.mxu0  ;;  %5174 = vmatpush3.bf16.msra.mxu1 %v5835_v33 }
 0x1a3   : > { %5215 = vmatprep.subr.bf16.mxu1 %v7657_v0  ;;  %v2199_v31 = vsel %vm1627_vm14, %v6558_v55, %v6510_v35  ;;  %v2451_v35 = vsel %vm429_vm4, %v6586_v4, %v6539_v52 }
 0x1a4   : > { %v808_v10 = vpop.f32.mrf.mxu1  ;;  %v6877_v20 = vpop.f32.mrf.mxu0 }
 0x1a5   : > { %5200 = vmatpush3.bf16.msra.mxu0 %v6327_v22  ;;  %v6880_v25 = vpop.permute.xlu1 %3586  ;;  %v6882_v27 = vpop.permute.xlu0 %3888 }
 0x1a6   : > { %7710 = vst [vmem:[#allocation48_spill] sm:$0xff] %v6880_v25  ;;  %7711 = vst [vmem:[#allocation49_spill] sm:$0xff] %v6882_v27  ;;  %v4804_v9 = vpop.f32.mrf.mxu1  ;;  %5201 = vmatprep.subr.bf16.mxu0 %v7657_v0  ;;  %v4870_v29 = vpop.f32.mrf.mxu0 }
 0x1a8   : > { %5150 = vmatmul.mubr.msk.bf16.gmra.mxu1 %vm280_vm2, %v2199_v31  ;;  %v6889_v33 = vpop.f32.mrf.mxu1  ;;  %v6891_v10 = vpop.f32.mrf.mxu0 }
 0x1a9   : > { %5202 = vmatpush3.bf16.msra.mxu0 %v6338_v51  ;;  %5175 = vmatprep.mubr.msk.bf16.mxu1 %vm5690_vm0, %v7657_v0  ;;  %v6896_v25 = vpop.permute.xlu1 %3884  ;;  %v6898_v9 = vpop.permute.xlu0 %3886 }
 0x1aa   : > { %7712 = vst [vmem:[#allocation50_spill] sm:$0xff] %v6896_v25  ;;  %7713 = vst [vmem:[#allocation51_spill] sm:$0xff] %v6898_v9  ;;  %v4843_v29 = vpop.f32.mrf.mxu1  ;;  %v4873_v27 = vpop.f32.mrf.mxu0  ;;  %5231 = vmatprep.subr.bf16.mxu0 %v7657_v0 }
 0x1ac   : > { %5204 = vmatmul.mubr.msk.bf16.vlgmr.msra.gmra.mxu0 %vm280_vm2, %v2451_v35  ;;  %v1016_v55 = vpop.f32.mrf.mxu1  ;;  %v6905_v31 = vpop.f32.mrf.mxu0  ;;  %v2452_v35 = vsel %vm429_vm4, %v6590_v5, %v6569_v44  ;;  %v6946_v44 = vld [vmem:[%s7639_s1 + $0x10] ss:$8 sps:$4 sm:$0xff]  }
 0x1ad   : > { %5207 = vmatprep.mubr.msk.bf16.mxu0 %vm5690_vm0, %v7657_v0  ;;  %5232 = vmatpush3.bf16.msra.mxu0 %v5820_v24  ;;  %v6911_v27 = vpop.permute.xlu1 %3882  ;;  %v6913_v29 = vpop.permute.xlu0 %3588 }
 0x1ae   : > { %v4844_v25 = vpop.f32.mrf.mxu1  ;;  %v4874_v9 = vpop.f32.mrf.mxu0  ;;  %5233 = vmatprep.subr.bf16.mxu0 %v7657_v0  ;;  %7714 = vst [vmem:[#allocation52_spill] sm:$0xff] %v6911_v27  ;;  %7715 = vst [vmem:[#allocation53_spill] sm:$0xff] %v6913_v29 }
 0x1b0   : > { %5176 = vmatmul.mubr.msk.bf16.vlgmr.msra.gmra.mxu1 %vm1517_vm13, %v6220_v57  ;;  %v6917_v52 = vpop.f32.mrf.mxu1  ;;  %v6919_v4 = vpop.f32.mrf.mxu0 }
 0x1b1   : > { %5216 = vmatpush3.bf16.msra.mxu1 %v6598_v8  ;;  %5179 = vmatprep.mubr.msk.bf16.mxu1 %vm5690_vm0, %v7657_v0  ;;  %v6933_v29 = vpop.permute.xlu1 %3772  ;;  %v6935_v27 = vpop.permute.xlu0 %3880 }
 0x1b2   : > { %v4847_v25 = vpop.f32.mrf.mxu1  ;;  %v4877_v9 = vpop.f32.mrf.mxu0  ;;  %5217 = vmatprep.subr.bf16.mxu1 %v7657_v0  ;;  %5234 = vmatpush3.bf16.msra.mxu0 %v5825_v26  ;;  %7716 = vst [vmem:[#allocation54_spill] sm:$0xff] %v6933_v29  ;;  %7717 = vst [vmem:[#allocation55_spill] sm:$0xff] %v6935_v27 }
 0x1b3   : > { %5235 = vmatprep.subr.bf16.mxu0 %v7657_v0 }
 0x1b4   : > { %5208 = vmatmul.mubr.msk.bf16.gmra.mxu0 %vm280_vm2, %v2452_v35  ;;  %v6931_v57 = vpop.f32.mrf.mxu1  ;;  %v1187_v8 = vpop.f32.mrf.mxu0 }
 0x1b5   : > { %5211 = vmatprep.mubr.msk.bf16.mxu0 %vm5690_vm0, %v7657_v0  ;;  %5218 = vmatpush3.bf16.msra.mxu1 %v6602_v49  ;;  %v6957_v35 = vpop.permute.xlu1 %3776  ;;  %v6959_v8 = vpop.permute.xlu0 %3774 }
 0x1b6   : > { %v4848_v25 = vpop.f32.mrf.mxu1  ;;  %v4878_v9 = vpop.f32.mrf.mxu0  ;;  %5236 = vmatpush3.bf16.msra.mxu0 %v5857_v43  ;;  %5249 = vmatprep.subr.bf16.mxu1 %v7657_v0  ;;  %v2453_v43 = vsel %vm429_vm4, %v6608_v16, %v6576_v62  ;;  %7718 = vst [vmem:[#allocation56_spill] sm:$0xff] %v6957_v35  ;;  %7719 = vst [vmem:[#allocation57_spill] sm:$0xff] %v6959_v8  ;;  %v2821_v16 = vsel %vm290_vm1, %v6625_v37, 0  ;;  %vm7760_vm4 = vcmask 916480  }
 0x1b7   : > { %5277 = vmatprep.subr.bf16.mxu0 %v7657_v0 }
 0x1b8   : > { %5180 = vmatmul.mubr.msk.bf16.gmra.mxu1 %vm1517_vm13, %v6946_v44  ;;  %v6950_v5 = vpop.f32.mrf.mxu1 }
 0x1b9   : > { %5183 = vmatprep.mubr.msk.bf16.mxu1 %vm5690_vm0, %v7657_v0 }
 0x1ba   : > { %v4851_v49 = vpop.f32.mrf.mxu1 }
 0x1bc   : > { %5212 = vmatmul.mubr.msk.bf16.gmra.mxu0 %vm280_vm2, %v2453_v43  ;;  %v1032_v25 = vpop.f32.mrf.mxu1  ;;  %v6962_v9 = vpop.f32.mrf.mxu0 }
 0x1bd   : > { %5237 = vmatprep.mubr.msk.bf16.mxu0 %vm5690_vm0, %v7657_v0 }
 0x1be   : > { %v4852_v29 = vpop.f32.mrf.mxu1  ;;  %v4919_v27 = vpop.f32.mrf.mxu0 }
 0x1c0   : > { %5184 = vmatmul.mubr.msk.bf16.gmra.mxu1 %vm1517_vm13, %v5794_v14  ;;  %v6968_v49 = vpop.f32.mrf.mxu1  ;;  %v1404_v62 = vpop.f32.mrf.mxu0 }
 0x1c1   : > { %v6972_v35 = vpop.permute.xlu0 %184  ;;  %5219 = vmatprep.mubr.msk.bf16.mxu1 %vm5690_vm0, %v7657_v0 }
 0x1c2   : > { %v6976_v43 = vpop.permute.xlu1 %189  ;;  %v4893_v25 = vpop.f32.mrf.mxu1  ;;  %v350_v27 = vadd.f32 %v6349_v19, %v6972_v35  ;;  %v587_v29 = vadd.f32 %v6706_v58, %v6972_v35  ;;  %v811_v8 = vadd.f32 %v6801_v45, %v6972_v35  ;;  %v1035_v37 = vadd.f32 %v6889_v33, %v6972_v35  ;;  %v6996_v58 = vld [vmem:[%s7639_s1] ss:$8 sps:$4 sm:$0xff]  }
 0x1c3   : > { %v351_v47 = vadd.f32 %v6362_v34, %v6976_v43  ;;  %v588_v0 = vadd.f32 %v6719_v38, %v6976_v43  ;;  %v812_v25 = vadd.f32 %v6813_v36, %v6976_v43  ;;  %v1036_v19 = vadd.f32 %v1016_v55, %v6976_v43  ;;  %v4920_v26 = vpop.f32.mrf.mxu0  ;;  %7720 = vst [vmem:[#allocation58_spill] sm:$0xff] %v6996_v58 }
 0x1c4   : > { %5238 = vmatmul.mubr.msk.bf16.vlgmr.msra.gmra.mxu0 %vm1298_vm12, %v6996_v58  ;;  %v1248_v45 = vpop.f32.mrf.mxu1  ;;  %v7001_v34 = vadd.f32 %v6616_v18, %v350_v27  ;;  %v7004_v38 = vadd.f32 %v6686_v56, %v587_v29  ;;  %v7007_v36 = vadd.f32 %v6765_v23, %v811_v8  ;;  %v7010_v26 = vadd.f32 %v6865_v32, %v1035_v37 }
 0x1c5   : > { %v1268_v33 = vadd.f32 %v1248_v45, %v6976_v43  ;;  %v496_v55 = vadd.f32 %v6631_v60, %v351_v47  ;;  %v734_v24 = vadd.f32 %v6696_v11, %v588_v0  ;;  %v959_v58 = vadd.f32 %v6777_v28, %v812_v25  ;;  %v7016_v51 = vpop.permute.xlu0 %199  ;;  %v1409_v18 = vpop.f32.mrf.mxu0  ;;  %5278 = vmatpush3.bf16.msra.mxu0 %v2821_v16 }
 0x1c6   : > { %v7721_v27 = vmov 0.0   ;;  %v1191_v23 = vadd.f32 %v6877_v20, %v1036_v19  ;;  %v7021_v56 = vpop.permute.xlu1 %194  ;;  %v4894_v32 = vpop.f32.mrf.mxu1  ;;  %v353_v8 = vadd.f32 %v6388_v53, %v7016_v51  ;;  %v590_v60 = vadd.f32 %v6749_v59, %v7016_v51 }
 0x1c7   : > { %5241 = vmatprep.mubr.msk.bf16.mxu0 %vm5690_vm0, %v7721_v27  ;;  %v814_v0 = vadd.f32 %v6845_v48, %v7016_v51  ;;  %v501_v28 = vmul.f32 %v496_v55, %v496_v55  ;;  %v739_v11 = vmul.f32 %v734_v24, %v734_v24  ;;  %v964_v47 = vmul.f32 %v959_v58, %v959_v58  ;;  %v4923_v37 = vpop.f32.mrf.mxu0 }
 0x1c8   : > { %v1424_v29 = vadd.f32 %v1404_v62, %v1268_v33  ;;  %5279 = vmatprep.subr.bf16.mxu0 %v7721_v27  ;;  %v1196_v20 = vmul.f32 %v1191_v23, %v1191_v23  ;;  %5220 = vmatmul.mubr.msk.bf16.vlgmr.msra.gmra.mxu1 %vm1065_vm11, %v6612_v17  ;;  %v1253_v25 = vpop.f32.mrf.mxu1  ;;  %v352_v53 = vadd.f32 %v6373_v42, %v7021_v56 }
 0x1c9   : > { %v589_v59 = vadd.f32 %v6735_v54, %v7021_v56  ;;  %v813_v48 = vadd.f32 %v6833_v15, %v7021_v56  ;;  %v744_v24 = vadd.f32 %v739_v11, %v501_v28  ;;  %5250 = vmatpush3.bf16.msra.mxu1 %v6272_v1  ;;  %v1269_v62 = vadd.f32 %v1253_v25, %v7021_v56  ;;  %v1412_v58 = vpop.f32.mrf.mxu0 }
 0x1ca   : > { %v1429_v16 = vmul.f32 %v1424_v29, %v1424_v29  ;;  %v1037_v19 = vadd.f32 %v6917_v52, %v7021_v56  ;;  %v4897_v45 = vpop.f32.mrf.mxu1  ;;  %v497_v33 = vadd.f32 %v6642_v40, %v352_v53  ;;  %5251 = vmatprep.subr.bf16.mxu1 %v7721_v27  ;;  %v498_v15 = vadd.f32 %v6659_v39, %v353_v8  ;;  %v7051_v11 = vpop.permute.xlu1 %204 }
 0x1cb   : > { %v735_v42 = vadd.f32 %v6710_v41, %v589_v59  ;;  %v960_v54 = vadd.f32 %v6789_v30, %v813_v48  ;;  %v969_v55 = vadd.f32 %v964_v47, %v744_v24  ;;  %v1425_v32 = vadd.f32 %v1409_v18, %v1269_v62  ;;  %5223 = vmatprep.mubr.msk.bf16.mxu1 %vm5690_vm0, %v7721_v27  ;;  %v4924_v52 = vpop.f32.mrf.mxu0 }
 0x1cc   : > { %v1192_v23 = vadd.f32 %v6891_v10, %v1037_v19  ;;  %v736_v28 = vadd.f32 %v6723_v2, %v590_v60  ;;  %v502_v40 = vmul.f32 %v497_v33, %v497_v33  ;;  %5242 = vmatmul.mubr.msk.bf16.gmra.mxu0 %vm1298_vm12, %v6946_v44  ;;  %v1256_v30 = vpop.f32.mrf.mxu1  ;;  %v503_v39 = vmul.f32 %v498_v15, %v498_v15  ;;  %v7722_v33 = vld [vmem:[#allocation15_spill] sm:$0xff] }
 0x1cd   : > { %v740_v41 = vmul.f32 %v735_v42, %v735_v42  ;;  %v965_v29 = vmul.f32 %v960_v54, %v960_v54  ;;  %v1201_v8 = vadd.f32 %v1196_v20, %v969_v55  ;;  %v1430_v10 = vmul.f32 %v1425_v32, %v1425_v32  ;;  %5252 = vmatpush3.bf16.msra.mxu1 %v6263_v61  ;;  %v1417_v18 = vpop.f32.mrf.mxu0  ;;  %v7723_v42 = vld [vmem:[#allocation26_spill] sm:$0xff] }
 0x1ce   : > { %v1197_v47 = vmul.f32 %v1192_v23, %v1192_v23  ;;  %v1270_v2 = vadd.f32 %v1256_v30, %v7016_v51  ;;  %v4898_v37 = vpop.f32.mrf.mxu1  ;;  %v741_v25 = vmul.f32 %v736_v28, %v736_v28  ;;  %v961_v53 = vadd.f32 %v6803_v7, %v814_v0  ;;  %5253 = vmatprep.subr.bf16.mxu1 %v7721_v27  ;;  %v7724_v30 = vld [vmem:[#allocation10_spill] sm:$0xff] }
 0x1cf   : > { %v745_v60 = vadd.f32 %v740_v41, %v502_v40  ;;  %v1038_v59 = vadd.f32 %v6931_v57, %v7016_v51  ;;  %v7061_v48 = vadd.f32 %v1429_v16, %v1201_v8  ;;  %v354_v24 = vadd.f32 %v6406_v6, %v7051_v11  ;;  %5245 = vmatprep.mubr.msk.bf16.mxu0 %vm5690_vm0, %v7721_v27  ;;  %v4927_v19 = vpop.f32.mrf.mxu0 }
 0x1d0   : > { %v1426_v20 = vadd.f32 %v1412_v58, %v1270_v2  ;;  %v591_v62 = vadd.f32 %v6761_v46, %v7051_v11  ;;  %v746_v7 = vadd.f32 %v741_v25, %v503_v39  ;;  %v966_v0 = vmul.f32 %v961_v53, %v961_v53  ;;  %5224 = vmatmul.mubr.msk.bf16.gmra.mxu1 %vm1065_vm11, %v6620_v21  ;;  %v1261_v16 = vpop.f32.mrf.mxu1  ;;  %v7725_v2 = vld [vmem:[#allocation39_spill] sm:$0xff]  ;;  %v7727_v19 = vld [vmem:[#allocation9_spill] sm:$0xff] }
 0x1d1   : > { %v970_v45 = vadd.f32 %v965_v29, %v745_v60  ;;  %v1193_v57 = vadd.f32 %v6905_v31, %v1038_v59  ;;  %5254 = vmatpush3.bf16.msra.mxu1 %v6267_v63  ;;  %v1271_v6 = vadd.f32 %v1261_v16, %v7051_v11  ;;  %v499_v46 = vadd.f32 %v7722_v33, %v354_v24  ;;  %v1420_v15 = vpop.f32.mrf.mxu0 }
 0x1d2   : > { %v1431_v58 = vmul.f32 %v1426_v20, %v1426_v20  ;;  %v737_v54 = vadd.f32 %v7723_v42, %v591_v62  ;;  %v971_v23 = vadd.f32 %v966_v0, %v746_v7  ;;  %v4901_v28 = vpop.f32.mrf.mxu1  ;;  %v815_v31 = vadd.f32 %v6863_v50, %v7051_v11  ;;  %5255 = vmatprep.subr.bf16.mxu1 %v7721_v27  ;;  %v7726_v20 = vld [vmem:[#allocation11_spill] sm:$0xff] }
 0x1d3   : > { %v1202_v55 = vadd.f32 %v1197_v47, %v970_v45  ;;  %v1198_v32 = vmul.f32 %v1193_v57, %v1193_v57  ;;  %v504_v52 = vmul.f32 %v499_v46, %v499_v46  ;;  %v1039_v41 = vadd.f32 %v6950_v5, %v7051_v11  ;;  %5280 = vmatpush3.bf16.msra.mxu0 %v7724_v30  ;;  %v4928_v39 = vpop.f32.mrf.mxu0  ;;  %v7728_v46 = vld [vmem:[#allocation13_spill] sm:$0xff] }
 0x1d4   : > { %v742_v40 = vmul.f32 %v737_v54, %v737_v54  ;;  %v1427_v29 = vadd.f32 %v1417_v18, %v1271_v6  ;;  %v962_v60 = vadd.f32 %v7725_v2, %v815_v31  ;;  %5246 = vmatmul.mubr.msk.bf16.gmra.mxu0 %vm1298_vm12, %v5794_v14  ;;  %v1264_v50 = vpop.f32.mrf.mxu1  ;;  %5227 = vmatprep.mubr.msk.bf16.mxu1 %vm5690_vm0, %v7721_v27 }
 0x1d5   : > { %v7082_v8 = vadd.f32 %v1430_v10, %v1202_v55  ;;  %v1203_v47 = vadd.f32 %v1198_v32, %v971_v23  ;;  %v1194_v25 = vadd.f32 %v6919_v4, %v1039_v41  ;;  %5256 = vmatpush3.bf16.msra.mxu1 %v6282_v3  ;;  %5281 = vmatprep.subr.bf16.mxu0 %v7721_v27  ;;  %v7729_v50 = vld [vmem:[#allocation17_spill] sm:$0xff] }
 0x1d6   : > { %v747_v37 = vadd.f32 %v742_v40, %v504_v52  ;;  %v967_v10 = vmul.f32 %v962_v60, %v962_v60  ;;  %v4902_v18 = vpop.f32.mrf.mxu1  ;;  %5257 = vmatprep.subr.bf16.mxu1 %v7721_v27  ;;  %5283 = vmatprep.mubr.msk.bf16.mxu0 %vm5690_vm0, %v7721_v27  ;;  %v500_v53 = vmul.f32 %v7001_v34, %v7001_v34 }
 0x1d7   : > { %v7092_v5 = vadd.f32 %v1431_v58, %v1203_v47  ;;  %v1432_v59 = vmul.f32 %v1427_v29, %v1427_v29  ;;  %5282 = vmatpush3.bf16.msra.mxu0 %v7726_v20  ;;  %v738_v4 = vmul.f32 %v7004_v38, %v7004_v38  ;;  %v1199_v62 = vmul.f32 %v1194_v25, %v1194_v25  ;;  %v7730_v25 = vld [vmem:[#allocation8_spill] sm:$0xff] }
 0x1d8   : > { %v972_v24 = vadd.f32 %v967_v10, %v747_v37  ;;  %5228 = vmatmul.mubr.msk.bf16.gmra.mxu1 %vm1065_vm11, %v7727_v19  ;;  %v1478_v45 = vpop.f32.mrf.mxu1  ;;  %5311 = vmatprep.subr.bf16.mxu0 %v7721_v27  ;;  %v1267_v7 = vadd.f32 %v6968_v49, %v6972_v35  ;;  %v963_v0 = vmul.f32 %v7007_v36, %v7007_v36 }
 0x1d9   : > { %5258 = vmatpush3.bf16.msra.mxu1 %v6300_v12  ;;  %v743_v34 = vadd.f32 %v738_v4, %v500_v53  ;;  %5265 = vmatprep.mubr.msk.bf16.mxu1 %vm5690_vm0, %v7721_v27  ;;  %v1500_v58 = vadd.f32 %v1478_v45, %v6972_v35  ;;  %v1195_v49 = vmul.f32 %v7010_v26, %v7010_v26 }
 0x1da   : > { %v1204_v38 = vadd.f32 %v1199_v62, %v972_v24  ;;  %v4941_v57 = vpop.f32.mrf.mxu1  ;;  %5259 = vmatprep.subr.bf16.mxu1 %v7721_v27  ;;  %v1423_v16 = vadd.f32 %v6962_v9, %v1267_v7  ;;  %v7732_v7 = vld [vmem:[#allocation7_spill] sm:$0xff] }
 0x1db   : > { %v968_v6 = vadd.f32 %v963_v0, %v743_v34 }
 0x1dc   : > { %v7117_v33 = vadd.f32 %v1432_v59, %v1204_v38  ;;  %5284 = vmatmul.mubr.msk.bf16.vlgmr.msra.gmra.mxu0 %vm1298_vm12, %v7728_v46  ;;  %v1481_v36 = vpop.f32.mrf.mxu1  ;;  %v1590_v42 = vpop.f32.mrf.mxu0  ;;  %v1428_v15 = vmul.f32 %v1423_v16, %v1423_v16  ;;  %v7731_v59 = vld [vmem:[#allocation12_spill] sm:$0xff] }
 0x1dd   : > { %5260 = vmatpush3.bf16.msra.mxu1 %v6309_v13  ;;  %5312 = vmatpush3.bf16.msra.mxu0 %v6272_v1  ;;  %v1200_v54 = vadd.f32 %v1195_v49, %v968_v6  ;;  %v1612_v9 = vadd.f32 %v1590_v42, %v1500_v58  ;;  %v1501_v26 = vadd.f32 %v1481_v36, %v6976_v43  ;;  %v7733_v58 = vld [vmem:[#allocation19_spill] sm:$0xff]  ;;  %v7734_v36 = vld [vmem:[#allocation5_spill] sm:$0xff] }
 0x1de   : > { %v4942_v55 = vpop.f32.mrf.mxu1  ;;  %v4969_v23 = vpop.f32.mrf.mxu0  ;;  %5261 = vmatprep.subr.bf16.mxu1 %v7721_v27  ;;  %5313 = vmatprep.subr.bf16.mxu0 %v7721_v27  ;;  %v2706_v20 = vsel %vm664_vm6, %v7731_v59, %v6612_v17 }
 0x1df   : > { %v1433_v32 = vadd.f32 %v1428_v15, %v1200_v54  ;;  %v1617_v28 = vmul.f32 %v1612_v9, %v1612_v9  ;;  %5287 = vmatprep.mubr.msk.bf16.mxu0 %vm5690_vm0, %v7721_v27  ;;  %v7735_v15 = vld [vmem:[#allocation14_spill] sm:$0xff] }
 0x1e0   : > { %v1486_v31 = vpop.f32.mrf.mxu1  ;;  %v1593_v52 = vpop.f32.mrf.mxu0  ;;  %v2707_v9 = vsel %vm664_vm6, %v7735_v15, %v6620_v21 }
 0x1e1   : > { %v7128_v40 = vadd.f32 %v1617_v28, %v1433_v32  ;;  %5262 = vmatpush3.bf16.msra.mxu1 %v6327_v22  ;;  %5314 = vmatpush3.bf16.msra.mxu0 %v6263_v61  ;;  %v1613_v41 = vadd.f32 %v1593_v52, %v1501_v26  ;;  %v1502_v39 = vadd.f32 %v1486_v31, %v7021_v56  ;;  %v7736_v52 = vld [vmem:[#allocation16_spill] sm:$0xff] }
 0x1e2   : > { %v4945_v29 = vpop.f32.mrf.mxu1  ;;  %v4970_v30 = vpop.f32.mrf.mxu0  ;;  %5263 = vmatprep.subr.bf16.mxu1 %v7721_v27  ;;  %5315 = vmatprep.subr.bf16.mxu0 %v7721_v27 }
 0x1e3   : > { %v1618_v47 = vmul.f32 %v1613_v41, %v1613_v41  ;;  %v7737_v30 = vld [vmem:[#allocation18_spill] sm:$0xff] }
 0x1e4   : > { %v1489_v2 = vpop.f32.mrf.mxu1  ;;  %v1598_v60 = vpop.f32.mrf.mxu0  ;;  %5288 = vmatmul.mubr.msk.bf16.gmra.mxu0 %vm1298_vm12, %v7729_v50 }
 0x1e5   : > { %v7138_v37 = vadd.f32 %v1618_v47, %v7061_v48  ;;  %5264 = vmatpush3.bf16.msra.mxu1 %v7730_v25  ;;  %5316 = vmatpush3.bf16.msra.mxu0 %v6267_v63  ;;  %v1614_v10 = vadd.f32 %v1598_v60, %v1502_v39  ;;  %v1503_v4 = vadd.f32 %v1489_v2, %v7016_v51 }
 0x1e6   : > { %v4946_v18 = vpop.f32.mrf.mxu1  ;;  %v4973_v53 = vpop.f32.mrf.mxu0  ;;  %5295 = vmatprep.subr.bf16.mxu1 %v7721_v27  ;;  %5317 = vmatprep.subr.bf16.mxu0 %v7721_v27  ;;  %v2968_v39 = vsel %vm892_vm9, %v7737_v30, %v7728_v46 }
 0x1e7   : > { %v1619_v24 = vmul.f32 %v1614_v10, %v1614_v10  ;;  %5291 = vmatprep.mubr.msk.bf16.mxu0 %vm5690_vm0, %v7721_v27  ;;  %v7738_v10 = vld [vmem:[#allocation4_spill] sm:$0xff] }
 0x1e8   : > { %5266 = vmatmul.mubr.msk.bf16.vlgmr.msra.gmra.mxu1 %vm280_vm2, %v2706_v20  ;;  %v1494_v48 = vpop.f32.mrf.mxu1  ;;  %v1601_v62 = vpop.f32.mrf.mxu0  ;;  %v7739_v20 = vld [vmem:[#allocation58_spill] sm:$0xff] }
 0x1e9   : > { %v7152_v45 = vadd.f32 %v1619_v24, %v7082_v8  ;;  %5296 = vmatpush3.bf16.msra.mxu1 %v7732_v7  ;;  %5318 = vmatpush3.bf16.msra.mxu0 %v6282_v3  ;;  %v1615_v34 = vadd.f32 %v1601_v62, %v1503_v4  ;;  %v1504_v38 = vadd.f32 %v1494_v48, %v7051_v11  ;;  %v7740_v24 = vld [vmem:[#allocation21_spill] sm:$0xff] }
 0x1ea   : > { %v4949_v0 = vpop.f32.mrf.mxu1  ;;  %v4974_v17 = vpop.f32.mrf.mxu0  ;;  %5319 = vmatprep.subr.bf16.mxu0 %v7721_v27  ;;  %5269 = vmatprep.mubr.msk.bf16.mxu1 %vm5690_vm0, %v7721_v27 }
 0x1eb   : > { %v1620_v57 = vmul.f32 %v1615_v34, %v1615_v34  ;;  %5297 = vmatprep.subr.bf16.mxu1 %v7721_v27  ;;  %v7741_v0 = vld [vmem:[#allocation6_spill] sm:$0xff]  ;;  %v7742_v17 = vld [vmem:[#allocation20_spill] sm:$0xff] }
 0x1ec   : > { %v1497_v16 = vpop.f32.mrf.mxu1  ;;  %v1606_v8 = vpop.f32.mrf.mxu0  ;;  %5292 = vmatmul.mubr.msk.bf16.gmra.mxu0 %vm1298_vm12, %v7733_v58 }
 0x1ed   : > { %v7164_v6 = vadd.f32 %v1620_v57, %v7092_v5  ;;  %5320 = vmatpush3.bf16.msra.mxu0 %v6300_v12  ;;  %v1616_v49 = vadd.f32 %v1606_v8, %v1504_v38  ;;  %5298 = vmatpush3.bf16.msra.mxu1 %v7734_v36  ;;  %v2969_v38 = vsel %vm892_vm9, %v7742_v17, %v7729_v50  ;;  %v7743_v36 = vld [vmem:[#allocation23_spill] sm:$0xff]  ;;  %v7747_v17 = vld [vmem:[#allocation24_spill] sm:$0xff] }
 0x1ee   : > { %v4950_v42 = vpop.f32.mrf.mxu1  ;;  %v4977_v54 = vpop.f32.mrf.mxu0  ;;  %5321 = vmatprep.subr.bf16.mxu0 %v7721_v27  ;;  %5327 = vmatprep.mubr.msk.bf16.mxu0 %vm5690_vm0, %v7721_v27 }
 0x1ef   : > { %v1621_v55 = vmul.f32 %v1616_v49, %v1616_v49  ;;  %5339 = vmatprep.subr.bf16.mxu1 %v7721_v27 }
 0x1f0   : > { %5270 = vmatmul.mubr.msk.bf16.gmra.mxu1 %vm280_vm2, %v2707_v9  ;;  %v1609_v5 = vpop.f32.mrf.mxu0  ;;  %v1668_v23 = vpop.f32.mrf.mxu1 }
 0x1f1   : > { %v7177_v26 = vadd.f32 %v1621_v55, %v7117_v33  ;;  %5322 = vmatpush3.bf16.msra.mxu0 %v6309_v13  ;;  %5273 = vmatprep.mubr.msk.bf16.mxu1 %vm5690_vm0, %v7721_v27  ;;  %v2708_v33 = vsel %vm664_vm6, %v7736_v52, %v7727_v19  ;;  %v1690_v47 = vadd.f32 %v1668_v23, %v6972_v35  ;;  %v7744_v23 = vld [vmem:[#allocation22_spill] sm:$0xff]  ;;  %vm7763_vm6 = vmmov %vm7760_vm4 }
 0x1f2   : > { %v4978_v32 = vpop.f32.mrf.mxu0  ;;  %v4991_v28 = vpop.f32.mrf.mxu1  ;;  %5323 = vmatprep.subr.bf16.mxu0 %v7721_v27 }
 0x1f4   : > { %v1671_v21 = vpop.f32.mrf.mxu1 }
 0x1f5   : > { %5324 = vmatpush3.bf16.msra.mxu0 %v6327_v22  ;;  %v1691_v59 = vadd.f32 %v1671_v21, %v6976_v43  ;;  %v7745_v21 = vld [vmem:[#allocation25_spill] sm:$0xff] }
 0x1f6   : > { %v4992_v31 = vpop.f32.mrf.mxu1  ;;  %5325 = vmatprep.subr.bf16.mxu0 %v7721_v27 }
 0x1f7   : > { %v2970_v31 = vsel %vm892_vm9, %v7745_v21, %v7733_v58 }
 0x1f8   : > { %5274 = vmatmul.mubr.msk.bf16.gmra.mxu1 %vm280_vm2, %v2708_v33  ;;  %v1676_v41 = vpop.f32.mrf.mxu1 }
 0x1f9   : > { %5326 = vmatpush3.bf16.msra.mxu0 %v7730_v25  ;;  %5299 = vmatprep.mubr.msk.bf16.mxu1 %vm5690_vm0, %v7721_v27  ;;  %v1692_v57 = vadd.f32 %v1676_v41, %v7021_v56 }
 0x1fa   : > { %v4995_v29 = vpop.f32.mrf.mxu1  ;;  %5357 = vmatprep.subr.bf16.mxu0 %v7721_v27 }
 0x1fc   : > { %5328 = vmatmul.mubr.msk.bf16.vlgmr.msra.gmra.mxu0 %vm280_vm2, %v2968_v39  ;;  %v1679_v19 = vpop.f32.mrf.mxu1  ;;  %v1754_v2 = vpop.f32.mrf.mxu0 }
 0x1fd   : > { %v1776_v60 = vadd.f32 %v1754_v2, %v1690_v47  ;;  %5331 = vmatprep.mubr.msk.bf16.mxu0 %vm5690_vm0, %v7721_v27  ;;  %5358 = vmatpush3.bf16.msra.mxu0 %v7738_v10  ;;  %v1693_v50 = vadd.f32 %v1679_v19, %v7016_v51 }
 0x1fe   : > { %v4996_v18 = vpop.f32.mrf.mxu1  ;;  %v5019_v53 = vpop.f32.mrf.mxu0  ;;  %5359 = vmatprep.subr.bf16.mxu0 %v7721_v27 }
 0x200   : > { %5300 = vmatmul.mubr.msk.bf16.vlgmr.msra.gmra.mxu1 %vm1065_vm11, %v7739_v20  ;;  %v1684_v46 = vpop.f32.mrf.mxu1  ;;  %v1757_v4 = vpop.f32.mrf.mxu0 }
 0x201   : > { %5340 = vmatpush3.bf16.msra.mxu1 %v7740_v24  ;;  %v1777_v48 = vadd.f32 %v1757_v4, %v1691_v59  ;;  %5303 = vmatprep.mubr.msk.bf16.mxu1 %vm5690_vm0, %v7721_v27  ;;  %v1694_v52 = vadd.f32 %v1684_v46, %v7051_v11 }
 0x202   : > { %v4999_v62 = vpop.f32.mrf.mxu1  ;;  %v5020_v34 = vpop.f32.mrf.mxu0  ;;  %5341 = vmatprep.subr.bf16.mxu1 %v7721_v27  ;;  %5360 = vmatpush3.bf16.msra.mxu0 %v7741_v0 }
 0x203   : > { %5401 = vmatprep.subr.bf16.mxu0 %v7721_v27 }
 0x204   : > { %5332 = vmatmul.mubr.msk.bf16.gmra.mxu0 %vm280_vm2, %v2969_v38  ;;  %v1687_v16 = vpop.f32.mrf.mxu1  ;;  %v1762_v8 = vpop.f32.mrf.mxu0 }
 0x205   : > { %v1778_v49 = vadd.f32 %v1762_v8, %v1692_v57  ;;  %5342 = vmatpush3.bf16.msra.mxu1 %v7743_v36  ;;  %5335 = vmatprep.mubr.msk.bf16.mxu0 %vm5690_vm0, %v7721_v27  ;;  %v7748_v8 = vld [vmem:[#allocation30_spill] sm:$0xff] }
 0x206   : > { %v5000_v42 = vpop.f32.mrf.mxu1  ;;  %v5023_v54 = vpop.f32.mrf.mxu0  ;;  %5343 = vmatprep.subr.bf16.mxu1 %v7721_v27 }
 0x208   : > { %5304 = vmatmul.mubr.msk.bf16.gmra.mxu1 %vm1065_vm11, %v6946_v44  ;;  %v1765_v15 = vpop.f32.mrf.mxu0  ;;  %v1840_v9 = vpop.f32.mrf.mxu1 }
 0x209   : > { %v1779_v55 = vadd.f32 %v1765_v15, %v1693_v50  ;;  %v1862_v5 = vadd.f32 %v1840_v9, %v1776_v60  ;;  %5307 = vmatprep.mubr.msk.bf16.mxu1 %vm5690_vm0, %v7721_v27  ;;  %5344 = vmatpush3.bf16.msra.mxu1 %v7744_v23  ;;  %v7749_v15 = vld [vmem:[#allocation32_spill] sm:$0xff] }
 0x20a   : > { %v5024_v32 = vpop.f32.mrf.mxu0  ;;  %v5033_v28 = vpop.f32.mrf.mxu1  ;;  %5373 = vmatprep.subr.bf16.mxu1 %v7721_v27  ;;  %v7750_v9 = vld [vmem:[#allocation28_spill] sm:$0xff] }
 0x20b   : > { %v1867_v33 = vmul.f32 %v1862_v5, %v1862_v5  ;;  %v7751_v28 = vld [vmem:[#allocation31_spill] sm:$0xff] }
 0x20c   : > { %5336 = vmatmul.mubr.msk.bf16.gmra.mxu0 %vm280_vm2, %v2970_v31  ;;  %v1770_v41 = vpop.f32.mrf.mxu0  ;;  %v1843_v29 = vpop.f32.mrf.mxu1 }
 0x20d   : > { %v7233_v30 = vadd.f32 %v1867_v33, %v7128_v40  ;;  %v1780_v39 = vadd.f32 %v1770_v41, %v1694_v52  ;;  %v1863_v47 = vadd.f32 %v1843_v29, %v1777_v48  ;;  %5361 = vmatprep.mubr.msk.bf16.mxu0 %vm5690_vm0, %v7721_v27  ;;  %v7746_v40 = vld [vmem:[#allocation27_spill] sm:$0xff] }
 0x20e   : > { %v5034_v19 = vpop.f32.mrf.mxu1  ;;  %v5027_v2 = vpop.f32.mrf.mxu0  ;;  %v3356_v59 = vsel %vm290_vm1, %v7746_v40, 0  ;;  %v7753_v40 = vld [vmem:[#allocation33_spill] sm:$0xff] }
 0x20f   : > { %v1868_v60 = vmul.f32 %v1863_v47, %v1863_v47  ;;  %v7752_v47 = vld [vmem:[#allocation29_spill] sm:$0xff] }
 0x210   : > { %5308 = vmatmul.mubr.msk.bf16.gmra.mxu1 %vm1065_vm11, %v5794_v14  ;;  %v1848_v58 = vpop.f32.mrf.mxu1  ;;  %v1773_v10 = vpop.f32.mrf.mxu0 }
 0x211   : > { %v7240_v18 = vadd.f32 %v1868_v60, %v7138_v37  ;;  %v1864_v53 = vadd.f32 %v1848_v58, %v1778_v49  ;;  %5345 = vmatprep.mubr.msk.bf16.mxu1 %vm5690_vm0, %v7721_v27 }
 0x212   : > { %v5037_v46 = vpop.f32.mrf.mxu1  ;;  %v5028_v4 = vpop.f32.mrf.mxu0 }
 0x213   : > { %v1869_v24 = vmul.f32 %v1864_v53, %v1864_v53 }
 0x214   : > { %5362 = vmatmul.mubr.msk.bf16.vlgmr.msra.gmra.mxu0 %vm840_vm8, %v7739_v20  ;;  %v1851_v48 = vpop.f32.mrf.mxu1 }
 0x215   : > { %v7249_v62 = vadd.f32 %v1869_v24, %v7152_v45  ;;  %v1865_v34 = vadd.f32 %v1851_v48, %v1779_v55  ;;  %5365 = vmatprep.mubr.msk.bf16.mxu0 %vm5690_vm0, %v7721_v27  ;;  %5402 = vmatpush3.bf16.msra.mxu0 %v3356_v59 }
 0x216   : > { %v5038_v37 = vpop.f32.mrf.mxu1  ;;  %5403 = vmatprep.subr.bf16.mxu0 %v7721_v27 }
 0x217   : > { %v1870_v0 = vmul.f32 %v1865_v34, %v1865_v34 }
 0x218   : > { %5346 = vmatmul.mubr.msk.bf16.vlgmr.msra.gmra.mxu1 %vm1517_vm13, %v7747_v17  ;;  %v1856_v38 = vpop.f32.mrf.mxu1 }
 0x219   : > { %v7257_v57 = vadd.f32 %v1870_v0, %v7164_v6  ;;  %5374 = vmatpush3.bf16.msra.mxu1 %v6272_v1  ;;  %v1866_v45 = vadd.f32 %v1856_v38, %v1780_v39  ;;  %5349 = vmatprep.mubr.msk.bf16.mxu1 %vm5690_vm0, %v7721_v27 }
 0x21a   : > { %5375 = vmatprep.subr.bf16.mxu1 %v7721_v27  ;;  %v5041_v16 = vpop.f32.mrf.mxu1  ;;  %5404 = vmatpush3.bf16.msra.mxu0 %v7748_v8 }
 0x21b   : > { %v1871_v49 = vmul.f32 %v1866_v45, %v1866_v45  ;;  %5405 = vmatprep.subr.bf16.mxu0 %v7721_v27 }
 0x21c   : > { %5366 = vmatmul.mubr.msk.bf16.gmra.mxu0 %vm840_vm8, %v6946_v44  ;;  %v1859_v36 = vpop.f32.mrf.mxu1  ;;  %v1998_v6 = vpop.f32.mrf.mxu0 }
 0x21d   : > { %v7268_v42 = vadd.f32 %v1871_v49, %v7177_v26  ;;  %5376 = vmatpush3.bf16.msra.mxu1 %v6263_v61  ;;  %5369 = vmatprep.mubr.msk.bf16.mxu0 %vm5690_vm0, %v7721_v27  ;;  %v7754_v36 = vld [vmem:[#allocation38_spill] sm:$0xff] }
 0x21e   : > { %5377 = vmatprep.subr.bf16.mxu1 %v7721_v27  ;;  %v5042_v54 = vpop.f32.mrf.mxu1  ;;  %v5081_v50 = vpop.f32.mrf.mxu0  ;;  %5406 = vmatpush3.bf16.msra.mxu0 %v7749_v15  ;;  %v7755_v15 = vld [vmem:[#allocation34_spill] sm:$0xff] }
 0x21f   : > { %5407 = vmatprep.subr.bf16.mxu0 %v7721_v27 }
 0x220   : > { %5350 = vmatmul.mubr.msk.bf16.gmra.mxu1 %vm1517_vm13, %v7750_v9  ;;  %v1918_v55 = vpop.f32.mrf.mxu1  ;;  %v2001_v5 = vpop.f32.mrf.mxu0 }
 0x221   : > { %5378 = vmatpush3.bf16.msra.mxu1 %v6267_v63  ;;  %v1940_v26 = vadd.f32 %v1918_v55, %v6972_v35  ;;  %5353 = vmatprep.mubr.msk.bf16.mxu1 %vm5690_vm0, %v7721_v27  ;;  %v3231_v55 = vsel %vm748_vm10, %v7755_v15, %v7747_v17  ;;  %v5676_v15 = vld [vmem:[%s5746_s17 + $0x38] sm:$0xf] }
 0x222   : > { %5379 = vmatprep.subr.bf16.mxu1 %v7721_v27  ;;  %v5053_v23 = vpop.f32.mrf.mxu1  ;;  %v5082_v32 = vpop.f32.mrf.mxu0  ;;  %5408 = vmatpush3.bf16.msra.mxu0 %v7751_v28 }
 0x223   : > { %5435 = vmatprep.subr.bf16.mxu0 %v7721_v27  ;;  %v2020_v21 = vadd.f32 %v1998_v6, %v1940_v26 }
 0x224   : > { %5370 = vmatmul.mubr.msk.bf16.gmra.mxu0 %vm840_vm8, %v5794_v14  ;;  %v1921_v31 = vpop.f32.mrf.mxu1  ;;  %v2006_v52 = vpop.f32.mrf.mxu0  ;;  %vm7767_vm8 = vmmov %vm7760_vm4 }
 0x225   : > { %5380 = vmatpush3.bf16.msra.mxu1 %v6282_v3  ;;  %v1941_v33 = vadd.f32 %v1921_v31, %v6976_v43  ;;  %5409 = vmatprep.mubr.msk.bf16.mxu0 %vm5690_vm0, %v7721_v27 }
 0x226   : > { %5381 = vmatprep.subr.bf16.mxu1 %v7721_v27  ;;  %v5054_v41 = vpop.f32.mrf.mxu1  ;;  %v5085_v29 = vpop.f32.mrf.mxu0 }
 0x227   : > { %v2021_v39 = vadd.f32 %v2001_v5, %v1941_v33 }
 0x228   : > { %5354 = vmatmul.mubr.msk.bf16.gmra.mxu1 %vm1517_vm13, %v7752_v47  ;;  %v1926_v19 = vpop.f32.mrf.mxu1  ;;  %v2009_v2 = vpop.f32.mrf.mxu0 }
 0x229   : > { %5382 = vmatpush3.bf16.msra.mxu1 %v6300_v12  ;;  %v1942_v60 = vadd.f32 %v1926_v19, %v7021_v56  ;;  %5389 = vmatprep.mubr.msk.bf16.mxu1 %vm5690_vm0, %v7721_v27  ;;  %v7757_v19 = vld [vmem:[#allocation36_spill] sm:$0xff] }
 0x22a   : > { %5383 = vmatprep.subr.bf16.mxu1 %v7721_v27  ;;  %v5057_v58 = vpop.f32.mrf.mxu1  ;;  %v5086_v10 = vpop.f32.mrf.mxu0 }
 0x22b   : > { %v7299_v53 = vadd.f32 %v2006_v52, %v1942_v60  ;;  %v7756_v52 = vld [vmem:[#allocation37_spill] sm:$0xff] }
 0x22c   : > { %5410 = vmatmul.mubr.msk.bf16.vlgmr.msra.gmra.mxu0 %vm1707_vm15, %v7753_v40  ;;  %v1929_v59 = vpop.f32.mrf.mxu1  ;;  %v2014_v46 = vpop.f32.mrf.mxu0 }
 0x22d   : > { %5384 = vmatpush3.bf16.msra.mxu1 %v6309_v13  ;;  %5436 = vmatpush3.bf16.msra.mxu0 %v6272_v1  ;;  %v1943_v4 = vadd.f32 %v1929_v59, %v7016_v51 }
 0x22e   : > { %5385 = vmatprep.subr.bf16.mxu1 %v7721_v27  ;;  %5437 = vmatprep.subr.bf16.mxu0 %v7721_v27  ;;  %v5058_v24 = vpop.f32.mrf.mxu1  ;;  %v5089_v48 = vpop.f32.mrf.mxu0 }
 0x22f   : > { %5413 = vmatprep.mubr.msk.bf16.mxu0 %vm5690_vm0, %v7721_v27  ;;  %v2023_v34 = vadd.f32 %v2009_v2, %v1943_v4  ;;  %v3232_v2 = vsel %vm748_vm10, %v7757_v19, %v7750_v9  ;;  %v7764_v19 = vld [vmem:[#allocation43_spill] sm:$0xff] }
 0x230   : > { %v1934_v37 = vpop.f32.mrf.mxu1  ;;  %v2017_v0 = vpop.f32.mrf.mxu0 }
 0x231   : > { %5386 = vmatpush3.bf16.msra.mxu1 %v6327_v22  ;;  %5438 = vmatpush3.bf16.msra.mxu0 %v6263_v61  ;;  %v1944_v38 = vadd.f32 %v1934_v37, %v7051_v11  ;;  %v7758_v0 = vld [vmem:[#allocation35_spill] sm:$0xff] }
 0x232   : > { %5387 = vmatprep.subr.bf16.mxu1 %v7721_v27  ;;  %5439 = vmatprep.subr.bf16.mxu0 %v7721_v27  ;;  %v5061_v45 = vpop.f32.mrf.mxu1  ;;  %v5090_v16 = vpop.f32.mrf.mxu0 }
 0x233   : > { %v2024_v8 = vadd.f32 %v2014_v46, %v1944_v38  ;;  %v3233_v38 = vsel %vm748_vm10, %v7758_v0, %v7752_v47  ;;  %v3709_v47 = vsel %vm290_vm1, %v5676_v15, 0 }
 0x234   : > { %v1937_v49 = vpop.f32.mrf.mxu1  ;;  %5414 = vmatmul.mubr.msk.bf16.gmra.mxu0 %vm1707_vm15, %v7754_v36  ;;  %v7317_v6 = vpop.f32.mrf.mxu0 }
 0x235   : > { %5388 = vmatpush3.bf16.msra.mxu1 %v7730_v25  ;;  %5440 = vmatpush3.bf16.msra.mxu0 %v6267_v63 }
 0x236   : > { %5421 = vmatprep.subr.bf16.mxu1 %v7721_v27  ;;  %5441 = vmatprep.subr.bf16.mxu0 %v7721_v27  ;;  %v5062_v54 = vpop.f32.mrf.mxu1  ;;  %v5115_v50 = vpop.f32.mrf.mxu0 }
 0x237   : > { %5417 = vmatprep.mubr.msk.bf16.mxu0 %vm5690_vm0, %v7721_v27 }
 0x238   : > { %5390 = vmatmul.mubr.msk.bf16.vlgmr.msra.gmra.mxu1 %vm280_vm2, %v3231_v55  ;;  %v2085_v5 = vpop.f32.mrf.mxu1  ;;  %v7329_v26 = vpop.f32.mrf.mxu0  ;;  %v7759_v55 = vld [vmem:[#allocation41_spill] sm:$0xff] }
 0x239   : > { %5422 = vmatpush3.bf16.msra.mxu1 %v7732_v7  ;;  %5442 = vmatpush3.bf16.msra.mxu0 %v6282_v3  ;;  %v2107_v23 = vadd.f32 %v2085_v5, %v2020_v21  ;;  %v3503_v5 = vsel %vm7760_vm4, %v7759_v55, %v7753_v40  ;;  %v7769_v55 = vld [vmem:[#allocation49_spill] sm:$0xff] }
 0x23a   : > { %5443 = vmatprep.subr.bf16.mxu0 %v7721_v27  ;;  %v5095_v32 = vpop.f32.mrf.mxu1  ;;  %5393 = vmatprep.mubr.msk.bf16.mxu1 %vm5690_vm0, %v7721_v27  ;;  %v5116_v17 = vpop.f32.mrf.mxu0 }
 0x23b   : > { %v2112_v28 = vmul.f32 %v2107_v23, %v2107_v23  ;;  %5463 = vmatprep.subr.bf16.mxu1 %v7721_v27 }
 0x23c   : > { %v2088_v31 = vpop.f32.mrf.mxu1  ;;  %5418 = vmatmul.mubr.msk.bf16.gmra.mxu0 %vm1707_vm15, %v7756_v52  ;;  %v7339_v33 = vpop.f32.mrf.mxu0 }
 0x23d   : > { %v7342_v7 = vadd.f32 %v2112_v28, %v7233_v30  ;;  %5444 = vmatpush3.bf16.msra.mxu0 %v6300_v12  ;;  %v2108_v21 = vadd.f32 %v2088_v31, %v2021_v39  ;;  %5451 = vmatprep.mubr.msk.bf16.mxu0 %vm5690_vm0, %v7721_v27  ;;  %v7761_v31 = vld [vmem:[#allocation40_spill] sm:$0xff] }
 0x23e   : > { %5445 = vmatprep.subr.bf16.mxu0 %v7721_v27  ;;  %v5096_v41 = vpop.f32.mrf.mxu1  ;;  %v5119_v29 = vpop.f32.mrf.mxu0 }
 0x23f   : > { %v2113_v60 = vmul.f32 %v2108_v21, %v2108_v21  ;;  %v7762_v21 = vld [vmem:[#allocation42_spill] sm:$0xff] }
 0x240   : > { %5394 = vmatmul.mubr.msk.bf16.gmra.mxu1 %vm280_vm2, %v3232_v2  ;;  %v2093_v58 = vpop.f32.mrf.mxu1  ;;  %v7352_v30 = vpop.f32.mrf.mxu0  ;;  %v3504_v41 = vsel %vm7763_vm6, %v7762_v21, %v7754_v36  ;;  %v7770_v21 = vld [vmem:[#allocation46_spill] sm:$0xff] }
 0x241   : > { %v7355_v10 = vadd.f32 %v2113_v60, %v7240_v18  ;;  %5446 = vmatpush3.bf16.msra.mxu0 %v6309_v13  ;;  %v2109_v39 = vadd.f32 %v2093_v58, %v7299_v53  ;;  %5397 = vmatprep.mubr.msk.bf16.mxu1 %vm5690_vm0, %v7721_v27  ;;  %v2185_v60 = vadd.f32 %v7317_v6, %v6972_v35 }
 0x242   : > { %5447 = vmatprep.subr.bf16.mxu0 %v7721_v27  ;;  %v5099_v59 = vpop.f32.mrf.mxu1  ;;  %v5120_v9 = vpop.f32.mrf.mxu0  ;;  %v2186_v6 = vadd.f32 %v7329_v26, %v6976_v43 }
 0x243   : > { %v2114_v46 = vmul.f32 %v2109_v39, %v2109_v39  ;;  %v7765_v59 = vld [vmem:[#allocation45_spill] sm:$0xff] }
 0x244   : > { %v2096_v4 = vpop.f32.mrf.mxu1  ;;  %v7362_v24 = vpop.f32.mrf.mxu0 }
 0x245   : > { %v7365_v48 = vadd.f32 %v2114_v46, %v7249_v62  ;;  %5448 = vmatpush3.bf16.msra.mxu0 %v6327_v22  ;;  %v2110_v18 = vadd.f32 %v2096_v4, %v2023_v34  ;;  %v7766_v4 = vld [vmem:[#allocation47_spill] sm:$0xff] }
 0x246   : > { %5449 = vmatprep.subr.bf16.mxu0 %v7721_v27  ;;  %v5100_v53 = vpop.f32.mrf.mxu1  ;;  %v5123_v37 = vpop.f32.mrf.mxu0 }
 0x247   : > { %v2115_v45 = vmul.f32 %v2110_v18, %v2110_v18  ;;  %v3505_v18 = vsel %vm7767_vm8, %v7766_v4, %v7756_v52  ;;  %v2187_v52 = vadd.f32 %v7339_v33, %v7021_v56  ;;  %v2188_v33 = vadd.f32 %v7352_v30, %v7016_v51 }
 0x248   : > { %5398 = vmatmul.mubr.msk.bf16.gmra.mxu1 %vm280_vm2, %v3233_v38  ;;  %v2101_v16 = vpop.f32.mrf.mxu1  ;;  %v2182_v49 = vpop.f32.mrf.mxu0  ;;  %v2189_v30 = vadd.f32 %v7362_v24, %v7051_v11 }
 0x249   : > { %v7374_v62 = vadd.f32 %v2115_v45, %v7257_v57  ;;  %5450 = vmatpush3.bf16.msra.mxu0 %v7730_v25  ;;  %v2111_v34 = vadd.f32 %v2101_v16, %v2024_v8  ;;  %5423 = vmatprep.mubr.msk.bf16.mxu1 %vm5690_vm0, %v7721_v27  ;;  %v7768_v45 = vld [vmem:[#allocation44_spill] sm:$0xff] }
 0x24a   : > { %v5103_v54 = vpop.f32.mrf.mxu1  ;;  %v5124_v50 = vpop.f32.mrf.mxu0  ;;  %5483 = vmatprep.subr.bf16.mxu0 %v7721_v27 }
 0x24b   : > { %v2116_v23 = vmul.f32 %v2111_v34, %v2111_v34 }
 0x24c   : > { %5452 = vmatmul.mubr.msk.bf16.vlgmr.msra.gmra.mxu0 %vm280_vm2, %v3503_v5  ;;  %v2104_v57 = vpop.f32.mrf.mxu1  ;;  %v2339_v32 = vpop.f32.mrf.mxu0  ;;  %v3904_v5 = vsel %vm290_vm1, %v7769_v55, 0  ;;  %vm4098_vm1 = vcmask 15360  }
 0x24d   : > { %v7387_v8 = vadd.f32 %v2116_v23, %v7268_v42  ;;  %5455 = vmatprep.mubr.msk.bf16.mxu0 %vm5690_vm0, %v7721_v27  ;;  %5484 = vmatpush3.bf16.msra.mxu0 %v3709_v47 }
 0x24e   : > { %v5104_v17 = vpop.f32.mrf.mxu1  ;;  %v5159_v28 = vpop.f32.mrf.mxu0  ;;  %5525 = vmatprep.subr.bf16.mxu0 %v7721_v27 }
 0x250   : > { %5424 = vmatmul.mubr.msk.bf16.vlgmr.msra.gmra.mxu1 %vm615_vm5, %v7739_v20  ;;  %v2342_v40 = vpop.f32.mrf.mxu0 }
 0x251   : > { %5464 = vmatpush3.bf16.msra.mxu1 %v7761_v31  ;;  %5427 = vmatprep.mubr.msk.bf16.mxu1 %vm5690_vm0, %v7721_v27 }
 0x252   : > { %5465 = vmatprep.subr.bf16.mxu1 %v7721_v27  ;;  %v5160_v42 = vpop.f32.mrf.mxu0 }
 0x254   : > { %5456 = vmatmul.mubr.msk.bf16.gmra.mxu0 %vm280_vm2, %v3504_v41  ;;  %v2347_v29 = vpop.f32.mrf.mxu0 }
 0x255   : > { %5466 = vmatpush3.bf16.msra.mxu1 %v7764_v19  ;;  %5459 = vmatprep.mubr.msk.bf16.mxu0 %vm5690_vm0, %v7721_v27 }
 0x256   : > { %5467 = vmatprep.subr.bf16.mxu1 %v7721_v27  ;;  %v5163_v2 = vpop.f32.mrf.mxu0 }
 0x257   : > { %v7771_v2 = vld [vmem:[#allocation51_spill] sm:$0xff] }
 0x258   : > { %5428 = vmatmul.mubr.msk.bf16.gmra.mxu1 %vm615_vm5, %v6946_v44  ;;  %v2243_v58 = vpop.f32.mrf.mxu1  ;;  %v2350_v39 = vpop.f32.mrf.mxu0 }
 0x259   : > { %v2265_v36 = vadd.f32 %v2243_v58, %v2185_v60  ;;  %5468 = vmatpush3.bf16.msra.mxu1 %v7765_v59  ;;  %5431 = vmatprep.mubr.msk.bf16.mxu1 %vm5690_vm0, %v7721_v27  ;;  %v5677_v60 = vld [vmem:[%s7639_s1 + $0x10] ss:$8 sps:$4 sm:$0xff]  }
 0x25a   : > { %v5143_v9 = vpop.f32.mrf.mxu1  ;;  %5469 = vmatprep.subr.bf16.mxu1 %v7721_v27  ;;  %v5164_v46 = vpop.f32.mrf.mxu0 }
 0x25b   : > { %v2361_v44 = vadd.f32 %v2339_v32, %v2265_v36  ;;  %v7773_v46 = vld [vmem:[#allocation48_spill] sm:$0xff] }
 0x25c   : > { %5460 = vmatmul.mubr.msk.bf16.gmra.mxu0 %vm280_vm2, %v3505_v18  ;;  %v2246_v53 = vpop.f32.mrf.mxu1  ;;  %v2355_v37 = vpop.f32.mrf.mxu0 }
 0x25d   : > { %v2366_v0 = vmul.f32 %v2361_v44, %v2361_v44  ;;  %v2266_v38 = vadd.f32 %v2246_v53, %v2186_v6  ;;  %5470 = vmatpush3.bf16.msra.mxu1 %v7768_v45  ;;  %5485 = vmatprep.mubr.msk.bf16.mxu0 %vm5690_vm0, %v7721_v27  ;;  %v7774_v53 = vld [vmem:[#allocation52_spill] sm:$0xff] }
 0x25e   : > { %v5144_v16 = vpop.f32.mrf.mxu1  ;;  %5497 = vmatprep.subr.bf16.mxu1 %v7721_v27  ;;  %v5167_v49 = vpop.f32.mrf.mxu0 }
 0x25f   : > { %v2362_v26 = vadd.f32 %v2342_v40, %v2266_v38  ;;  %v7427_v34 = vadd.f32 %v2366_v0, %v7342_v7  ;;  %v7775_v16 = vld [vmem:[#allocation55_spill] sm:$0xff] }
 0x260   : > { %5432 = vmatmul.mubr.msk.bf16.gmra.mxu1 %vm615_vm5, %v5794_v14  ;;  %v2251_v54 = vpop.f32.mrf.mxu1  ;;  %v2358_v50 = vpop.f32.mrf.mxu0 }
 0x261   : > { %v2367_v15 = vmul.f32 %v2362_v26, %v2362_v26  ;;  %v2267_v47 = vadd.f32 %v2251_v54, %v2187_v52  ;;  %5471 = vmatprep.mubr.msk.bf16.mxu1 %vm5690_vm0, %v7721_v27  ;;  %v7776_v52 = vld [vmem:[#allocation53_spill] sm:$0xff] }
 0x262   : > { %v5147_v23 = vpop.f32.mrf.mxu1  ;;  %v5168_v57 = vpop.f32.mrf.mxu0 }
 0x263   : > { %v2363_v7 = vadd.f32 %v2347_v29, %v2267_v47  ;;  %v7438_v32 = vadd.f32 %v2367_v15, %v7355_v10 }
 0x264   : > { %5486 = vmatmul.mubr.msk.bf16.vlgmr.msra.gmra.mxu0 %vm385_vm3, %v7739_v20  ;;  %v2254_v17 = vpop.f32.mrf.mxu1 }
 0x265   : > { %v2368_v28 = vmul.f32 %v2363_v7, %v2363_v7  ;;  %v2268_v40 = vadd.f32 %v2254_v17, %v2188_v33  ;;  %5489 = vmatprep.mubr.msk.bf16.mxu0 %vm5690_vm0, %v7721_v27  ;;  %5526 = vmatpush3.bf16.msra.mxu0 %v3904_v5  ;;  %v5678_v5 = vld [vmem:[%s7639_s1 + $0x4] ss:$8 sps:$4 sm:$0xff]  }
 0x266   : > { %v5148_v31 = vpop.f32.mrf.mxu1  ;;  %5527 = vmatprep.subr.bf16.mxu0 %v7721_v27 }
 0x267   : > { %v2364_v42 = vadd.f32 %v2350_v39, %v2268_v40  ;;  %v7448_v10 = vadd.f32 %v2368_v28, %v7365_v48 }
 0x268   : > { %5472 = vmatmul.mubr.msk.bf16.vlgmr.msra.gmra.mxu1 %vm1877_vm7, %v7770_v21  ;;  %v2259_v20 = vpop.f32.mrf.mxu1  ;;  %v5679_v21 = vld [vmem:[%s7639_s1 + $0x14] ss:$8 sps:$4 sm:$0xff]  }
 0x269   : > { %v2369_v41 = vmul.f32 %v2364_v42, %v2364_v42  ;;  %5498 = vmatpush3.bf16.msra.mxu1 %v6272_v1  ;;  %v2269_v29 = vadd.f32 %v2259_v20, %v2189_v30  ;;  %5475 = vmatprep.mubr.msk.bf16.mxu1 %vm5690_vm0, %v7721_v27 }
 0x26a   : > { %5499 = vmatprep.subr.bf16.mxu1 %v7721_v27  ;;  %v5151_v19 = vpop.f32.mrf.mxu1  ;;  %5528 = vmatpush3.bf16.msra.mxu0 %v7771_v2 }
 0x26b   : > { %v2365_v24 = vadd.f32 %v2355_v37, %v2269_v29  ;;  %5529 = vmatprep.subr.bf16.mxu0 %v7721_v27  ;;  %v7459_v48 = vadd.f32 %v2369_v41, %v7374_v62  ;;  %v7772_v62 = vld [vmem:[#allocation50_spill] sm:$0xff] }
 0x26c   : > { %5490 = vmatmul.mubr.msk.bf16.gmra.mxu0 %vm385_vm3, %v5677_v60  ;;  %v2262_v1 = vpop.f32.mrf.mxu1  ;;  %v2497_v58 = vpop.f32.mrf.mxu0  ;;  %v7777_v41 = vld [vmem:[#allocation54_spill] sm:$0xff] }
 0x26d   : > { %v2370_v39 = vmul.f32 %v2365_v24, %v2365_v24  ;;  %5500 = vmatpush3.bf16.msra.mxu1 %v6263_v61  ;;  %5493 = vmatprep.mubr.msk.bf16.mxu0 %vm5690_vm0, %v7721_v27 }
 0x26e   : > { %5501 = vmatprep.subr.bf16.mxu1 %v7721_v27  ;;  %v5152_v36 = vpop.f32.mrf.mxu1  ;;  %v5205_v59 = vpop.f32.mrf.mxu0  ;;  %5530 = vmatpush3.bf16.msra.mxu0 %v7772_v62 }
 0x26f   : > { %5531 = vmatprep.subr.bf16.mxu0 %v7721_v27  ;;  %v7472_v9 = vadd.f32 %v2370_v39, %v7387_v8 }
 0x270   : > { %5476 = vmatmul.mubr.msk.bf16.gmra.mxu1 %vm1877_vm7, %v7773_v46  ;;  %v2417_v4 = vpop.f32.mrf.mxu1  ;;  %v2500_v18 = vpop.f32.mrf.mxu0 }
 0x271   : > { %5502 = vmatpush3.bf16.msra.mxu1 %v6267_v63  ;;  %v2439_v61 = vadd.f32 %v2417_v4, %v6972_v35  ;;  %5479 = vmatprep.mubr.msk.bf16.mxu1 %vm5690_vm0, %v7721_v27 }
 0x272   : > { %5503 = vmatprep.subr.bf16.mxu1 %v7721_v27  ;;  %v5177_v6 = vpop.f32.mrf.mxu1  ;;  %v5206_v44 = vpop.f32.mrf.mxu0  ;;  %5532 = vmatpush3.bf16.msra.mxu0 %v7774_v53 }
 0x273   : > { %5533 = vmatprep.subr.bf16.mxu0 %v7721_v27  ;;  %v2519_v8 = vadd.f32 %v2497_v58, %v2439_v61 }
 0x274   : > { %v2420_v37 = vpop.f32.mrf.mxu1  ;;  %v2505_v0 = vpop.f32.mrf.mxu0  ;;  %5494 = vmatmul.mubr.msk.bf16.gmra.mxu0 %vm385_vm3, %v5794_v14 }
 0x275   : > { %5504 = vmatpush3.bf16.msra.mxu1 %v6282_v3  ;;  %v2440_v63 = vadd.f32 %v2420_v37, %v6976_v43  ;;  %5535 = vmatprep.mubr.msk.bf16.mxu0 %vm5690_vm0, %v7721_v27 }
 0x276   : > { %5505 = vmatprep.subr.bf16.mxu1 %v7721_v27  ;;  %v5178_v38 = vpop.f32.mrf.mxu1  ;;  %v5209_v45 = vpop.f32.mrf.mxu0  ;;  %5534 = vmatpush3.bf16.msra.mxu0 %v7775_v16 }
 0x277   : > { %v2520_v49 = vadd.f32 %v2500_v18, %v2440_v63  ;;  %v7779_v18 = vld [vmem:[#allocation57_spill] sm:$0xff] }
 0x278   : > { %5480 = vmatmul.mubr.msk.bf16.gmra.mxu1 %vm1877_vm7, %v7776_v52  ;;  %v2425_v26 = vpop.f32.mrf.mxu1  ;;  %v2508_v54 = vpop.f32.mrf.mxu0 }
 0x279   : > { %5506 = vmatpush3.bf16.msra.mxu1 %v6300_v12  ;;  %v2441_v14 = vadd.f32 %v2425_v26, %v7021_v56  ;;  %5513 = vmatprep.mubr.msk.bf16.mxu1 %vm5690_vm0, %v7721_v27  ;;  %v7780_v26 = vld [vmem:[#allocation56_spill] sm:$0xff] }
 0x27a   : > { %5507 = vmatprep.subr.bf16.mxu1 %v7721_v27  ;;  %v5181_v3 = vpop.f32.mrf.mxu1  ;;  %v5210_v50 = vpop.f32.mrf.mxu0 }
 0x27b   : > { %v2521_v15 = vadd.f32 %v2505_v0, %v2441_v14 }
 0x27c   : > { %v2428_v47 = vpop.f32.mrf.mxu1  ;;  %v2513_v55 = vpop.f32.mrf.mxu0  ;;  %5536 = vmatmul.mubr.msk.bf16.vlgmr.msra.gmra.mxu0 %vm1627_vm14, %v5678_v5 }
 0x27d   : > { %5508 = vmatpush3.bf16.msra.mxu1 %v6309_v13  ;;  %v2442_v12 = vadd.f32 %v2428_v47, %v7016_v51  ;;  %5539 = vmatprep.mubr.msk.bf16.mxu0 %vm5690_vm0, %v7721_v27 }
 0x27e   : > { %5509 = vmatprep.subr.bf16.mxu1 %v7721_v27  ;;  %v5182_v23 = vpop.f32.mrf.mxu1  ;;  %v5213_v57 = vpop.f32.mrf.mxu0 }
 0x27f   : > { %v2522_v33 = vadd.f32 %v2508_v54, %v2442_v12 }
 0x280   : > { %v2433_v7 = vpop.f32.mrf.mxu1  ;;  %v2516_v17 = vpop.f32.mrf.mxu0 }
 0x281   : > { %5510 = vmatpush3.bf16.msra.mxu1 %v6327_v22  ;;  %v2443_v28 = vadd.f32 %v2433_v7, %v7051_v11 }
 0x282   : > { %5511 = vmatprep.subr.bf16.mxu1 %v7721_v27  ;;  %v5185_v40 = vpop.f32.mrf.mxu1  ;;  %v5214_v13 = vpop.f32.mrf.mxu0 }
 0x283   : > { %v2523_v31 = vadd.f32 %v2513_v55, %v2443_v28 }
 0x284   : > { %v2436_v30 = vpop.f32.mrf.mxu1  ;;  %v2672_v42 = vpop.f32.mrf.mxu0  ;;  %5540 = vmatmul.mubr.msk.bf16.gmra.mxu0 %vm1627_vm14, %v5679_v21 }
 0x285   : > { %5512 = vmatpush3.bf16.msra.mxu1 %v7730_v25  ;;  %5543 = vmatprep.mubr.msk.bf16.mxu0 %vm5690_vm0, %v7721_v27  ;;  %v7778_v25 = vld [vmem:[#allocation3_spill] sm:$0xff]  ;;  %v2694_v17 = vadd.f32 %v2672_v42, %v6972_v35 }
 0x286   : > { %v5186_v22 = vpop.f32.mrf.mxu1  ;;  %v5239_v20 = vpop.f32.mrf.mxu0 }
 0x288   : > { %5514 = vmatmul.mubr.msk.bf16.vlgmr.msra.gmra.mxu1 %vm280_vm2, %v7777_v41  ;;  %v2594_v29 = vpop.f32.mrf.mxu1  ;;  %v2675_v19 = vpop.f32.mrf.mxu0 }
 0x289   : > { %v2616_v2 = vadd.f32 %v2594_v29, %v2519_v8  ;;  %5517 = vmatprep.mubr.msk.bf16.mxu1 %vm5690_vm0, %v7721_v27  ;;  %v2695_v30 = vadd.f32 %v2675_v19, %v6976_v43 }
 0x28a   : > { %v5221_v24 = vpop.f32.mrf.mxu1  ;;  %v5240_v60 = vpop.f32.mrf.mxu0 }
 0x28b   : > { %v2621_v1 = vmul.f32 %v2616_v2, %v2616_v2 }
 0x28c   : > { %v2597_v58 = vpop.f32.mrf.mxu1  ;;  %v2680_v39 = vpop.f32.mrf.mxu0  ;;  %5544 = vmatmul.mubr.msk.bf16.gmra.mxu0 %vm1627_vm14, %v7778_v25 }
 0x28d   : > { %v2626_v36 = vadd.f32 %v2621_v1, %v7427_v34  ;;  %v2617_v59 = vadd.f32 %v2597_v58, %v2520_v49  ;;  %v2696_v24 = vadd.f32 %v2680_v39, %v7021_v56 }
 0x28e   : > { %v5222_v62 = vpop.f32.mrf.mxu1  ;;  %v5243_v46 = vpop.f32.mrf.mxu0 }
 0x28f   : > { %v2622_v4 = vmul.f32 %v2617_v59, %v2617_v59 }
 0x290   : > { %5518 = vmatmul.mubr.msk.bf16.gmra.mxu1 %vm280_vm2, %v7779_v18  ;;  %v2602_v61 = vpop.f32.mrf.mxu1  ;;  %v2683_v6 = vpop.f32.mrf.mxu0 }
 0x291   : > { %v2627_v44 = vadd.f32 %v2622_v4, %v7438_v32  ;;  %v2618_v53 = vadd.f32 %v2602_v61, %v2521_v15  ;;  %5521 = vmatprep.mubr.msk.bf16.mxu1 %vm5690_vm0, %v7721_v27  ;;  %v2697_v19 = vadd.f32 %v2683_v6, %v7016_v51  ;;  %vm3977_vm0 = vcmask 48128  }
 0x292   : > { %v5225_v8 = vpop.f32.mrf.mxu1  ;;  %v5244_v37 = vpop.f32.mrf.mxu0 }
 0x293   : > { %v2623_v0 = vmul.f32 %v2618_v53, %v2618_v53 }
 0x294   : > { %v2605_v63 = vpop.f32.mrf.mxu1  ;;  %v2688_v34 = vpop.f32.mrf.mxu0 }
 0x295   : > { %v2628_v38 = vadd.f32 %v2623_v0, %v7448_v10  ;;  %v2619_v45 = vadd.f32 %v2605_v63, %v2522_v33  ;;  %v2698_v39 = vadd.f32 %v2688_v34, %v7051_v11 }
 0x296   : > { %v5226_v16 = vpop.f32.mrf.mxu1  ;;  %v5247_v49 = vpop.f32.mrf.mxu0 }
 0x297   : > { %v2624_v52 = vmul.f32 %v2619_v45, %v2619_v45 }
 0x298   : > { %5522 = vmatmul.mubr.msk.bf16.gmra.mxu1 %vm280_vm2, %v7780_v26  ;;  %v2610_v54 = vpop.f32.mrf.mxu1  ;;  %v2691_v32 = vpop.f32.mrf.mxu0 }
 0x299   : > { %v2629_v14 = vadd.f32 %v2624_v52, %v7459_v48  ;;  %v2620_v3 = vadd.f32 %v2610_v54, %v2523_v31 }
 0x29a   : > { %v5229_v27 = vpop.f32.mrf.mxu1  ;;  %v5248_v50 = vpop.f32.mrf.mxu0 }
 0x29b   : > { %v2625_v15 = vmul.f32 %v2620_v3, %v2620_v3 }
 0x29c   : > { %v2613_v47 = vpop.f32.mrf.mxu1  ;;  %v2857_v55 = vpop.f32.mrf.mxu0 }
 0x29d   : > { %v2630_v5 = vadd.f32 %v2625_v15, %v7472_v9 }
 0x29e   : > { %v5230_v10 = vpop.f32.mrf.mxu1  ;;  %v5285_v12 = vpop.f32.mrf.mxu0 }
 0x2a0   : > { %v2860_v23 = vpop.f32.mrf.mxu0 }
 0x2a2   : > { %v5286_v57 = vpop.f32.mrf.mxu0 }
 0x2a4   : > { %v2865_v33 = vpop.f32.mrf.mxu0 }
 0x2a6   : > { %v5289_v7 = vpop.f32.mrf.mxu0 }
 0x2a8   : > { %v2752_v28 = vpop.f32.mrf.mxu1  ;;  %v2868_v40 = vpop.f32.mrf.mxu0 }
 0x2a9   : > { %v2774_v13 = vadd.f32 %v2752_v28, %v2694_v17 }
 0x2aa   : > { %v5267_v48 = vpop.f32.mrf.mxu1  ;;  %v5290_v31 = vpop.f32.mrf.mxu0 }
 0x2ab   : > { %v2879_v21 = vadd.f32 %v2857_v55, %v2774_v13 }
 0x2ac   : > { %v2755_v22 = vpop.f32.mrf.mxu1  ;;  %v2873_v20 = vpop.f32.mrf.mxu0 }
 0x2ad   : > { %v2884_v41 = vmul.f32 %v2879_v21, %v2879_v21  ;;  %v2775_v9 = vadd.f32 %v2755_v22, %v2695_v30 }
 0x2ae   : > { %v5268_v29 = vpop.f32.mrf.mxu1  ;;  %v5293_v2 = vpop.f32.mrf.mxu0 }
 0x2af   : > { %v2880_v60 = vadd.f32 %v2860_v23, %v2775_v9  ;;  %v7537_v1 = vadd.f32 %v2884_v41, %v2626_v36 }
 0x2b0   : > { %v2760_v42 = vpop.f32.mrf.mxu1  ;;  %v2876_v58 = vpop.f32.mrf.mxu0 }
 0x2b1   : > { %v2885_v25 = vmul.f32 %v2880_v60, %v2880_v60  ;;  %v2776_v59 = vadd.f32 %v2760_v42, %v2696_v24 }
 0x2b2   : > { %v5271_v62 = vpop.f32.mrf.mxu1  ;;  %v5294_v46 = vpop.f32.mrf.mxu0 }
 0x2b3   : > { %v2881_v4 = vadd.f32 %v2865_v33, %v2776_v59  ;;  %v7540_v18 = vadd.f32 %v2885_v25, %v2627_v44 }
 0x2b4   : > { %v2763_v61 = vpop.f32.mrf.mxu1 }
 0x2b5   : > { %v2886_v53 = vmul.f32 %v2881_v4, %v2881_v4  ;;  %v2777_v8 = vadd.f32 %v2763_v61, %v2697_v19 }
 0x2b6   : > { %v5272_v37 = vpop.f32.mrf.mxu1 }
 0x2b7   : > { %v2882_v0 = vadd.f32 %v2868_v40, %v2777_v8  ;;  %v7543_v36 = vadd.f32 %v2886_v53, %v2628_v38 }
 0x2b8   : > { %v2768_v63 = vpop.f32.mrf.mxu1 }
 0x2b9   : > { %v2887_v45 = vmul.f32 %v2882_v0, %v2882_v0  ;;  %v2778_v16 = vadd.f32 %v2768_v63, %v2698_v39 }
 0x2ba   : > { %v5275_v49 = vpop.f32.mrf.mxu1 }
 0x2bb   : > { %v2883_v52 = vadd.f32 %v2873_v20, %v2778_v16  ;;  %v7545_v26 = vadd.f32 %v2887_v45, %v2629_v14 }
 0x2bc   : > { %v2771_v6 = vpop.f32.mrf.mxu1  ;;  %v3014_v54 = vpop.f32.mrf.mxu0 }
 0x2bd   : > { %v2888_v44 = vmul.f32 %v2883_v52, %v2883_v52 }
 0x2be   : > { %v5276_v32 = vpop.f32.mrf.mxu1  ;;  %v5329_v3 = vpop.f32.mrf.mxu0 }
 0x2bf   : > { %v7547_v27 = vadd.f32 %v2888_v44, %v2630_v5 }
 0x2c0   : > { %v2934_v50 = vpop.f32.mrf.mxu1  ;;  %v3017_v15 = vpop.f32.mrf.mxu0 }
 0x2c1   : > { %v2956_v34 = vadd.f32 %v2934_v50, %v6972_v35 }
 0x2c2   : > { %v5301_v38 = vpop.f32.mrf.mxu1  ;;  %v5330_v47 = vpop.f32.mrf.mxu0 }
 0x2c3   : > { %v3036_v55 = vadd.f32 %v3014_v54, %v2956_v34 }
 0x2c4   : > { %v2937_v10 = vpop.f32.mrf.mxu1  ;;  %v3022_v12 = vpop.f32.mrf.mxu0 }
 0x2c5   : > { %v2957_v23 = vadd.f32 %v2937_v10, %v6976_v43 }
 0x2c6   : > { %v5302_v14 = vpop.f32.mrf.mxu1  ;;  %v5333_v57 = vpop.f32.mrf.mxu0 }
 0x2c7   : > { %v3037_v33 = vadd.f32 %v3017_v15, %v2957_v23 }
 0x2c8   : > { %v2942_v7 = vpop.f32.mrf.mxu1  ;;  %v3025_v17 = vpop.f32.mrf.mxu0 }
 0x2c9   : > { %v2958_v28 = vadd.f32 %v2942_v7, %v7021_v56 }
 0x2ca   : > { %v5305_v5 = vpop.f32.mrf.mxu1  ;;  %v5334_v40 = vpop.f32.mrf.mxu0 }
 0x2cb   : > { %v3038_v13 = vadd.f32 %v3022_v12, %v2958_v28 }
 0x2cc   : > { %v2945_v48 = vpop.f32.mrf.mxu1  ;;  %v3030_v31 = vpop.f32.mrf.mxu0 }
 0x2cd   : > { %v2959_v30 = vadd.f32 %v2945_v48, %v7016_v51 }
 0x2ce   : > { %v5306_v21 = vpop.f32.mrf.mxu1  ;;  %v5337_v22 = vpop.f32.mrf.mxu0 }
 0x2cf   : > { %v3039_v20 = vadd.f32 %v3025_v17, %v2959_v30 }
 0x2d0   : > { %v2950_v41 = vpop.f32.mrf.mxu1  ;;  %v3033_v9 = vpop.f32.mrf.mxu0 }
 0x2d1   : > { %v2960_v29 = vadd.f32 %v2950_v41, %v7051_v11 }
 0x2d2   : > { %v5309_v2 = vpop.f32.mrf.mxu1  ;;  %v5338_v24 = vpop.f32.mrf.mxu0 }
 0x2d3   : > { %v3040_v60 = vadd.f32 %v3030_v31, %v2960_v29 }
 0x2d4   : > { %v2953_v42 = vpop.f32.mrf.mxu1  ;;  %v3197_v58 = vpop.f32.mrf.mxu0 }
 0x2d5   : > { %v3219_v30 = vadd.f32 %v3197_v58, %v6972_v35 }
 0x2d6   : > { %v5310_v25 = vpop.f32.mrf.mxu1  ;;  %v5363_v59 = vpop.f32.mrf.mxu0 }
 0x2d8   : > { %v3120_v62 = vpop.f32.mrf.mxu1  ;;  %v3200_v46 = vpop.f32.mrf.mxu0 }
 0x2d9   : > { %v3142_v19 = vadd.f32 %v3120_v62, %v3036_v55  ;;  %v3220_v9 = vadd.f32 %v3200_v46, %v6976_v43 }
 0x2da   : > { %v5347_v4 = vpop.f32.mrf.mxu1  ;;  %v5364_v61 = vpop.f32.mrf.mxu0 }
 0x2db   : > { %v3147_v53 = vmul.f32 %v3142_v19, %v3142_v19 }
 0x2dc   : > { %v3123_v8 = vpop.f32.mrf.mxu1  ;;  %v3205_v37 = vpop.f32.mrf.mxu0 }
 0x2dd   : > { %v3152_v39 = vadd.f32 %v3147_v53, %v7537_v1  ;;  %v3143_v0 = vadd.f32 %v3123_v8, %v3037_v33  ;;  %v3221_v59 = vadd.f32 %v3205_v37, %v7021_v56 }
 0x2de   : > { %v5348_v63 = vpop.f32.mrf.mxu1  ;;  %v5367_v45 = vpop.f32.mrf.mxu0 }
 0x2df   : > { %v3148_v16 = vmul.f32 %v3143_v0, %v3143_v0 }
 0x2e0   : > { %v3128_v49 = vpop.f32.mrf.mxu1  ;;  %v3208_v52 = vpop.f32.mrf.mxu0 }
 0x2e1   : > { %v3153_v6 = vadd.f32 %v3148_v16, %v7540_v18  ;;  %v3144_v54 = vadd.f32 %v3128_v49, %v3038_v13  ;;  %v3222_v46 = vadd.f32 %v3208_v52, %v7016_v51 }
 0x2e2   : > { %v5351_v44 = vpop.f32.mrf.mxu1  ;;  %v5368_v32 = vpop.f32.mrf.mxu0 }
 0x2e3   : > { %v3149_v3 = vmul.f32 %v3144_v54, %v3144_v54 }
 0x2e4   : > { %v3131_v50 = vpop.f32.mrf.mxu1  ;;  %v3213_v15 = vpop.f32.mrf.mxu0 }
 0x2e5   : > { %v3154_v34 = vadd.f32 %v3149_v3, %v7543_v36  ;;  %v3145_v38 = vadd.f32 %v3131_v50, %v3039_v20  ;;  %v3223_v37 = vadd.f32 %v3213_v15, %v7051_v11 }
 0x2e6   : > { %v5352_v47 = vpop.f32.mrf.mxu1  ;;  %v5371_v55 = vpop.f32.mrf.mxu0 }
 0x2e7   : > { %v3150_v1 = vmul.f32 %v3145_v38, %v3145_v38 }
 0x2e8   : > { %v3136_v10 = vpop.f32.mrf.mxu1  ;;  %v3216_v12 = vpop.f32.mrf.mxu0 }
 0x2e9   : > { %v3155_v23 = vadd.f32 %v3150_v1, %v7545_v26  ;;  %v3146_v14 = vadd.f32 %v3136_v10, %v3040_v60 }
 0x2ea   : > { %v5355_v57 = vpop.f32.mrf.mxu1  ;;  %v5372_v33 = vpop.f32.mrf.mxu0 }
 0x2eb   : > { %v3151_v18 = vmul.f32 %v3146_v14, %v3146_v14 }
 0x2ec   : > { %v3139_v7 = vpop.f32.mrf.mxu1  ;;  %v3392_v17 = vpop.f32.mrf.mxu0 }
 0x2ed   : > { %v3156_v28 = vadd.f32 %v3151_v18, %v7547_v27 }
 0x2ee   : > { %v5356_v5 = vpop.f32.mrf.mxu1  ;;  %v5411_v40 = vpop.f32.mrf.mxu0 }
 0x2f0   : > { %v3395_v13 = vpop.f32.mrf.mxu0 }
 0x2f2   : > { %v5412_v36 = vpop.f32.mrf.mxu0 }
 0x2f4   : > { %v3400_v48 = vpop.f32.mrf.mxu0 }
 0x2f6   : > { %v5415_v31 = vpop.f32.mrf.mxu0 }
 0x2f8   : > { %v3277_v21 = vpop.f32.mrf.mxu1  ;;  %v3403_v22 = vpop.f32.mrf.mxu0 }
 0x2f9   : > { %v3299_v20 = vadd.f32 %v3277_v21, %v3219_v30 }
 0x2fa   : > { %v5391_v26 = vpop.f32.mrf.mxu1  ;;  %v5416_v41 = vpop.f32.mrf.mxu0 }
 0x2fb   : > { %v3414_v29 = vadd.f32 %v3392_v17, %v3299_v20 }
 0x2fc   : > { %v3280_v2 = vpop.f32.mrf.mxu1  ;;  %v3408_v24 = vpop.f32.mrf.mxu0 }
 0x2fd   : > { %v3419_v60 = vmul.f32 %v3414_v29, %v3414_v29  ;;  %v3300_v27 = vadd.f32 %v3280_v2, %v3220_v9 }
 0x2fe   : > { %v5392_v42 = vpop.f32.mrf.mxu1  ;;  %v5419_v25 = vpop.f32.mrf.mxu0 }
 0x2ff   : > { %v3415_v62 = vadd.f32 %v3395_v13, %v3300_v27  ;;  %v7562_v19 = vadd.f32 %v3419_v60, %v3152_v39 }
 0x300   : > { %v3285_v58 = vpop.f32.mrf.mxu1  ;;  %v3411_v4 = vpop.f32.mrf.mxu0 }
 0x301   : > { %v3420_v61 = vmul.f32 %v3415_v62, %v3415_v62  ;;  %v3301_v53 = vadd.f32 %v3285_v58, %v3221_v59 }
 0x302   : > { %v5395_v8 = vpop.f32.mrf.mxu1  ;;  %v5420_v0 = vpop.f32.mrf.mxu0 }
 0x303   : > { %v3416_v63 = vadd.f32 %v3400_v48, %v3301_v53  ;;  %v7565_v45 = vadd.f32 %v3420_v61, %v3153_v6 }
 0x304   : > { %v3288_v16 = vpop.f32.mrf.mxu1 }
 0x305   : > { %v3421_v49 = vmul.f32 %v3416_v63, %v3416_v63  ;;  %v3302_v54 = vadd.f32 %v3288_v16, %v3222_v46 }
 0x306   : > { %v5396_v44 = vpop.f32.mrf.mxu1 }
 0x307   : > { %v3417_v32 = vadd.f32 %v3403_v22, %v3302_v54  ;;  %v7568_v39 = vadd.f32 %v3421_v49, %v3154_v34 }
 0x308   : > { %v3293_v3 = vpop.f32.mrf.mxu1 }
 0x309   : > { %v3422_v50 = vmul.f32 %v3417_v32, %v3417_v32  ;;  %v3303_v38 = vadd.f32 %v3293_v3, %v3223_v37 }
 0x30a   : > { %v5399_v47 = vpop.f32.mrf.mxu1 }
 0x30b   : > { %v3418_v55 = vadd.f32 %v3408_v24, %v3303_v38  ;;  %v7570_v1 = vadd.f32 %v3422_v50, %v3155_v23 }
 0x30c   : > { %v3296_v52 = vpop.f32.mrf.mxu1  ;;  %v3549_v10 = vpop.f32.mrf.mxu0 }
 0x30d   : > { %v3423_v6 = vmul.f32 %v3418_v55, %v3418_v55 }
 0x30e   : > { %v5400_v12 = vpop.f32.mrf.mxu1  ;;  %v5453_v14 = vpop.f32.mrf.mxu0 }
 0x30f   : > { %v7572_v57 = vadd.f32 %v3423_v6, %v3156_v28 }
 0x310   : > { %v3469_v33 = vpop.f32.mrf.mxu1  ;;  %v3552_v18 = vpop.f32.mrf.mxu0 }
 0x311   : > { %v3491_v38 = vadd.f32 %v3469_v33, %v6972_v35 }
 0x312   : > { %v5425_v15 = vpop.f32.mrf.mxu1  ;;  %v5454_v7 = vpop.f32.mrf.mxu0 }
 0x313   : > { %v3571_v6 = vadd.f32 %v3549_v10, %v3491_v38 }
 0x314   : > { %v3472_v34 = vpop.f32.mrf.mxu1  ;;  %v7574_v17 = vpop.f32.mrf.mxu0 }
 0x315   : > { %v3492_v14 = vadd.f32 %v3472_v34, %v6976_v43 }
 0x316   : > { %v5426_v5 = vpop.f32.mrf.mxu1  ;;  %v5457_v40 = vpop.f32.mrf.mxu0 }
 0x318   : > { %v3477_v13 = vpop.f32.mrf.mxu1  ;;  %v7576_v36 = vpop.f32.mrf.mxu0 }
 0x319   : > { %v3493_v40 = vadd.f32 %v3477_v13, %v7021_v56 }
 0x31a   : > { %v5429_v23 = vpop.f32.mrf.mxu1  ;;  %v5458_v48 = vpop.f32.mrf.mxu0 }
 0x31b   : > { %v3572_v48 = vadd.f32 %v3552_v18, %v3492_v14  ;;  %v3573_v34 = vadd.f32 %v7574_v17, %v3493_v40 }
 0x31c   : > { %v3480_v31 = vpop.f32.mrf.mxu1  ;;  %v7578_v30 = vpop.f32.mrf.mxu0 }
 0x31e   : > { %v5430_v21 = vpop.f32.mrf.mxu1  ;;  %v5461_v28 = vpop.f32.mrf.mxu0 }
 0x320   : > { %v7580_v22 = vpop.f32.mrf.mxu1  ;;  %v3568_v20 = vpop.f32.mrf.mxu0 }
 0x322   : > { %v5433_v26 = vpop.f32.mrf.mxu1  ;;  %v5462_v41 = vpop.f32.mrf.mxu0 }
 0x323   : > { %v3494_v41 = vadd.f32 %v3480_v31, %v7016_v51 }
 0x324   : > { %v3488_v9 = vpop.f32.mrf.mxu1  ;;  %v3745_v29 = vpop.f32.mrf.mxu0 }
 0x325   : > { %v3767_v23 = vadd.f32 %v3745_v29, %v6972_v35 }
 0x326   : > { %v5434_v2 = vpop.f32.mrf.mxu1  ;;  %v5487_v24 = vpop.f32.mrf.mxu0 }
 0x328   : > { %v3665_v60 = vpop.f32.mrf.mxu1  ;;  %v3748_v27 = vpop.f32.mrf.mxu0 }
 0x329   : > { %v3687_v15 = vadd.f32 %v3665_v60, %v3571_v6  ;;  %v3768_v2 = vadd.f32 %v3748_v27, %v6976_v43 }
 0x32a   : > { %v5473_v42 = vpop.f32.mrf.mxu1  ;;  %v5488_v25 = vpop.f32.mrf.mxu0 }
 0x32b   : > { %v3692_v21 = vmul.f32 %v3687_v15, %v3687_v15 }
 0x32c   : > { %v3668_v59 = vpop.f32.mrf.mxu1  ;;  %v3753_v62 = vpop.f32.mrf.mxu0 }
 0x32d   : > { %v3688_v26 = vadd.f32 %v3668_v59, %v3572_v48  ;;  %v3697_v60 = vadd.f32 %v3692_v21, %v7562_v19  ;;  %v3574_v59 = vadd.f32 %v7576_v36, %v3494_v41  ;;  %v3769_v43 = vadd.f32 %v3753_v62, %v7021_v56 }
 0x32e   : > { %v5474_v58 = vpop.f32.mrf.mxu1  ;;  %v5491_v4 = vpop.f32.mrf.mxu0 }
 0x32f   : > { %v3693_v35 = vmul.f32 %v3688_v26, %v3688_v26  ;;  %v3495_v4 = vadd.f32 %v7580_v22, %v7051_v11 }
 0x330   : > { %v3673_v61 = vpop.f32.mrf.mxu1  ;;  %v3756_v53 = vpop.f32.mrf.mxu0 }
 0x331   : > { %v3689_v18 = vadd.f32 %v3673_v61, %v3573_v34  ;;  %v3575_v22 = vadd.f32 %v7578_v30, %v3495_v4 }
 0x332   : > { %v5477_v8 = vpop.f32.mrf.mxu1  ;;  %v5492_v0 = vpop.f32.mrf.mxu0 }
 0x333   : > { %v3694_v61 = vmul.f32 %v3689_v18, %v3689_v18 }
 0x334   : > { %v3676_v46 = vpop.f32.mrf.mxu1  ;;  %v7582_v63 = vpop.f32.mrf.mxu0 }
 0x335   : > { %v3690_v8 = vadd.f32 %v3676_v46, %v3574_v59  ;;  %v3699_v46 = vadd.f32 %v3694_v61, %v7568_v39 }
 0x336   : > { %v5478_v16 = vpop.f32.mrf.mxu1  ;;  %v5495_v49 = vpop.f32.mrf.mxu0 }
 0x337   : > { %v3698_v16 = vadd.f32 %v3693_v35, %v7565_v45  ;;  %v3695_v62 = vmul.f32 %v3690_v8, %v3690_v8 }
 0x338   : > { %v3681_v54 = vpop.f32.mrf.mxu1  ;;  %v3764_v44 = vpop.f32.mrf.mxu0 }
 0x339   : > { %v3691_v38 = vadd.f32 %v3681_v54, %v3575_v22 }
 0x33a   : > { %v5481_v37 = vpop.f32.mrf.mxu1  ;;  %v5496_v32 = vpop.f32.mrf.mxu0 }
 0x33b   : > { %v3770_v32 = vadd.f32 %v3756_v53, %v7016_v51  ;;  %v3700_v51 = vadd.f32 %v3695_v62, %v7570_v1  ;;  %v3696_v14 = vmul.f32 %v3691_v38, %v3691_v38 }
 0x33c   : > { %v3684_v3 = vpop.f32.mrf.mxu1  ;;  %v3940_v50 = vpop.f32.mrf.mxu0 }
 0x33e   : > { %v5482_v47 = vpop.f32.mrf.mxu1  ;;  %v5537_v55 = vpop.f32.mrf.mxu0 }
 0x340   : > { %v3943_v52 = vpop.f32.mrf.mxu0 }
 0x342   : > { %v5538_v12 = vpop.f32.mrf.mxu0 }
 0x344   : > { %v3948_v7 = vpop.f32.mrf.mxu0 }
 0x346   : > { %v5541_v5 = vpop.f32.mrf.mxu0 }
 0x348   : > { %v3821_v28 = vpop.f32.mrf.mxu1  ;;  %v3951_v20 = vpop.f32.mrf.mxu0 }
 0x349   : > { %v3843_v33 = vadd.f32 %v3821_v28, %v3767_v23 }
 0x34a   : > { %v5515_v9 = vpop.f32.mrf.mxu1  ;;  %v5542_v10 = vpop.f32.mrf.mxu0 }
 0x34b   : > { %v3962_v24 = vadd.f32 %v3940_v50, %v3843_v33 }
 0x34c   : > { %v3824_v13 = vpop.f32.mrf.mxu1  ;;  %v3956_v42 = vpop.f32.mrf.mxu0 }
 0x34d   : > { %v3967_v29 = vmul.f32 %v3962_v24, %v3962_v24  ;;  %v3844_v25 = vadd.f32 %v3824_v13, %v3768_v2 }
 0x34e   : > { %v5516_v58 = vpop.f32.mrf.mxu1  ;;  %v5545_v31 = vpop.f32.mrf.mxu0 }
 0x34f   : > { %v3972_v17 = vadd.f32 %v3967_v29, %v3697_v60  ;;  %v3963_v27 = vadd.f32 %v3943_v52, %v3844_v25  ;;  %v3771_v52 = vadd.f32 %v7582_v63, %v7051_v11  ;;  %v3701_v11 = vadd.f32 %v3696_v14, %v7572_v57 }
 0x350   : > { %v3829_v19 = vpop.f32.mrf.mxu1  ;;  %v3959_v0 = vpop.f32.mrf.mxu0 }
 0x351   : > { %3978 = vst.msk [vmem:[#allocation2] sm:$0xff] %vm3977_vm0, %v3972_v17  ;;  %v3968_v49 = vmul.f32 %v3963_v27, %v3963_v27  ;;  %v3845_v36 = vadd.f32 %v3829_v19, %v3769_v43 }
 0x352   : > { %v5519_v44 = vpop.f32.mrf.mxu1  ;;  %v5546_v37 = vpop.f32.mrf.mxu0 }
 0x353   : > { %v3973_v3 = vadd.f32 %v3968_v49, %v3698_v16  ;;  %v3964_v56 = vadd.f32 %v3948_v7, %v3845_v36 }
 0x354   : > { %v3832_v50 = vpop.f32.mrf.mxu1 }
 0x355   : > { %3979 = vst.msk [vmem:[#allocation2 + $0x8] sm:$0xff] %vm3977_vm0, %v3973_v3  ;;  %v3969_v45 = vmul.f32 %v3964_v56, %v3964_v56  ;;  %v3846_v47 = vadd.f32 %v3832_v50, %v3770_v32 }
 0x356   : > { %v5520_v55 = vpop.f32.mrf.mxu1 }
 0x357   : > { %v3974_v6 = vadd.f32 %v3969_v45, %v3699_v46  ;;  %v3965_v12 = vadd.f32 %v3951_v20, %v3846_v47 }
 0x358   : > { %v3837_v30 = vpop.f32.mrf.mxu1  ;;  %v3983_v53 = vld [vmem:[#allocation2] sm:$0xff] }
 0x359   : > { %3980 = vst.msk [vmem:[#allocation2 + $0x10] sm:$0xff] %vm3977_vm0, %v3974_v6  ;;  %v3970_v15 = vmul.f32 %v3965_v12, %v3965_v12  ;;  %v3847_v39 = vadd.f32 %v3837_v30, %v3771_v52  ;;  %4013 = vrot.lane.b32.xlu1 %v3983_v53, %s5697_s8  ;;  %3993 = vrot.lane.b32.xlu0 %v3983_v53, %s5689_s18 }
 0x35a   : > { %v5523_v54 = vpop.f32.mrf.mxu1 }
 0x35b   : > { %v3975_v7 = vadd.f32 %v3970_v15, %v3700_v51  ;;  %v3966_v5 = vadd.f32 %v3956_v42, %v3847_v39 }
 0x35c   : > { %v3840_v40 = vpop.f32.mrf.mxu1  ;;  %v3984_v48 = vld [vmem:[#allocation2 + $0x8] sm:$0xff] }
 0x35d   : > { %3981 = vst.msk [vmem:[#allocation2 + $0x18] sm:$0xff] %vm3977_vm0, %v3975_v7  ;;  %v3971_v1 = vmul.f32 %v3966_v5, %v3966_v5  ;;  %4053 = vrot.lane.b32.xlu1 %v3983_v53, %s5708_s27  ;;  %4033 = vrot.lane.b32.xlu0 %v3983_v53, %s5709_s28 }
 0x35e   : > { %v5524_v63 = vpop.f32.mrf.mxu1 }
 0x35f   : > { %v3976_v23 = vadd.f32 %v3971_v1, %v3701_v11 }
 0x360   : > { %v3985_v21 = vld [vmem:[#allocation2 + $0x10] sm:$0xff] }
 0x361   : > { %3982 = vst.msk [vmem:[#allocation2 + $0x20] sm:$0xff] %vm3977_vm0, %v3976_v23  ;;  %4015 = vrot.lane.b32.xlu0 %v3984_v48, %s5697_s8  ;;  %3995 = vrot.lane.b32.xlu1 %v3984_v48, %s5689_s18 }
 0x364   : > { %v3986_v57 = vld [vmem:[#allocation2 + $0x18] sm:$0xff] }
 0x365   : > { %4055 = vrot.lane.b32.xlu0 %v3984_v48, %s5708_s27  ;;  %4035 = vrot.lane.b32.xlu1 %v3984_v48, %s5709_s28 }
 0x368   : > { %v3987_v28 = vld [vmem:[#allocation2 + $0x20] sm:$0xff] }
 0x369   : > { %4017 = vrot.lane.b32.xlu1 %v3985_v21, %s5697_s8  ;;  %3997 = vrot.lane.b32.xlu0 %v3985_v21, %s5689_s18 }
 0x36d   : > { %4057 = vrot.lane.b32.xlu1 %v3985_v21, %s5708_s27  ;;  %4037 = vrot.lane.b32.xlu0 %v3985_v21, %s5709_s28 }
 0x371   : > { %4019 = vrot.lane.b32.xlu0 %v3986_v57, %s5697_s8  ;;  %3999 = vrot.lane.b32.xlu1 %v3986_v57, %s5689_s18 }
 0x375   : > { %4039 = vrot.lane.b32.xlu1 %v3986_v57, %s5709_s28  ;;  %4001 = vrot.lane.b32.xlu0 %v3987_v28, %s5689_s18  ;;  %s5548_s18 = smul.u32 40, %s7782_s13 }
 0x377   : > { %s7623_s30 = scalar_lea.vmem %s7641_s3, %s5548_s18 }
 0x379   : > { %4021 = vrot.lane.b32.xlu1 %v3987_v28, %s5697_s8  ;;  %4041 = vrot.lane.b32.xlu0 %v3987_v28, %s5709_s28 }
 0x37d   : > { %4061 = vrot.lane.b32.xlu1 %v3987_v28, %s5708_s27  ;;  %4059 = vrot.lane.b32.xlu0 %v3986_v57, %s5708_s27 }
 0x3cb   : > { %v4014_v20 = vpop.permute.xlu1 %4013  ;;  %v3994_v26 = vpop.permute.xlu0 %3993 }
 0x3cc   : > { %v4008_v33 = vadd.f32 %v3994_v26, %v3983_v53 }
 0x3ce   : > { %v4028_v41 = vadd.f32 %v4014_v20, %v4008_v33 }
 0x3cf   : > { %v4054_v9 = vpop.permute.xlu1 %4053  ;;  %v4034_v10 = vpop.permute.xlu0 %4033 }
 0x3d0   : > { %v4048_v2 = vadd.f32 %v4034_v10, %v4028_v41 }
 0x3d2   : > { %v4068_v34 = vadd.f32 %v4054_v9, %v4048_v2 }
 0x3d3   : > { %v4016_v24 = vpop.permute.xlu0 %4015  ;;  %v3996_v60 = vpop.permute.xlu1 %3995 }
 0x3d4   : > { %v4073_v13 = vmul.f32 0.013333334, %v4068_v34  ;;  %v4009_v42 = vadd.f32 %v3996_v60, %v3984_v48 }
 0x3d6   : > { %5660 = vlog2.f32 %v4073_v13  ;;  %v4029_v35 = vadd.f32 %v4016_v24, %v4009_v42 }
 0x3d7   : > { %v4056_v18 = vpop.permute.xlu0 %4055  ;;  %v4036_v29 = vpop.permute.xlu1 %4035 }
 0x3d8   : > { %v4049_v25 = vadd.f32 %v4036_v29, %v4029_v35 }
 0x3da   : > { %v4069_v59 = vadd.f32 %v4056_v18, %v4049_v25 }
 0x3db   : > { %v4018_v58 = vpop.permute.xlu1 %4017  ;;  %v3998_v31 = vpop.permute.xlu0 %3997 }
 0x3dc   : > { %v4074_v4 = vmul.f32 0.013333334, %v4069_v59  ;;  %v4010_v43 = vadd.f32 %v3998_v31, %v3985_v21 }
 0x3de   : > { %5662 = vlog2.f32 %v4074_v4  ;;  %v4030_v17 = vadd.f32 %v4018_v58, %v4010_v43 }
 0x3df   : > { %v4058_v27 = vpop.permute.xlu1 %4057  ;;  %v4038_v8 = vpop.permute.xlu0 %4037 }
 0x3e0   : > { %v4050_v19 = vadd.f32 %v4038_v8, %v4030_v17 }
 0x3e2   : > { %v4070_v0 = vadd.f32 %v4058_v27, %v4050_v19 }
 0x3e3   : > { %v5661_v16 = vpop.eup %5660  ;;  %v4020_v61 = vpop.permute.xlu0 %4019 }
 0x3e4   : > { %v4000_v49 = vpop.permute.xlu1 %3999  ;;  %v4079_v36 = vmul.f32 0.6931472, %v5661_v16  ;;  %v4075_v44 = vmul.f32 0.013333334, %v4070_v0 }
 0x3e5   : > { %v4011_v32 = vadd.f32 %v4000_v49, %v3986_v57 }
 0x3e6   : > { %v4088_v37 = vmax.f32 %v4079_v36, 1e-07  ;;  %5664 = vlog2.f32 %v4075_v44 }
 0x3e7   : > { %v4002_v3 = vpop.permute.xlu0 %4001  ;;  %v4031_v62 = vadd.f32 %v4020_v61, %v4011_v32 }
 0x3e8   : > { %v4040_v22 = vpop.permute.xlu1 %4039  ;;  %v4093_v56 = vmin.f32 %v4088_v37, 10000000.0  ;;  %v4012_v50 = vadd.f32 %v4002_v3, %v3987_v28 }
 0x3e9   : > { %v4051_v6 = vadd.f32 %v4040_v22, %v4031_v62 }
 0x3ea   : > { %4099 = vst.msk [vmem:[%s7623_s30] sm:$0xff] %vm4098_vm1, %v4093_v56 }
 0x3eb   : > { %v5663_v46 = vpop.eup %5662  ;;  %v4042_v45 = vpop.permute.xlu0 %4041 }
 0x3ec   : > { %v4022_v38 = vpop.permute.xlu1 %4021  ;;  %v4081_v47 = vmul.f32 0.6931472, %v5663_v46 }
 0x3ed   : > { %v4032_v55 = vadd.f32 %v4022_v38, %v4012_v50 }
 0x3ee   : > { %v4089_v52 = vmax.f32 %v4081_v47, 1e-07 }
 0x3ef   : > { %v4052_v12 = vadd.f32 %v4042_v45, %v4032_v55  ;;  %v4060_v30 = vpop.permute.xlu0 %4059 }
 0x3f0   : > { %v4062_v51 = vpop.permute.xlu1 %4061  ;;  %v4094_v53 = vmin.f32 %v4089_v52, 10000000.0  ;;  %v4071_v15 = vadd.f32 %v4060_v30, %v4051_v6 }
 0x3f1   : > { %v4072_v14 = vadd.f32 %v4062_v51, %v4052_v12 }
 0x3f2   : > { %4100 = vst.msk [vmem:[%s7623_s30 + $0x8] sm:$0xff] %vm4098_vm1, %v4094_v53  ;;  %v4076_v54 = vmul.f32 0.013333334, %v4071_v15 }
 0x3f3   : > { %v4077_v39 = vmul.f32 0.013333334, %v4072_v14  ;;  %v5665_v7 = vpop.eup %5664 }
 0x3f4   : > { %v4083_v5 = vmul.f32 0.6931472, %v5665_v7 }
 0x3f5   : > { %5666 = vlog2.f32 %v4077_v39 }
 0x3f6   : > { %5668 = vlog2.f32 %v4076_v54  ;;  %v4090_v40 = vmax.f32 %v4083_v5, 1e-07 }
 0x3f8   : > { %v4095_v11 = vmin.f32 %v4090_v40, 10000000.0 }
 0x3fa   : > { %4101 = vst.msk [vmem:[%s7623_s30 + $0x10] sm:$0xff] %vm4098_vm1, %v4095_v11 }
 0x402   : > { %v5667_v1 = vpop.eup %5666 }
 0x403   : > { %v5669_v63 = vpop.eup %5668  ;;  %v4087_v23 = vmul.f32 0.6931472, %v5667_v1 }
 0x404   : > { %v4085_v48 = vmul.f32 0.6931472, %v5669_v63 }
 0x405   : > { %v4092_v21 = vmax.f32 %v4087_v23, 1e-07 }
 0x406   : > { %v4091_v57 = vmax.f32 %v4085_v48, 1e-07 }
 0x407   : > { %v4097_v28 = vmin.f32 %v4092_v21, 10000000.0 }
 0x408   : > { %v4096_v20 = vmin.f32 %v4091_v57, 10000000.0 }
 0x409   : > { %4103 = vst.msk [vmem:[%s7623_s30 + $0x20] sm:$0xff] %vm4098_vm1, %v4097_v28 }
 0x40a   : > { %4102 = vst.msk [vmem:[%s7623_s30 + $0x18] sm:$0xff] %vm4098_vm1, %v4096_v20 }
 0x40b PF: > { %s13_s12 = sadd.s32 1, %s5686_s12  }
 0x40c   : > { %p10_p4 = scmp.ge.s32.totalorder %s13_s12, 4  }
 0x40e   :  { %12 = sbr.rel (!%p10_p4) target bundleno = 1 (0x1), region = 62 }

</bundles_post_ra>
